<compile_context>
chip_gen: v7x
topology: tpu7x:2x2x1
jax: 0.10.0
libtpu: 0.0.40
codegen_flags: <defaults>
</compile_context>

<pallas_src>
import functools

import jax
import jax.numpy as jnp
from jax import lax
from jax.experimental import pallas as pl
from jax.experimental.pallas import tpu as pltpu

# ---- small, self-consistent hyper-parameters (module defaults scaled down) ----
EMBEDDING_DIM = 32          # module default 256 (configurable via __init__)
VOCAB_SIZE = 50             # module default 10000
SEQ_LEN = 33                # module default 87000
NUM_CLASSES = 1
CONV_OUT = 100              # fixed in the module
C_PAD = 128                 # conv channels zero-padded to one full lane width
KERNEL_SIZE = 4
CONV_PAD = 1
L_PAD = SEQ_LEN + 2 * CONV_PAD                      # 35 (edge-padded embedding length)
L_CONV = L_PAD - KERNEL_SIZE + 1                    # 32
L_POOL = L_CONV // 4                                # 8 (max_pool1d(kernel=4, stride=4))
LSTM_HIDDEN = 32            # fixed in the module
ATTN_DIM = 2 * LSTM_HIDDEN                          # 64 (bidirectional concat)
GATE_LANES = 8 * LSTM_HIDDEN                        # 256 fused-gate lanes (4 gates x 2 dirs)
FC1_IN = ATTN_DIM * L_POOL                          # 64 * int((seq_len-1)/4) = 512
FC1_OUT = 10


def _neurlux_kernel(x_ref, wc_ref, bc_ref,
                    wih_ref, bih_ref, whh_ref,
                    wqkv_ref, bqkv_ref, wo_ref, bo_ref,
                    w1_ref, b1_ref, w2_ref, b2_ref,
                    out_ref, xproj_ref, lstm_ref,
                    *, b_tile, attn_group, compute_dtype):
    B = b_tile
    H = LSTM_HIDDEN
    DH = ATTN_DIM                     # fused fwd|bwd state width = 64
    TB = L_POOL * B
    cdt = compute_dtype

    # ---- Conv1d(E -> 100, k=4, pad=1) + ReLU: im2col done in-kernel as 4 shifted-slice
    #      matmuls accumulated in f32 (input block is the padded embedding, time-major). ----
    x2 = x_ref[...].reshape(L_PAD * B, EMBEDDING_DIM)
    conv = bc_ref[...]                                   # (1,128) broadcasts over rows
    for k in range(KERNEL_SIZE):
        slab = x2[k * B:k * B + L_CONV * B, :]           # row (t*B + b) = x_pad[t + k, b, :]
        conv = conv + jnp.dot(slab, wc_ref[k],
                              preferred_element_type=jnp.float32)
    conv = jnp.maximum(conv, 0.0)                        # (L_CONV*B, 128)

    # ---- MaxPool1d(kernel=4, stride=4) over time: elementwise max of 4 contiguous slabs ----
    c3 = conv.reshape(L_POOL, 4 * B, C_PAD)
    pooled = jnp.maximum(
        jnp.maximum(c3[:, 0 * B:1 * B, :], c3[:, 1 * B:2 * B, :]),
        jnp.maximum(c3[:, 2 * B:3 * B, :], c3[:, 3 * B:4 * B, :]))   # (L_POOL, B, 128)
    pooled2d = pooled.reshape(TB, C_PAD)                 # rows = (time, batch)

    # ---- BiLSTM(100 -> 32): fwd+bwd input projections fused into ONE 256-lane matmul,
    #      hoisted out of the serial recurrence.  Gate lane layout (32 lanes each):
    #      [i_f i_b f_f f_b o_f o_b | g_f g_b] -> one sigmoid(192) + one tanh(64) per step. ----
    xproj_ref[...] = jnp.dot(pooled2d.astype(cdt), wih_ref[...],
                             preferred_element_type=jnp.float32) + bih_ref[...]

    whh = whh_ref[...]                                   # (64, 256) block-diagonal, hoisted
    lane = lax.broadcasted_iota(jnp.int32, (B, GATE_LANES), 1)
    fwd_lane = (lane & H) == 0                           # forward-direction gate lanes

    def lstm_body(t, carry):
        h, c = carry                                     # h=[h_f|h_b], c=[c_f|c_b]  (B,64) f32
        tb = L_POOL - 1 - t
        row_f = pl.multiple_of(t * B, B)
        row_b = pl.multiple_of(tb * B, B)
        # fwd gates read x-projection at time t, bwd gates at time L-1-t (both precomputed,
        # off the serial chain -> cheap VPU select).
        gx = jnp.where(fwd_lane,
                       xproj_ref[pl.ds(row_f, B), :],
                       xproj_ref[pl.ds(row_b, B), :])
        gates = gx + jnp.dot(h.astype(cdt), whh,
                             preferred_element_type=jnp.float32)     # (B, 256)
        sig = jax.nn.sigmoid(gates[:, :3 * DH])
        g = jnp.tanh(gates[:, 3 * DH:])
        i_g, f_g, o_g = sig[:, :DH], sig[:, DH:2 * DH], sig[:, 2 * DH:3 * DH]
        c_new = f_g * c + i_g * g
        h_new = o_g * jnp.tanh(c_new)
        # TODO(synk): fwd/bwd hiddens land on different rows, so two 32-lane stores per step
        # remain (lane-dense stores would need an extra relayout pass; minor per perf review).
        lstm_ref[pl.ds(row_f, B), 0:H] = h_new[:, 0:H]
        lstm_ref[pl.ds(row_b, B), H:2 * H] = h_new[:, H:2 * H]
        return h_new, c_new

    zeros = jnp.zeros((B, DH), jnp.float32)
    _ = lax.fori_loop(0, L_POOL, lstm_body, (zeros, zeros), unroll=True)
    lstm_out = lstm_ref[...]                             # (TB, 64) time-major

    # ---- single-head self-attention (nn.MultiheadAttention, num_heads=1) ----
    # Fused QKV projection on the whole tile; scores are computed per sample sub-group
    # (diagonal blocks of attn_group samples => <=128-row blocks) so the same-sample stripe
    # waste does not grow with B_TILE.
    qkv = jnp.dot(lstm_out.astype(cdt), wqkv_ref[...],
                  preferred_element_type=jnp.float32) + bqkv_ref[...]        # (TB, 192)
    qkv3 = qkv.reshape(L_POOL, B, 3 * ATTN_DIM)
    q3 = qkv3[:, :, 0:ATTN_DIM]
    k3 = qkv3[:, :, ATTN_DIM:2 * ATTN_DIM]
    v3 = qkv3[:, :, 2 * ATTN_DIM:3 * ATTN_DIM]

    G = attn_group                                       # power of two, divides B
    rows = G * L_POOL
    scale = 1.0 / (float(ATTN_DIM) ** 0.5)
    r_idx = lax.broadcasted_iota(jnp.int32, (rows, rows), 0)
    c_idx = lax.broadcasted_iota(jnp.int32, (rows, rows), 1)
    same_sample = ((r_idx - c_idx) & (G - 1)) == 0       # within-group row = t*G + g

    att_groups = []
    for gi in range(B // G):
        sl = slice(gi * G, (gi + 1) * G)
        qg = q3[:, sl, :].reshape(rows, ATTN_DIM).astype(cdt)
        kg = k3[:, sl, :].reshape(rows, ATTN_DIM).astype(cdt)
        vg = v3[:, sl, :].reshape(rows, ATTN_DIM).astype(cdt)
        s = lax.dot_general(qg, kg, (((1,), (1,)), ((), ())),
                            preferred_element_type=jnp.float32) * scale
        s = jnp.where(same_sample, s, -1e30)
        m = jnp.max(s, axis=-1, keepdims=True)
        e = jnp.exp(s - m)
        p = e * pl.reciprocal(jnp.sum(e, axis=-1, keepdims=True), approx=True)
        attg = jnp.dot(p.astype(cdt), vg, preferred_element_type=jnp.float32)
        att_groups.append(attg.reshape(L_POOL, G, ATTN_DIM))
    att_pre = att_groups[0] if len(att_groups) == 1 else jnp.concatenate(att_groups, axis=1)

    # output projection (one big matmul), then fc1 as ONE batched dot_general over
    # (time x feature) + reduce over time, ReLU, fc2.
    att_o = jnp.dot(att_pre.reshape(TB, ATTN_DIM).astype(cdt), wo_ref[...],
                    preferred_element_type=jnp.float32) + bo_ref[...]        # (TB, 64)
    att3 = att_o.reshape(L_POOL, B, ATTN_DIM).astype(cdt)
    y = lax.dot_general(att3, w1_ref[...], (((2,), (1,)), ((0,), (0,))),
                        preferred_element_type=jnp.float32)                  # (L_POOL, B, 10)
    y = jnp.sum(y, axis=0) + b1_ref[...]
    y = jnp.maximum(y, 0.0)
    # TODO(synk): nn.Dropout(0.25) is treated as identity (inference / eval mode).
    out_ref[...] = jnp.dot(y.astype(cdt), w2_ref[...],
                           preferred_element_type=jnp.float32) + b2_ref[...]


def _pack_params(p, compute_dtype):
    """Repack natural (PyTorch-like) params into the kernel layout:
       * conv weight -> (K, E, 128) lane-padded
       * BiLSTM -> fused input-proj (128,256), block-diagonal recurrent (64,256), bias (1,256)
         with gate-lane layout [i_f i_b f_f f_b o_f o_b | g_f g_b]
       * Wq|Wk|Wv fused to (64,192)
       Matmul weights are cast to compute_dtype; biases stay f32."""
    H = LSTM_HIDDEN
    cdt = compute_dtype

    wc = jnp.pad(p["wc"], ((0, 0), (0, 0), (0, C_PAD - CONV_OUT)))    # (K, E, 128)
    bc = jnp.pad(p["bc"], ((0, 0), (0, C_PAD - CONV_OUT)))            # (1, 128)

    # PyTorch gate order is [i, f, g, o]; fused lane blocks are
    # [i_f, i_b, f_f, f_b, o_f, o_b, g_f, g_b] (dir 0 = forward, 1 = backward).
    gate_dir = [(0, 0), (0, 1), (1, 0), (1, 1), (3, 0), (3, 1), (2, 0), (2, 1)]
    wih_all = (p["wih_f"], p["wih_b"])
    whh_all = (p["whh_f"], p["whh_b"])
    b_all = (p["b_f"], p["b_b"])
    wih_cols, whh_cols, b_cols = [], [], []
    for g, d in gate_dir:
        wih_cols.append(jnp.pad(wih_all[d][g], ((0, C_PAD - CONV_OUT), (0, 0))))
        col = jnp.zeros((2 * H, H), jnp.float32).at[d * H:(d + 1) * H, :].set(whh_all[d][g])
        whh_cols.append(col)
        b_cols.append(b_all[d][g])
    wih = jnp.concatenate(wih_cols, axis=1)        # (128, 256)
    whh = jnp.concatenate(whh_cols, axis=1)        # (64, 256) block-diagonal
    bih = jnp.concatenate(b_cols, axis=1)          # (1, 256)

    wqkv = jnp.concatenate([p["wq"], p["wk"], p["wv"]], axis=1)   # (64, 192)
    bqkv = jnp.concatenate([p["bq"], p["bk"], p["bv"]], axis=1)   # (1, 192)

    return [wc.astype(cdt), bc,
            wih.astype(cdt), bih, whh.astype(cdt),
            wqkv.astype(cdt), bqkv,
            p["wo"].astype(cdt), p["bo"],
            p["w1"].astype(cdt), p["b1"],
            p["w2"].astype(cdt), p["b2"]]


def _choose_b_tile(batch):
    """Largest power-of-two batch tile in [8, 128] that still leaves >= 2 grid steps
    (v7x: two TensorCores share the 'parallel' grid axis) when the batch allows it."""
    bt = 8
    while bt < 128 and bt * 2 <= max(8, batch // 2):
        bt *= 2
    return bt


def _zero_index_map(i, *, nd):
    return (0,) * nd


def neurlux_forward(tokens, params, compute_dtype=jnp.float32):
    """NeurLuxModel forward; everything after the embedding gather runs inside one Pallas
    kernel, tiled over the batch."""
    # glue: embedding gather + conv edge padding + time-major transpose (plain JAX)
    emb = params["embedding"][tokens]                                 # (B, S, E)
    xp = jnp.pad(emb, ((0, 0), (CONV_PAD, CONV_PAD), (0, 0)))         # (B, L_PAD, E)
    xt = jnp.transpose(xp, (1, 0, 2)).astype(compute_dtype)           # (L_PAD, B, E) time-major

    batch = tokens.shape[0]
    bt = _choose_b_tile(batch)
    attn_group = min(bt, 16)                 # <=128-row score blocks; caps stripe waste
    b_pad = ((batch + bt - 1) // bt) * bt
    if b_pad != batch:
        xt = jnp.pad(xt, ((0, 0), (0, b_pad - batch), (0, 0)))

    weight_args = _pack_params(params, compute_dtype)

    in_specs = [pl.BlockSpec((L_PAD, bt, EMBEDDING_DIM), lambda i: (0, i, 0))]
    for w in weight_args:
        in_specs.append(
            pl.BlockSpec(w.shape, functools.partial(_zero_index_map, nd=w.ndim)))

    kernel = functools.partial(_neurlux_kernel, b_tile=bt,
                               attn_group=attn_group, compute_dtype=compute_dtype)

    out = pl.pallas_call(
        kernel,
        out_shape=jax.ShapeDtypeStruct((b_pad, NUM_CLASSES), jnp.float32),
        grid=(b_pad // bt,),
        in_specs=in_specs,
        out_specs=pl.BlockSpec((bt, NUM_CLASSES), lambda i: (i, 0)),
        scratch_shapes=[pltpu.VMEM((L_POOL * bt, GATE_LANES), jnp.float32),   # x-projections
                        pltpu.VMEM((L_POOL * bt, ATTN_DIM), jnp.float32)],    # LSTM hiddens
        compiler_params=pltpu.CompilerParams(
            dimension_semantics=("parallel",),
            vmem_limit_bytes=32 * 1024 * 1024),
    )(xt, *weight_args)
    return out[:batch]


def init_params(key):
    ks = jax.random.split(key, 21)

    def nrm(k, shape, scale=0.1):
        return (scale * jax.random.normal(k, shape)).astype(jnp.float32)

    p = {}
    p["embedding"] = nrm(ks[0], (VOCAB_SIZE, EMBEDDING_DIM), 1.0)
    p["wc"] = nrm(ks[1], (KERNEL_SIZE, EMBEDDING_DIM, CONV_OUT))     # conv weight (k, in, out)
    p["bc"] = nrm(ks[2], (1, CONV_OUT))
    p["wih_f"] = nrm(ks[3], (4, CONV_OUT, LSTM_HIDDEN))              # gates [i, f, g, o]
    p["whh_f"] = nrm(ks[4], (4, LSTM_HIDDEN, LSTM_HIDDEN))
    p["b_f"] = nrm(ks[5], (4, 1, LSTM_HIDDEN))                       # b_ih + b_hh combined
    p["wih_b"] = nrm(ks[6], (4, CONV_OUT, LSTM_HIDDEN))
    p["whh_b"] = nrm(ks[7], (4, LSTM_HIDDEN, LSTM_HIDDEN))
    p["b_b"] = nrm(ks[8], (4, 1, LSTM_HIDDEN))
    p["wq"] = nrm(ks[9], (ATTN_DIM, ATTN_DIM))
    p["wk"] = nrm(ks[10], (ATTN_DIM, ATTN_DIM))
    p["wv"] = nrm(ks[11], (ATTN_DIM, ATTN_DIM))
    p["bq"] = nrm(ks[12], (1, ATTN_DIM))
    p["bk"] = nrm(ks[13], (1, ATTN_DIM))
    p["bv"] = nrm(ks[14], (1, ATTN_DIM))
    p["wo"] = nrm(ks[15], (ATTN_DIM, ATTN_DIM))
    p["bo"] = nrm(ks[16], (1, ATTN_DIM))
    p["w1"] = nrm(ks[17], (L_POOL, ATTN_DIM, FC1_OUT))               # fc1 weight (L, 64, 10)
    p["b1"] = nrm(ks[18], (1, FC1_OUT))
    p["w2"] = nrm(ks[19], (FC1_OUT, NUM_CLASSES))
    p["b2"] = nrm(ks[20], (1, NUM_CLASSES))
    return p


def neurlux_reference(tokens, p):
    """Pure-JAX f32 reference of the same forward pass (correctness check)."""
    emb = p["embedding"][tokens]
    xp = jnp.pad(emb, ((0, 0), (CONV_PAD, CONV_PAD), (0, 0)))
    B = tokens.shape[0]
    conv = jnp.zeros((B, L_CONV, CONV_OUT)) + p["bc"][None]
    for k in range(KERNEL_SIZE):
        conv = conv + jnp.einsum('ble,eo->blo', xp[:, k:k + L_CONV, :], p["wc"][k])
    conv = jnp.maximum(conv, 0.0)
    pooled = jnp.max(conv[:, :L_POOL * 4].reshape(B, L_POOL, 4, CONV_OUT), axis=2)

    def cell(x_row, h, c, wih, whh, b):
        gs = [x_row @ wih[g] + h @ whh[g] + b[g] for g in range(4)]
        i = jax.nn.sigmoid(gs[0]); f = jax.nn.sigmoid(gs[1])
        g = jnp.tanh(gs[2]); o = jax.nn.sigmoid(gs[3])
        c = f * c + i * g
        h = o * jnp.tanh(c)
        return h, c

    h = jnp.zeros((B, LSTM_HIDDEN)); c = h
    fwd = []
    for t in range(L_POOL):
        h, c = cell(pooled[:, t], h, c, p["wih_f"], p["whh_f"], p["b_f"])
        fwd.append(h)
    h = jnp.zeros((B, LSTM_HIDDEN)); c = h
    bwd = [None] * L_POOL
    for t in reversed(range(L_POOL)):
        h, c = cell(pooled[:, t], h, c, p["wih_b"], p["whh_b"], p["b_b"])
        bwd[t] = h
    lstm_out = jnp.concatenate([jnp.stack(fwd, 1), jnp.stack(bwd, 1)], axis=-1)

    q = lstm_out @ p["wq"] + p["bq"]
    k_ = lstm_out @ p["wk"] + p["bk"]
    v = lstm_out @ p["wv"] + p["bv"]
    scores = jnp.einsum('bqd,bkd->bqk', q, k_) / jnp.sqrt(float(ATTN_DIM))
    pw = jax.nn.softmax(scores, axis=-1)
    att = jnp.einsum('bqk,bkd->bqd', pw, v) @ p["wo"] + p["bo"]
    flat = att.reshape(B, -1)
    y = jnp.maximum(flat @ p["w1"].reshape(FC1_IN, FC1_OUT) + p["b1"], 0.0)
    return y @ p["w2"] + p["b2"]


if __name__ == "__main__":
    key = jax.random.PRNGKey(0)
    pkey, xkey = jax.random.split(key)
    params = init_params(pkey)
    tokens = jax.random.randint(xkey, (16, SEQ_LEN), 0, VOCAB_SIZE)

    ref = neurlux_reference(tokens, params)
    fwd_fn = jax.jit(neurlux_forward, static_argnames=("compute_dtype",))

    # f32 path: exact-math check against the pure-JAX reference.
    out_f32 = jax.block_until_ready(fwd_fn(tokens, params, compute_dtype=jnp.float32))
    assert out_f32.shape == (16, NUM_CLASSES)
    assert jnp.allclose(out_f32, ref, rtol=1e-2, atol=1e-2), (out_f32, ref)

    # bf16 matmul path (full-rate MXU on v6e/v7x; accumulation & LSTM state stay f32).
    out_bf16 = jax.block_until_ready(fwd_fn(tokens, params, compute_dtype=jnp.bfloat16))
    assert out_bf16.shape == (16, NUM_CLASSES)
    assert jnp.allclose(out_bf16, ref, rtol=6e-2, atol=6e-2), (out_bf16, ref)

    print("KERNEL_OK")
</pallas_src>

<mosaic_0001>
module attributes {stable_mosaic.version = 11 : i64} {
  func.func @_neurlux_kernel(%arg0: i32, %arg1: memref<35x8x32xf32, #tpu.memory_space<vmem>>, %arg2: memref<4x32x128xf32, #tpu.memory_space<vmem>>, %arg3: memref<1x128xf32, #tpu.memory_space<vmem>>, %arg4: memref<128x256xf32, #tpu.memory_space<vmem>>, %arg5: memref<1x256xf32, #tpu.memory_space<vmem>>, %arg6: memref<64x256xf32, #tpu.memory_space<vmem>>, %arg7: memref<64x192xf32, #tpu.memory_space<vmem>>, %arg8: memref<1x192xf32, #tpu.memory_space<vmem>>, %arg9: memref<64x64xf32, #tpu.memory_space<vmem>>, %arg10: memref<1x64xf32, #tpu.memory_space<vmem>>, %arg11: memref<8x64x10xf32, #tpu.memory_space<vmem>>, %arg12: memref<1x10xf32, #tpu.memory_space<vmem>>, %arg13: memref<10x1xf32, #tpu.memory_space<vmem>>, %arg14: memref<1x1xf32, #tpu.memory_space<vmem>>, %arg15: memref<8x1xf32, #tpu.memory_space<vmem>>, %arg16: memref<64x256xf32, #tpu.memory_space<vmem>>, %arg17: memref<64x64xf32, #tpu.memory_space<vmem>>) attributes {dimension_semantics = [#tpu.dimension_semantics<parallel>], iteration_bounds = array<i64: 2>, scalar_prefetch = 0 : i64, scratch_operands = 2 : i64, tpu.core_type = #tpu.core_type<tc>, window_params = [{transform_indices = @transform_0, window_bounds = array<i64: 35, 8, 32>}, {pipeline_mode = #tpu.pipeline_mode<synchronous>, transform_indices = @transform_1, window_bounds = array<i64: 4, 32, 128>}, {pipeline_mode = #tpu.pipeline_mode<synchronous>, transform_indices = @transform_2, window_bounds = array<i64: 1, 128>}, {pipeline_mode = #tpu.pipeline_mode<synchronous>, transform_indices = @transform_3, window_bounds = array<i64: 128, 256>}, {pipeline_mode = #tpu.pipeline_mode<synchronous>, transform_indices = @transform_4, window_bounds = array<i64: 1, 256>}, {pipeline_mode = #tpu.pipeline_mode<synchronous>, transform_indices = @transform_5, window_bounds = array<i64: 64, 256>}, {pipeline_mode = #tpu.pipeline_mode<synchronous>, transform_indices = @transform_6, window_bounds = array<i64: 64, 192>}, {pipeline_mode = #tpu.pipeline_mode<synchronous>, transform_indices = @transform_7, window_bounds = array<i64: 1, 192>}, {pipeline_mode = #tpu.pipeline_mode<synchronous>, transform_indices = @transform_8, window_bounds = array<i64: 64, 64>}, {pipeline_mode = #tpu.pipeline_mode<synchronous>, transform_indices = @transform_9, window_bounds = array<i64: 1, 64>}, {pipeline_mode = #tpu.pipeline_mode<synchronous>, transform_indices = @transform_10, window_bounds = array<i64: 8, 64, 10>}, {pipeline_mode = #tpu.pipeline_mode<synchronous>, transform_indices = @transform_11, window_bounds = array<i64: 1, 10>}, {pipeline_mode = #tpu.pipeline_mode<synchronous>, transform_indices = @transform_12, window_bounds = array<i64: 10, 1>}, {pipeline_mode = #tpu.pipeline_mode<synchronous>, transform_indices = @transform_13, window_bounds = array<i64: 1, 1>}, {transform_indices = @transform_14, window_bounds = array<i64: 8, 1>}]} {
    %c0 = arith.constant 0 : index
    %c0_0 = arith.constant 0 : index
    %c0_1 = arith.constant 0 : index
    %0 = vector.load %arg1[%c0, %c0_0, %c0_1] : memref<35x8x32xf32, #tpu.memory_space<vmem>>, vector<35x8x32xf32>
    %1 = vector.shape_cast %0 : vector<35x8x32xf32> to vector<280x32xf32>
    %c0_2 = arith.constant 0 : index
    %c0_3 = arith.constant 0 : index
    %2 = vector.load %arg3[%c0_2, %c0_3] : memref<1x128xf32, #tpu.memory_space<vmem>>, vector<1x128xf32>
    %3 = vector.extract_strided_slice %1 {offsets = [0, 0], sizes = [256, 32], strides = [1, 1]} : vector<280x32xf32> to vector<256x32xf32>
    %c0_4 = arith.constant 0 : index
    %c0_5 = arith.constant 0 : index
    %c0_6 = arith.constant 0 : index
    %4 = vector.load %arg2[%c0_4, %c0_5, %c0_6] : memref<4x32x128xf32, #tpu.memory_space<vmem>>, vector<1x32x128xf32>
    %5 = vector.shape_cast %4 : vector<1x32x128xf32> to vector<32x128xf32>
    %cst = arith.constant dense<0.000000e+00> : vector<256x128xf32>
    %6 = tpu.matmul %3, %5, %cst {dimension_numbers = #tpu.dot_dimension_numbers<[1], [0], [0], [1], [0, 0, 1, 1], [], []>} : vector<256x32xf32>, vector<32x128xf32>, vector<256x128xf32> -> vector<256x128xf32>
    %7 = vector.broadcast %2 : vector<1x128xf32> to vector<256x128xf32>
    %8 = arith.addf %7, %6 : vector<256x128xf32>
    %9 = vector.extract_strided_slice %1 {offsets = [8, 0], sizes = [256, 32], strides = [1, 1]} : vector<280x32xf32> to vector<256x32xf32>
    %c1 = arith.constant 1 : index
    %c0_7 = arith.constant 0 : index
    %c0_8 = arith.constant 0 : index
    %10 = vector.load %arg2[%c1, %c0_7, %c0_8] : memref<4x32x128xf32, #tpu.memory_space<vmem>>, vector<1x32x128xf32>
    %11 = vector.shape_cast %10 : vector<1x32x128xf32> to vector<32x128xf32>
    %cst_9 = arith.constant dense<0.000000e+00> : vector<256x128xf32>
    %12 = tpu.matmul %9, %11, %cst_9 {dimension_numbers = #tpu.dot_dimension_numbers<[1], [0], [0], [1], [0, 0, 1, 1], [], []>} : vector<256x32xf32>, vector<32x128xf32>, vector<256x128xf32> -> vector<256x128xf32>
    %13 = arith.addf %8, %12 : vector<256x128xf32>
    %14 = vector.extract_strided_slice %1 {offsets = [16, 0], sizes = [256, 32], strides = [1, 1]} : vector<280x32xf32> to vector<256x32xf32>
    %c2 = arith.constant 2 : index
    %c0_10 = arith.constant 0 : index
    %c0_11 = arith.constant 0 : index
    %15 = vector.load %arg2[%c2, %c0_10, %c0_11] : memref<4x32x128xf32, #tpu.memory_space<vmem>>, vector<1x32x128xf32>
    %16 = vector.shape_cast %15 : vector<1x32x128xf32> to vector<32x128xf32>
    %cst_12 = arith.constant dense<0.000000e+00> : vector<256x128xf32>
    %17 = tpu.matmul %14, %16, %cst_12 {dimension_numbers = #tpu.dot_dimension_numbers<[1], [0], [0], [1], [0, 0, 1, 1], [], []>} : vector<256x32xf32>, vector<32x128xf32>, vector<256x128xf32> -> vector<256x128xf32>
    %18 = arith.addf %13, %17 : vector<256x128xf32>
    %19 = vector.extract_strided_slice %1 {offsets = [24, 0], sizes = [256, 32], strides = [1, 1]} : vector<280x32xf32> to vector<256x32xf32>
    %c3 = arith.constant 3 : index
    %c0_13 = arith.constant 0 : index
    %c0_14 = arith.constant 0 : index
    %20 = vector.load %arg2[%c3, %c0_13, %c0_14] : memref<4x32x128xf32, #tpu.memory_space<vmem>>, vector<1x32x128xf32>
    %21 = vector.shape_cast %20 : vector<1x32x128xf32> to vector<32x128xf32>
    %cst_15 = arith.constant dense<0.000000e+00> : vector<256x128xf32>
    %22 = tpu.matmul %19, %21, %cst_15 {dimension_numbers = #tpu.dot_dimension_numbers<[1], [0], [0], [1], [0, 0, 1, 1], [], []>} : vector<256x32xf32>, vector<32x128xf32>, vector<256x128xf32> -> vector<256x128xf32>
    %23 = arith.addf %18, %22 : vector<256x128xf32>
    %cst_16 = arith.constant 0.000000e+00 : f32
    %24 = vector.broadcast %cst_16 : f32 to vector<256x128xf32>
    %25 = arith.maximumf %23, %24 : vector<256x128xf32>
    %26 = vector.shape_cast %25 : vector<256x128xf32> to vector<8x32x128xf32>
    %27 = vector.extract_strided_slice %26 {offsets = [0, 0, 0], sizes = [8, 8, 128], strides = [1, 1, 1]} : vector<8x32x128xf32> to vector<8x8x128xf32>
    %28 = vector.extract_strided_slice %26 {offsets = [0, 8, 0], sizes = [8, 8, 128], strides = [1, 1, 1]} : vector<8x32x128xf32> to vector<8x8x128xf32>
    %29 = arith.maximumf %27, %28 : vector<8x8x128xf32>
    %30 = vector.extract_strided_slice %26 {offsets = [0, 16, 0], sizes = [8, 8, 128], strides = [1, 1, 1]} : vector<8x32x128xf32> to vector<8x8x128xf32>
    %31 = vector.extract_strided_slice %26 {offsets = [0, 24, 0], sizes = [8, 8, 128], strides = [1, 1, 1]} : vector<8x32x128xf32> to vector<8x8x128xf32>
    %32 = arith.maximumf %30, %31 : vector<8x8x128xf32>
    %33 = arith.maximumf %29, %32 : vector<8x8x128xf32>
    %34 = vector.shape_cast %33 : vector<8x8x128xf32> to vector<64x128xf32>
    %c0_17 = arith.constant 0 : index
    %c0_18 = arith.constant 0 : index
    %35 = vector.load %arg4[%c0_17, %c0_18] : memref<128x256xf32, #tpu.memory_space<vmem>>, vector<128x256xf32>
    %cst_19 = arith.constant dense<0.000000e+00> : vector<64x256xf32>
    %36 = tpu.matmul %34, %35, %cst_19 {dimension_numbers = #tpu.dot_dimension_numbers<[1], [0], [0], [1], [0, 0, 1, 1], [], []>} : vector<64x128xf32>, vector<128x256xf32>, vector<64x256xf32> -> vector<64x256xf32>
    %c0_20 = arith.constant 0 : index
    %c0_21 = arith.constant 0 : index
    %37 = vector.load %arg5[%c0_20, %c0_21] : memref<1x256xf32, #tpu.memory_space<vmem>>, vector<1x256xf32>
    %38 = vector.broadcast %37 : vector<1x256xf32> to vector<64x256xf32>
    %39 = arith.addf %36, %38 : vector<64x256xf32>
    %c0_22 = arith.constant 0 : index
    %c0_23 = arith.constant 0 : index
    %40 = vector.load %arg16[%c0_22, %c0_23] : memref<64x256xf32, #tpu.memory_space<vmem>>, vector<64x256xf32>
    tpu.vector_store %arg16[%c0_22, %c0_23], %39 {strides = array<i32>} : memref<64x256xf32, #tpu.memory_space<vmem>>, vector<64x256xf32>,
    %c0_24 = arith.constant 0 : index
    %c0_25 = arith.constant 0 : index
    %41 = vector.load %arg6[%c0_24, %c0_25] : memref<64x256xf32, #tpu.memory_space<vmem>>, vector<64x256xf32>
    %42 = tpu.iota {dimensions = array<i32: 1>} : vector<8x256xi32>
    %c32_i32 = arith.constant 32 : i32
    %43 = vector.broadcast %c32_i32 : i32 to vector<8x256xi32>
    %44 = arith.andi %42, %43 : vector<8x256xi32>
    %c0_i32 = arith.constant 0 : i32
    %45 = vector.broadcast %c0_i32 : i32 to vector<8x256xi32>
    %46 = arith.cmpi eq, %44, %45 : vector<8x256xi32>
    %cst_26 = arith.constant 0.000000e+00 : f32
    %47 = vector.broadcast %cst_26 : f32 to vector<8x64xf32>
    %c0_i32_27 = arith.constant 0 : i32
    %c7_i32 = arith.constant 7 : i32
    %48 = arith.subi %c7_i32, %c0_i32_27 : i32
    %c8_i32 = arith.constant 8 : i32
    %49 = arith.muli %c0_i32_27, %c8_i32 : i32
    %50 = tpu.assume_multiple %49, 8 : i32
    %c8_i32_28 = arith.constant 8 : i32
    %51 = arith.muli %48, %c8_i32_28 : i32
    %52 = tpu.assume_multiple %51, 8 : i32
    %53 = arith.index_cast %50 : i32 to index
    %c0_29 = arith.constant 0 : index
    %54 = vector.load %arg16[%53, %c0_29] : memref<64x256xf32, #tpu.memory_space<vmem>>, vector<8x256xf32>
    %55 = arith.index_cast %52 : i32 to index
    %c0_30 = arith.constant 0 : index
    %56 = vector.load %arg16[%55, %c0_30] : memref<64x256xf32, #tpu.memory_space<vmem>>, vector<8x256xf32>
    %57 = arith.select %46, %54, %56 : vector<8x256xi1>, vector<8x256xf32>
    %cst_31 = arith.constant dense<0.000000e+00> : vector<8x256xf32>
    %58 = tpu.matmul %47, %41, %cst_31 {dimension_numbers = #tpu.dot_dimension_numbers<[1], [0], [0], [1], [0, 0, 1, 1], [], []>} : vector<8x64xf32>, vector<64x256xf32>, vector<8x256xf32> -> vector<8x256xf32>
    %59 = arith.addf %57, %58 : vector<8x256xf32>
    %60 = vector.extract_strided_slice %59 {offsets = [0, 0], sizes = [8, 192], strides = [1, 1]} : vector<8x256xf32> to vector<8x192xf32>
    %61 = arith.negf %60 : vector<8x192xf32>
    %62 = math.exp %61 : vector<8x192xf32>
    %cst_32 = arith.constant 1.000000e+00 : f32
    %63 = vector.broadcast %cst_32 : f32 to vector<8x192xf32>
    %64 = arith.addf %63, %62 : vector<8x192xf32>
    %65 = arith.divf %63, %64 : vector<8x192xf32>
    %66 = vector.extract_strided_slice %59 {offsets = [0, 192], sizes = [8, 64], strides = [1, 1]} : vector<8x256xf32> to vector<8x64xf32>
    %67 = math.tanh %66 : vector<8x64xf32>
    %68 = vector.extract_strided_slice %65 {offsets = [0, 0], sizes = [8, 64], strides = [1, 1]} : vector<8x192xf32> to vector<8x64xf32>
    %69 = vector.extract_strided_slice %65 {offsets = [0, 64], sizes = [8, 64], strides = [1, 1]} : vector<8x192xf32> to vector<8x64xf32>
    %70 = vector.extract_strided_slice %65 {offsets = [0, 128], sizes = [8, 64], strides = [1, 1]} : vector<8x192xf32> to vector<8x64xf32>
    %71 = arith.mulf %69, %47 : vector<8x64xf32>
    %72 = arith.mulf %68, %67 : vector<8x64xf32>
    %73 = arith.addf %71, %72 : vector<8x64xf32>
    %74 = math.tanh %73 : vector<8x64xf32>
    %75 = arith.mulf %70, %74 : vector<8x64xf32>
    %76 = vector.extract_strided_slice %75 {offsets = [0, 0], sizes = [8, 32], strides = [1, 1]} : vector<8x64xf32> to vector<8x32xf32>
    %77 = arith.index_cast %50 : i32 to index
    %c0_33 = arith.constant 0 : index
    %78 = vector.load %arg17[%77, %c0_33] : memref<64x64xf32, #tpu.memory_space<vmem>>, vector<8x32xf32>
    tpu.vector_store %arg17[%77, %c0_33], %76 {strides = array<i32>} : memref<64x64xf32, #tpu.memory_space<vmem>>, vector<8x32xf32>,
    %79 = vector.extract_strided_slice %75 {offsets = [0, 32], sizes = [8, 32], strides = [1, 1]} : vector<8x64xf32> to vector<8x32xf32>
    %80 = arith.index_cast %52 : i32 to index
    %c32 = arith.constant 32 : index
    %81 = vector.load %arg17[%80, %c32] : memref<64x64xf32, #tpu.memory_space<vmem>>, vector<8x32xf32>
    tpu.vector_store %arg17[%80, %c32], %79 {strides = array<i32>} : memref<64x64xf32, #tpu.memory_space<vmem>>, vector<8x32xf32>,
    %c1_i32 = arith.constant 1 : i32
    %c7_i32_34 = arith.constant 7 : i32
    %82 = arith.subi %c7_i32_34, %c1_i32 : i32
    %c8_i32_35 = arith.constant 8 : i32
    %83 = arith.muli %c1_i32, %c8_i32_35 : i32
    %84 = tpu.assume_multiple %83, 8 : i32
    %c8_i32_36 = arith.constant 8 : i32
    %85 = arith.muli %82, %c8_i32_36 : i32
    %86 = tpu.assume_multiple %85, 8 : i32
    %87 = arith.index_cast %84 : i32 to index
    %c0_37 = arith.constant 0 : index
    %88 = vector.load %arg16[%87, %c0_37] : memref<64x256xf32, #tpu.memory_space<vmem>>, vector<8x256xf32>
    %89 = arith.index_cast %86 : i32 to index
    %c0_38 = arith.constant 0 : index
    %90 = vector.load %arg16[%89, %c0_38] : memref<64x256xf32, #tpu.memory_space<vmem>>, vector<8x256xf32>
    %91 = arith.select %46, %88, %90 : vector<8x256xi1>, vector<8x256xf32>
    %cst_39 = arith.constant dense<0.000000e+00> : vector<8x256xf32>
    %92 = tpu.matmul %75, %41, %cst_39 {dimension_numbers = #tpu.dot_dimension_numbers<[1], [0], [0], [1], [0, 0, 1, 1], [], []>} : vector<8x64xf32>, vector<64x256xf32>, vector<8x256xf32> -> vector<8x256xf32>
    %93 = arith.addf %91, %92 : vector<8x256xf32>
    %94 = vector.extract_strided_slice %93 {offsets = [0, 0], sizes = [8, 192], strides = [1, 1]} : vector<8x256xf32> to vector<8x192xf32>
    %95 = arith.negf %94 : vector<8x192xf32>
    %96 = math.exp %95 : vector<8x192xf32>
    %cst_40 = arith.constant 1.000000e+00 : f32
    %97 = vector.broadcast %cst_40 : f32 to vector<8x192xf32>
    %98 = arith.addf %97, %96 : vector<8x192xf32>
    %99 = arith.divf %97, %98 : vector<8x192xf32>
    %100 = vector.extract_strided_slice %93 {offsets = [0, 192], sizes = [8, 64], strides = [1, 1]} : vector<8x256xf32> to vector<8x64xf32>
    %101 = math.tanh %100 : vector<8x64xf32>
    %102 = vector.extract_strided_slice %99 {offsets = [0, 0], sizes = [8, 64], strides = [1, 1]} : vector<8x192xf32> to vector<8x64xf32>
    %103 = vector.extract_strided_slice %99 {offsets = [0, 64], sizes = [8, 64], strides = [1, 1]} : vector<8x192xf32> to vector<8x64xf32>
    %104 = vector.extract_strided_slice %99 {offsets = [0, 128], sizes = [8, 64], strides = [1, 1]} : vector<8x192xf32> to vector<8x64xf32>
    %105 = arith.mulf %103, %73 : vector<8x64xf32>
    %106 = arith.mulf %102, %101 : vector<8x64xf32>
    %107 = arith.addf %105, %106 : vector<8x64xf32>
    %108 = math.tanh %107 : vector<8x64xf32>
    %109 = arith.mulf %104, %108 : vector<8x64xf32>
    %110 = vector.extract_strided_slice %109 {offsets = [0, 0], sizes = [8, 32], strides = [1, 1]} : vector<8x64xf32> to vector<8x32xf32>
    %111 = arith.index_cast %84 : i32 to index
    %c0_41 = arith.constant 0 : index
    %112 = vector.load %arg17[%111, %c0_41] : memref<64x64xf32, #tpu.memory_space<vmem>>, vector<8x32xf32>
    tpu.vector_store %arg17[%111, %c0_41], %110 {strides = array<i32>} : memref<64x64xf32, #tpu.memory_space<vmem>>, vector<8x32xf32>,
    %113 = vector.extract_strided_slice %109 {offsets = [0, 32], sizes = [8, 32], strides = [1, 1]} : vector<8x64xf32> to vector<8x32xf32>
    %114 = arith.index_cast %86 : i32 to index
    %c32_42 = arith.constant 32 : index
    %115 = vector.load %arg17[%114, %c32_42] : memref<64x64xf32, #tpu.memory_space<vmem>>, vector<8x32xf32>
    tpu.vector_store %arg17[%114, %c32_42], %113 {strides = array<i32>} : memref<64x64xf32, #tpu.memory_space<vmem>>, vector<8x32xf32>,
    %c2_i32 = arith.constant 2 : i32
    %c7_i32_43 = arith.constant 7 : i32
    %116 = arith.subi %c7_i32_43, %c2_i32 : i32
    %c8_i32_44 = arith.constant 8 : i32
    %117 = arith.muli %c2_i32, %c8_i32_44 : i32
    %118 = tpu.assume_multiple %117, 8 : i32
    %c8_i32_45 = arith.constant 8 : i32
    %119 = arith.muli %116, %c8_i32_45 : i32
    %120 = tpu.assume_multiple %119, 8 : i32
    %121 = arith.index_cast %118 : i32 to index
    %c0_46 = arith.constant 0 : index
    %122 = vector.load %arg16[%121, %c0_46] : memref<64x256xf32, #tpu.memory_space<vmem>>, vector<8x256xf32>
    %123 = arith.index_cast %120 : i32 to index
    %c0_47 = arith.constant 0 : index
    %124 = vector.load %arg16[%123, %c0_47] : memref<64x256xf32, #tpu.memory_space<vmem>>, vector<8x256xf32>
    %125 = arith.select %46, %122, %124 : vector<8x256xi1>, vector<8x256xf32>
    %cst_48 = arith.constant dense<0.000000e+00> : vector<8x256xf32>
    %126 = tpu.matmul %109, %41, %cst_48 {dimension_numbers = #tpu.dot_dimension_numbers<[1], [0], [0], [1], [0, 0, 1, 1], [], []>} : vector<8x64xf32>, vector<64x256xf32>, vector<8x256xf32> -> vector<8x256xf32>
    %127 = arith.addf %125, %126 : vector<8x256xf32>
    %128 = vector.extract_strided_slice %127 {offsets = [0, 0], sizes = [8, 192], strides = [1, 1]} : vector<8x256xf32> to vector<8x192xf32>
    %129 = arith.negf %128 : vector<8x192xf32>
    %130 = math.exp %129 : vector<8x192xf32>
    %cst_49 = arith.constant 1.000000e+00 : f32
    %131 = vector.broadcast %cst_49 : f32 to vector<8x192xf32>
    %132 = arith.addf %131, %130 : vector<8x192xf32>
    %133 = arith.divf %131, %132 : vector<8x192xf32>
    %134 = vector.extract_strided_slice %127 {offsets = [0, 192], sizes = [8, 64], strides = [1, 1]} : vector<8x256xf32> to vector<8x64xf32>
    %135 = math.tanh %134 : vector<8x64xf32>
    %136 = vector.extract_strided_slice %133 {offsets = [0, 0], sizes = [8, 64], strides = [1, 1]} : vector<8x192xf32> to vector<8x64xf32>
    %137 = vector.extract_strided_slice %133 {offsets = [0, 64], sizes = [8, 64], strides = [1, 1]} : vector<8x192xf32> to vector<8x64xf32>
    %138 = vector.extract_strided_slice %133 {offsets = [0, 128], sizes = [8, 64], strides = [1, 1]} : vector<8x192xf32> to vector<8x64xf32>
    %139 = arith.mulf %137, %107 : vector<8x64xf32>
    %140 = arith.mulf %136, %135 : vector<8x64xf32>
    %141 = arith.addf %139, %140 : vector<8x64xf32>
    %142 = math.tanh %141 : vector<8x64xf32>
    %143 = arith.mulf %138, %142 : vector<8x64xf32>
    %144 = vector.extract_strided_slice %143 {offsets = [0, 0], sizes = [8, 32], strides = [1, 1]} : vector<8x64xf32> to vector<8x32xf32>
    %145 = arith.index_cast %118 : i32 to index
    %c0_50 = arith.constant 0 : index
    %146 = vector.load %arg17[%145, %c0_50] : memref<64x64xf32, #tpu.memory_space<vmem>>, vector<8x32xf32>
    tpu.vector_store %arg17[%145, %c0_50], %144 {strides = array<i32>} : memref<64x64xf32, #tpu.memory_space<vmem>>, vector<8x32xf32>,
    %147 = vector.extract_strided_slice %143 {offsets = [0, 32], sizes = [8, 32], strides = [1, 1]} : vector<8x64xf32> to vector<8x32xf32>
    %148 = arith.index_cast %120 : i32 to index
    %c32_51 = arith.constant 32 : index
    %149 = vector.load %arg17[%148, %c32_51] : memref<64x64xf32, #tpu.memory_space<vmem>>, vector<8x32xf32>
    tpu.vector_store %arg17[%148, %c32_51], %147 {strides = array<i32>} : memref<64x64xf32, #tpu.memory_space<vmem>>, vector<8x32xf32>,
    %c3_i32 = arith.constant 3 : i32
    %c7_i32_52 = arith.constant 7 : i32
    %150 = arith.subi %c7_i32_52, %c3_i32 : i32
    %c8_i32_53 = arith.constant 8 : i32
    %151 = arith.muli %c3_i32, %c8_i32_53 : i32
    %152 = tpu.assume_multiple %151, 8 : i32
    %c8_i32_54 = arith.constant 8 : i32
    %153 = arith.muli %150, %c8_i32_54 : i32
    %154 = tpu.assume_multiple %153, 8 : i32
    %155 = arith.index_cast %152 : i32 to index
    %c0_55 = arith.constant 0 : index
    %156 = vector.load %arg16[%155, %c0_55] : memref<64x256xf32, #tpu.memory_space<vmem>>, vector<8x256xf32>
    %157 = arith.index_cast %154 : i32 to index
    %c0_56 = arith.constant 0 : index
    %158 = vector.load %arg16[%157, %c0_56] : memref<64x256xf32, #tpu.memory_space<vmem>>, vector<8x256xf32>
    %159 = arith.select %46, %156, %158 : vector<8x256xi1>, vector<8x256xf32>
    %cst_57 = arith.constant dense<0.000000e+00> : vector<8x256xf32>
    %160 = tpu.matmul %143, %41, %cst_57 {dimension_numbers = #tpu.dot_dimension_numbers<[1], [0], [0], [1], [0, 0, 1, 1], [], []>} : vector<8x64xf32>, vector<64x256xf32>, vector<8x256xf32> -> vector<8x256xf32>
    %161 = arith.addf %159, %160 : vector<8x256xf32>
    %162 = vector.extract_strided_slice %161 {offsets = [0, 0], sizes = [8, 192], strides = [1, 1]} : vector<8x256xf32> to vector<8x192xf32>
    %163 = arith.negf %162 : vector<8x192xf32>
    %164 = math.exp %163 : vector<8x192xf32>
    %cst_58 = arith.constant 1.000000e+00 : f32
    %165 = vector.broadcast %cst_58 : f32 to vector<8x192xf32>
    %166 = arith.addf %165, %164 : vector<8x192xf32>
    %167 = arith.divf %165, %166 : vector<8x192xf32>
    %168 = vector.extract_strided_slice %161 {offsets = [0, 192], sizes = [8, 64], strides = [1, 1]} : vector<8x256xf32> to vector<8x64xf32>
    %169 = math.tanh %168 : vector<8x64xf32>
    %170 = vector.extract_strided_slice %167 {offsets = [0, 0], sizes = [8, 64], strides = [1, 1]} : vector<8x192xf32> to vector<8x64xf32>
    %171 = vector.extract_strided_slice %167 {offsets = [0, 64], sizes = [8, 64], strides = [1, 1]} : vector<8x192xf32> to vector<8x64xf32>
    %172 = vector.extract_strided_slice %167 {offsets = [0, 128], sizes = [8, 64], strides = [1, 1]} : vector<8x192xf32> to vector<8x64xf32>
    %173 = arith.mulf %171, %141 : vector<8x64xf32>
    %174 = arith.mulf %170, %169 : vector<8x64xf32>
    %175 = arith.addf %173, %174 : vector<8x64xf32>
    %176 = math.tanh %175 : vector<8x64xf32>
    %177 = arith.mulf %172, %176 : vector<8x64xf32>
    %178 = vector.extract_strided_slice %177 {offsets = [0, 0], sizes = [8, 32], strides = [1, 1]} : vector<8x64xf32> to vector<8x32xf32>
    %179 = arith.index_cast %152 : i32 to index
    %c0_59 = arith.constant 0 : index
    %180 = vector.load %arg17[%179, %c0_59] : memref<64x64xf32, #tpu.memory_space<vmem>>, vector<8x32xf32>
    tpu.vector_store %arg17[%179, %c0_59], %178 {strides = array<i32>} : memref<64x64xf32, #tpu.memory_space<vmem>>, vector<8x32xf32>,
    %181 = vector.extract_strided_slice %177 {offsets = [0, 32], sizes = [8, 32], strides = [1, 1]} : vector<8x64xf32> to vector<8x32xf32>
    %182 = arith.index_cast %154 : i32 to index
    %c32_60 = arith.constant 32 : index
    %183 = vector.load %arg17[%182, %c32_60] : memref<64x64xf32, #tpu.memory_space<vmem>>, vector<8x32xf32>
    tpu.vector_store %arg17[%182, %c32_60], %181 {strides = array<i32>} : memref<64x64xf32, #tpu.memory_space<vmem>>, vector<8x32xf32>,
    %c4_i32 = arith.constant 4 : i32
    %c7_i32_61 = arith.constant 7 : i32
    %184 = arith.subi %c7_i32_61, %c4_i32 : i32
    %c8_i32_62 = arith.constant 8 : i32
    %185 = arith.muli %c4_i32, %c8_i32_62 : i32
    %186 = tpu.assume_multiple %185, 8 : i32
    %c8_i32_63 = arith.constant 8 : i32
    %187 = arith.muli %184, %c8_i32_63 : i32
    %188 = tpu.assume_multiple %187, 8 : i32
    %189 = arith.index_cast %186 : i32 to index
    %c0_64 = arith.constant 0 : index
    %190 = vector.load %arg16[%189, %c0_64] : memref<64x256xf32, #tpu.memory_space<vmem>>, vector<8x256xf32>
    %191 = arith.index_cast %188 : i32 to index
    %c0_65 = arith.constant 0 : index
    %192 = vector.load %arg16[%191, %c0_65] : memref<64x256xf32, #tpu.memory_space<vmem>>, vector<8x256xf32>
    %193 = arith.select %46, %190, %192 : vector<8x256xi1>, vector<8x256xf32>
    %cst_66 = arith.constant dense<0.000000e+00> : vector<8x256xf32>
    %194 = tpu.matmul %177, %41, %cst_66 {dimension_numbers = #tpu.dot_dimension_numbers<[1], [0], [0], [1], [0, 0, 1, 1], [], []>} : vector<8x64xf32>, vector<64x256xf32>, vector<8x256xf32> -> vector<8x256xf32>
    %195 = arith.addf %193, %194 : vector<8x256xf32>
    %196 = vector.extract_strided_slice %195 {offsets = [0, 0], sizes = [8, 192], strides = [1, 1]} : vector<8x256xf32> to vector<8x192xf32>
    %197 = arith.negf %196 : vector<8x192xf32>
    %198 = math.exp %197 : vector<8x192xf32>
    %cst_67 = arith.constant 1.000000e+00 : f32
    %199 = vector.broadcast %cst_67 : f32 to vector<8x192xf32>
    %200 = arith.addf %199, %198 : vector<8x192xf32>
    %201 = arith.divf %199, %200 : vector<8x192xf32>
    %202 = vector.extract_strided_slice %195 {offsets = [0, 192], sizes = [8, 64], strides = [1, 1]} : vector<8x256xf32> to vector<8x64xf32>
    %203 = math.tanh %202 : vector<8x64xf32>
    %204 = vector.extract_strided_slice %201 {offsets = [0, 0], sizes = [8, 64], strides = [1, 1]} : vector<8x192xf32> to vector<8x64xf32>
    %205 = vector.extract_strided_slice %201 {offsets = [0, 64], sizes = [8, 64], strides = [1, 1]} : vector<8x192xf32> to vector<8x64xf32>
    %206 = vector.extract_strided_slice %201 {offsets = [0, 128], sizes = [8, 64], strides = [1, 1]} : vector<8x192xf32> to vector<8x64xf32>
    %207 = arith.mulf %205, %175 : vector<8x64xf32>
    %208 = arith.mulf %204, %203 : vector<8x64xf32>
    %209 = arith.addf %207, %208 : vector<8x64xf32>
    %210 = math.tanh %209 : vector<8x64xf32>
    %211 = arith.mulf %206, %210 : vector<8x64xf32>
    %212 = vector.extract_strided_slice %211 {offsets = [0, 0], sizes = [8, 32], strides = [1, 1]} : vector<8x64xf32> to vector<8x32xf32>
    %213 = arith.index_cast %186 : i32 to index
    %c0_68 = arith.constant 0 : index
    %214 = vector.load %arg17[%213, %c0_68] : memref<64x64xf32, #tpu.memory_space<vmem>>, vector<8x32xf32>
    tpu.vector_store %arg17[%213, %c0_68], %212 {strides = array<i32>} : memref<64x64xf32, #tpu.memory_space<vmem>>, vector<8x32xf32>,
    %215 = vector.extract_strided_slice %211 {offsets = [0, 32], sizes = [8, 32], strides = [1, 1]} : vector<8x64xf32> to vector<8x32xf32>
    %216 = arith.index_cast %188 : i32 to index
    %c32_69 = arith.constant 32 : index
    %217 = vector.load %arg17[%216, %c32_69] : memref<64x64xf32, #tpu.memory_space<vmem>>, vector<8x32xf32>
    tpu.vector_store %arg17[%216, %c32_69], %215 {strides = array<i32>} : memref<64x64xf32, #tpu.memory_space<vmem>>, vector<8x32xf32>,
    %c5_i32 = arith.constant 5 : i32
    %c7_i32_70 = arith.constant 7 : i32
    %218 = arith.subi %c7_i32_70, %c5_i32 : i32
    %c8_i32_71 = arith.constant 8 : i32
    %219 = arith.muli %c5_i32, %c8_i32_71 : i32
    %220 = tpu.assume_multiple %219, 8 : i32
    %c8_i32_72 = arith.constant 8 : i32
    %221 = arith.muli %218, %c8_i32_72 : i32
    %222 = tpu.assume_multiple %221, 8 : i32
    %223 = arith.index_cast %220 : i32 to index
    %c0_73 = arith.constant 0 : index
    %224 = vector.load %arg16[%223, %c0_73] : memref<64x256xf32, #tpu.memory_space<vmem>>, vector<8x256xf32>
    %225 = arith.index_cast %222 : i32 to index
    %c0_74 = arith.constant 0 : index
    %226 = vector.load %arg16[%225, %c0_74] : memref<64x256xf32, #tpu.memory_space<vmem>>, vector<8x256xf32>
    %227 = arith.select %46, %224, %226 : vector<8x256xi1>, vector<8x256xf32>
    %cst_75 = arith.constant dense<0.000000e+00> : vector<8x256xf32>
    %228 = tpu.matmul %211, %41, %cst_75 {dimension_numbers = #tpu.dot_dimension_numbers<[1], [0], [0], [1], [0, 0, 1, 1], [], []>} : vector<8x64xf32>, vector<64x256xf32>, vector<8x256xf32> -> vector<8x256xf32>
    %229 = arith.addf %227, %228 : vector<8x256xf32>
    %230 = vector.extract_strided_slice %229 {offsets = [0, 0], sizes = [8, 192], strides = [1, 1]} : vector<8x256xf32> to vector<8x192xf32>
    %231 = arith.negf %230 : vector<8x192xf32>
    %232 = math.exp %231 : vector<8x192xf32>
    %cst_76 = arith.constant 1.000000e+00 : f32
    %233 = vector.broadcast %cst_76 : f32 to vector<8x192xf32>
    %234 = arith.addf %233, %232 : vector<8x192xf32>
    %235 = arith.divf %233, %234 : vector<8x192xf32>
    %236 = vector.extract_strided_slice %229 {offsets = [0, 192], sizes = [8, 64], strides = [1, 1]} : vector<8x256xf32> to vector<8x64xf32>
    %237 = math.tanh %236 : vector<8x64xf32>
    %238 = vector.extract_strided_slice %235 {offsets = [0, 0], sizes = [8, 64], strides = [1, 1]} : vector<8x192xf32> to vector<8x64xf32>
    %239 = vector.extract_strided_slice %235 {offsets = [0, 64], sizes = [8, 64], strides = [1, 1]} : vector<8x192xf32> to vector<8x64xf32>
    %240 = vector.extract_strided_slice %235 {offsets = [0, 128], sizes = [8, 64], strides = [1, 1]} : vector<8x192xf32> to vector<8x64xf32>
    %241 = arith.mulf %239, %209 : vector<8x64xf32>
    %242 = arith.mulf %238, %237 : vector<8x64xf32>
    %243 = arith.addf %241, %242 : vector<8x64xf32>
    %244 = math.tanh %243 : vector<8x64xf32>
    %245 = arith.mulf %240, %244 : vector<8x64xf32>
    %246 = vector.extract_strided_slice %245 {offsets = [0, 0], sizes = [8, 32], strides = [1, 1]} : vector<8x64xf32> to vector<8x32xf32>
    %247 = arith.index_cast %220 : i32 to index
    %c0_77 = arith.constant 0 : index
    %248 = vector.load %arg17[%247, %c0_77] : memref<64x64xf32, #tpu.memory_space<vmem>>, vector<8x32xf32>
    tpu.vector_store %arg17[%247, %c0_77], %246 {strides = array<i32>} : memref<64x64xf32, #tpu.memory_space<vmem>>, vector<8x32xf32>,
    %249 = vector.extract_strided_slice %245 {offsets = [0, 32], sizes = [8, 32], strides = [1, 1]} : vector<8x64xf32> to vector<8x32xf32>
    %250 = arith.index_cast %222 : i32 to index
    %c32_78 = arith.constant 32 : index
    %251 = vector.load %arg17[%250, %c32_78] : memref<64x64xf32, #tpu.memory_space<vmem>>, vector<8x32xf32>
    tpu.vector_store %arg17[%250, %c32_78], %249 {strides = array<i32>} : memref<64x64xf32, #tpu.memory_space<vmem>>, vector<8x32xf32>,
    %c6_i32 = arith.constant 6 : i32
    %c7_i32_79 = arith.constant 7 : i32
    %252 = arith.subi %c7_i32_79, %c6_i32 : i32
    %c8_i32_80 = arith.constant 8 : i32
    %253 = arith.muli %c6_i32, %c8_i32_80 : i32
    %254 = tpu.assume_multiple %253, 8 : i32
    %c8_i32_81 = arith.constant 8 : i32
    %255 = arith.muli %252, %c8_i32_81 : i32
    %256 = tpu.assume_multiple %255, 8 : i32
    %257 = arith.index_cast %254 : i32 to index
    %c0_82 = arith.constant 0 : index
    %258 = vector.load %arg16[%257, %c0_82] : memref<64x256xf32, #tpu.memory_space<vmem>>, vector<8x256xf32>
    %259 = arith.index_cast %256 : i32 to index
    %c0_83 = arith.constant 0 : index
    %260 = vector.load %arg16[%259, %c0_83] : memref<64x256xf32, #tpu.memory_space<vmem>>, vector<8x256xf32>
    %261 = arith.select %46, %258, %260 : vector<8x256xi1>, vector<8x256xf32>
    %cst_84 = arith.constant dense<0.000000e+00> : vector<8x256xf32>
    %262 = tpu.matmul %245, %41, %cst_84 {dimension_numbers = #tpu.dot_dimension_numbers<[1], [0], [0], [1], [0, 0, 1, 1], [], []>} : vector<8x64xf32>, vector<64x256xf32>, vector<8x256xf32> -> vector<8x256xf32>
    %263 = arith.addf %261, %262 : vector<8x256xf32>
    %264 = vector.extract_strided_slice %263 {offsets = [0, 0], sizes = [8, 192], strides = [1, 1]} : vector<8x256xf32> to vector<8x192xf32>
    %265 = arith.negf %264 : vector<8x192xf32>
    %266 = math.exp %265 : vector<8x192xf32>
    %cst_85 = arith.constant 1.000000e+00 : f32
    %267 = vector.broadcast %cst_85 : f32 to vector<8x192xf32>
    %268 = arith.addf %267, %266 : vector<8x192xf32>
    %269 = arith.divf %267, %268 : vector<8x192xf32>
    %270 = vector.extract_strided_slice %263 {offsets = [0, 192], sizes = [8, 64], strides = [1, 1]} : vector<8x256xf32> to vector<8x64xf32>
    %271 = math.tanh %270 : vector<8x64xf32>
    %272 = vector.extract_strided_slice %269 {offsets = [0, 0], sizes = [8, 64], strides = [1, 1]} : vector<8x192xf32> to vector<8x64xf32>
    %273 = vector.extract_strided_slice %269 {offsets = [0, 64], sizes = [8, 64], strides = [1, 1]} : vector<8x192xf32> to vector<8x64xf32>
    %274 = vector.extract_strided_slice %269 {offsets = [0, 128], sizes = [8, 64], strides = [1, 1]} : vector<8x192xf32> to vector<8x64xf32>
    %275 = arith.mulf %273, %243 : vector<8x64xf32>
    %276 = arith.mulf %272, %271 : vector<8x64xf32>
    %277 = arith.addf %275, %276 : vector<8x64xf32>
    %278 = math.tanh %277 : vector<8x64xf32>
    %279 = arith.mulf %274, %278 : vector<8x64xf32>
    %280 = vector.extract_strided_slice %279 {offsets = [0, 0], sizes = [8, 32], strides = [1, 1]} : vector<8x64xf32> to vector<8x32xf32>
    %281 = arith.index_cast %254 : i32 to index
    %c0_86 = arith.constant 0 : index
    %282 = vector.load %arg17[%281, %c0_86] : memref<64x64xf32, #tpu.memory_space<vmem>>, vector<8x32xf32>
    tpu.vector_store %arg17[%281, %c0_86], %280 {strides = array<i32>} : memref<64x64xf32, #tpu.memory_space<vmem>>, vector<8x32xf32>,
    %283 = vector.extract_strided_slice %279 {offsets = [0, 32], sizes = [8, 32], strides = [1, 1]} : vector<8x64xf32> to vector<8x32xf32>
    %284 = arith.index_cast %256 : i32 to index
    %c32_87 = arith.constant 32 : index
    %285 = vector.load %arg17[%284, %c32_87] : memref<64x64xf32, #tpu.memory_space<vmem>>, vector<8x32xf32>
    tpu.vector_store %arg17[%284, %c32_87], %283 {strides = array<i32>} : memref<64x64xf32, #tpu.memory_space<vmem>>, vector<8x32xf32>,
    %c7_i32_88 = arith.constant 7 : i32
    %c7_i32_89 = arith.constant 7 : i32
    %286 = arith.subi %c7_i32_89, %c7_i32_88 : i32
    %c8_i32_90 = arith.constant 8 : i32
    %287 = arith.muli %c7_i32_88, %c8_i32_90 : i32
    %288 = tpu.assume_multiple %287, 8 : i32
    %c8_i32_91 = arith.constant 8 : i32
    %289 = arith.muli %286, %c8_i32_91 : i32
    %290 = tpu.assume_multiple %289, 8 : i32
    %291 = arith.index_cast %288 : i32 to index
    %c0_92 = arith.constant 0 : index
    %292 = vector.load %arg16[%291, %c0_92] : memref<64x256xf32, #tpu.memory_space<vmem>>, vector<8x256xf32>
    %293 = arith.index_cast %290 : i32 to index
    %c0_93 = arith.constant 0 : index
    %294 = vector.load %arg16[%293, %c0_93] : memref<64x256xf32, #tpu.memory_space<vmem>>, vector<8x256xf32>
    %295 = arith.select %46, %292, %294 : vector<8x256xi1>, vector<8x256xf32>
    %cst_94 = arith.constant dense<0.000000e+00> : vector<8x256xf32>
    %296 = tpu.matmul %279, %41, %cst_94 {dimension_numbers = #tpu.dot_dimension_numbers<[1], [0], [0], [1], [0, 0, 1, 1], [], []>} : vector<8x64xf32>, vector<64x256xf32>, vector<8x256xf32> -> vector<8x256xf32>
    %297 = arith.addf %295, %296 : vector<8x256xf32>
    %298 = vector.extract_strided_slice %297 {offsets = [0, 0], sizes = [8, 192], strides = [1, 1]} : vector<8x256xf32> to vector<8x192xf32>
    %299 = arith.negf %298 : vector<8x192xf32>
    %300 = math.exp %299 : vector<8x192xf32>
    %cst_95 = arith.constant 1.000000e+00 : f32
    %301 = vector.broadcast %cst_95 : f32 to vector<8x192xf32>
    %302 = arith.addf %301, %300 : vector<8x192xf32>
    %303 = arith.divf %301, %302 : vector<8x192xf32>
    %304 = vector.extract_strided_slice %297 {offsets = [0, 192], sizes = [8, 64], strides = [1, 1]} : vector<8x256xf32> to vector<8x64xf32>
    %305 = math.tanh %304 : vector<8x64xf32>
    %306 = vector.extract_strided_slice %303 {offsets = [0, 0], sizes = [8, 64], strides = [1, 1]} : vector<8x192xf32> to vector<8x64xf32>
    %307 = vector.extract_strided_slice %303 {offsets = [0, 64], sizes = [8, 64], strides = [1, 1]} : vector<8x192xf32> to vector<8x64xf32>
    %308 = vector.extract_strided_slice %303 {offsets = [0, 128], sizes = [8, 64], strides = [1, 1]} : vector<8x192xf32> to vector<8x64xf32>
    %309 = arith.mulf %307, %277 : vector<8x64xf32>
    %310 = arith.mulf %306, %305 : vector<8x64xf32>
    %311 = arith.addf %309, %310 : vector<8x64xf32>
    %312 = math.tanh %311 : vector<8x64xf32>
    %313 = arith.mulf %308, %312 : vector<8x64xf32>
    %314 = vector.extract_strided_slice %313 {offsets = [0, 0], sizes = [8, 32], strides = [1, 1]} : vector<8x64xf32> to vector<8x32xf32>
    %315 = arith.index_cast %288 : i32 to index
    %c0_96 = arith.constant 0 : index
    %316 = vector.load %arg17[%315, %c0_96] : memref<64x64xf32, #tpu.memory_space<vmem>>, vector<8x32xf32>
    tpu.vector_store %arg17[%315, %c0_96], %314 {strides = array<i32>} : memref<64x64xf32, #tpu.memory_space<vmem>>, vector<8x32xf32>,
    %317 = vector.extract_strided_slice %313 {offsets = [0, 32], sizes = [8, 32], strides = [1, 1]} : vector<8x64xf32> to vector<8x32xf32>
    %318 = arith.index_cast %290 : i32 to index
    %c32_97 = arith.constant 32 : index
    %319 = vector.load %arg17[%318, %c32_97] : memref<64x64xf32, #tpu.memory_space<vmem>>, vector<8x32xf32>
    tpu.vector_store %arg17[%318, %c32_97], %317 {strides = array<i32>} : memref<64x64xf32, #tpu.memory_space<vmem>>, vector<8x32xf32>,
    %c8_i32_98 = arith.constant 8 : i32
    %c0_99 = arith.constant 0 : index
    %c0_100 = arith.constant 0 : index
    %320 = vector.load %arg17[%c0_99, %c0_100] : memref<64x64xf32, #tpu.memory_space<vmem>>, vector<64x64xf32>
    %c0_101 = arith.constant 0 : index
    %c0_102 = arith.constant 0 : index
    %321 = vector.load %arg7[%c0_101, %c0_102] : memref<64x192xf32, #tpu.memory_space<vmem>>, vector<64x192xf32>
    %cst_103 = arith.constant dense<0.000000e+00> : vector<64x192xf32>
    %322 = tpu.matmul %320, %321, %cst_103 {dimension_numbers = #tpu.dot_dimension_numbers<[1], [0], [0], [1], [0, 0, 1, 1], [], []>} : vector<64x64xf32>, vector<64x192xf32>, vector<64x192xf32> -> vector<64x192xf32>
    %c0_104 = arith.constant 0 : index
    %c0_105 = arith.constant 0 : index
    %323 = vector.load %arg8[%c0_104, %c0_105] : memref<1x192xf32, #tpu.memory_space<vmem>>, vector<1x192xf32>
    %324 = vector.broadcast %323 : vector<1x192xf32> to vector<64x192xf32>
    %325 = arith.addf %322, %324 : vector<64x192xf32>
    %326 = vector.shape_cast %325 : vector<64x192xf32> to vector<8x8x192xf32>
    %327 = vector.extract_strided_slice %326 {offsets = [0, 0, 0], sizes = [8, 8, 64], strides = [1, 1, 1]} : vector<8x8x192xf32> to vector<8x8x64xf32>
    %328 = vector.extract_strided_slice %326 {offsets = [0, 0, 64], sizes = [8, 8, 64], strides = [1, 1, 1]} : vector<8x8x192xf32> to vector<8x8x64xf32>
    %329 = vector.extract_strided_slice %326 {offsets = [0, 0, 128], sizes = [8, 8, 64], strides = [1, 1, 1]} : vector<8x8x192xf32> to vector<8x8x64xf32>
    %330 = tpu.iota {dimensions = array<i32: 0>} : vector<64x64xi32>
    %331 = tpu.iota {dimensions = array<i32: 1>} : vector<64x64xi32>
    %332 = arith.subi %330, %331 : vector<64x64xi32>
    %c7_i32_106 = arith.constant 7 : i32
    %333 = vector.broadcast %c7_i32_106 : i32 to vector<64x64xi32>
    %334 = arith.andi %332, %333 : vector<64x64xi32>
    %c0_i32_107 = arith.constant 0 : i32
    %335 = vector.broadcast %c0_i32_107 : i32 to vector<64x64xi32>
    %336 = arith.cmpi eq, %334, %335 : vector<64x64xi32>
    %337 = vector.shape_cast %327 : vector<8x8x64xf32> to vector<64x64xf32>
    %338 = vector.shape_cast %328 : vector<8x8x64xf32> to vector<64x64xf32>
    %339 = vector.shape_cast %329 : vector<8x8x64xf32> to vector<64x64xf32>
    %cst_108 = arith.constant dense<0.000000e+00> : vector<64x64xf32>
    %340 = tpu.matmul %337, %338, %cst_108 {dimension_numbers = #tpu.dot_dimension_numbers<[1], [1], [0], [0], [0, 0, 1, 0], [], []>} : vector<64x64xf32>, vector<64x64xf32>, vector<64x64xf32> -> vector<64x64xf32>
    %cst_109 = arith.constant 1.250000e-01 : f32
    %341 = vector.broadcast %cst_109 : f32 to vector<64x64xf32>
    %342 = arith.mulf %340, %341 : vector<64x64xf32>
    %cst_110 = arith.constant -1.000000e+30 : f32
    %343 = vector.broadcast %cst_110 : f32 to vector<64x64xf32>
    %344 = arith.select %336, %342, %343 : vector<64x64xi1>, vector<64x64xf32>
    %cst_111 = arith.constant dense<0xFF800000> : vector<64xf32>
    %345 = vector.multi_reduction <maximumf>, %344, %cst_111 [1] : vector<64x64xf32> to vector<64xf32>
    %346 = vector.shape_cast %345 : vector<64xf32> to vector<64x1xf32>
    %347 = vector.broadcast %346 : vector<64x1xf32> to vector<64x64xf32>
    %348 = arith.subf %344, %347 : vector<64x64xf32>
    %349 = math.exp %348 : vector<64x64xf32>
    %cst_112 = arith.constant dense<0.000000e+00> : vector<64xf32>
    %350 = vector.multi_reduction <add>, %349, %cst_112 [1] : vector<64x64xf32> to vector<64xf32>
    %351 = vector.shape_cast %350 : vector<64xf32> to vector<64x1xf32>
    %352 = tpu.reciprocal %351 {approx = true} : vector<64x1xf32> -> vector<64x1xf32>
    %353 = vector.broadcast %352 : vector<64x1xf32> to vector<64x64xf32>
    %354 = arith.mulf %349, %353 : vector<64x64xf32>
    %cst_113 = arith.constant dense<0.000000e+00> : vector<64x64xf32>
    %355 = tpu.matmul %354, %339, %cst_113 {dimension_numbers = #tpu.dot_dimension_numbers<[1], [0], [0], [1], [0, 0, 1, 1], [], []>} : vector<64x64xf32>, vector<64x64xf32>, vector<64x64xf32> -> vector<64x64xf32>
    %356 = vector.shape_cast %355 : vector<64x64xf32> to vector<8x8x64xf32>
    %357 = vector.shape_cast %356 : vector<8x8x64xf32> to vector<64x64xf32>
    %c0_114 = arith.constant 0 : index
    %c0_115 = arith.constant 0 : index
    %358 = vector.load %arg9[%c0_114, %c0_115] : memref<64x64xf32, #tpu.memory_space<vmem>>, vector<64x64xf32>
    %cst_116 = arith.constant dense<0.000000e+00> : vector<64x64xf32>
    %359 = tpu.matmul %357, %358, %cst_116 {dimension_numbers = #tpu.dot_dimension_numbers<[1], [0], [0], [1], [0, 0, 1, 1], [], []>} : vector<64x64xf32>, vector<64x64xf32>, vector<64x64xf32> -> vector<64x64xf32>
    %c0_117 = arith.constant 0 : index
    %c0_118 = arith.constant 0 : index
    %360 = vector.load %arg10[%c0_117, %c0_118] : memref<1x64xf32, #tpu.memory_space<vmem>>, vector<1x64xf32>
    %361 = vector.broadcast %360 : vector<1x64xf32> to vector<64x64xf32>
    %362 = arith.addf %359, %361 : vector<64x64xf32>
    %363 = vector.shape_cast %362 : vector<64x64xf32> to vector<8x8x64xf32>
    %c0_119 = arith.constant 0 : index
    %c0_120 = arith.constant 0 : index
    %c0_121 = arith.constant 0 : index
    %364 = vector.load %arg11[%c0_119, %c0_120, %c0_121] : memref<8x64x10xf32, #tpu.memory_space<vmem>>, vector<8x64x10xf32>
    %cst_122 = arith.constant dense<0.000000e+00> : vector<8x8x10xf32>
    %365 = tpu.matmul %363, %364, %cst_122 {dimension_numbers = #tpu.dot_dimension_numbers<[2], [1], [1], [2], [0, 0, 0, 1, 1, 2], [0], [0]>} : vector<8x8x64xf32>, vector<8x64x10xf32>, vector<8x8x10xf32> -> vector<8x8x10xf32>
    %cst_123 = arith.constant dense<0.000000e+00> : vector<8x10xf32>
    %366 = vector.multi_reduction <add>, %365, %cst_123 [0] : vector<8x8x10xf32> to vector<8x10xf32>
    %c0_124 = arith.constant 0 : index
    %c0_125 = arith.constant 0 : index
    %367 = vector.load %arg12[%c0_124, %c0_125] : memref<1x10xf32, #tpu.memory_space<vmem>>, vector<1x10xf32>
    %368 = vector.broadcast %367 : vector<1x10xf32> to vector<8x10xf32>
    %369 = arith.addf %366, %368 : vector<8x10xf32>
    %cst_126 = arith.constant 0.000000e+00 : f32
    %370 = vector.broadcast %cst_126 : f32 to vector<8x10xf32>
    %371 = arith.maximumf %369, %370 : vector<8x10xf32>
    %c0_127 = arith.constant 0 : index
    %c0_128 = arith.constant 0 : index
    %372 = vector.load %arg13[%c0_127, %c0_128] : memref<10x1xf32, #tpu.memory_space<vmem>>, vector<10x1xf32>
    %cst_129 = arith.constant dense<0.000000e+00> : vector<8x1xf32>
    %373 = tpu.matmul %371, %372, %cst_129 {dimension_numbers = #tpu.dot_dimension_numbers<[1], [0], [0], [1], [0, 0, 1, 1], [], []>} : vector<8x10xf32>, vector<10x1xf32>, vector<8x1xf32> -> vector<8x1xf32>
    %c0_130 = arith.constant 0 : index
    %c0_131 = arith.constant 0 : index
    %374 = vector.load %arg14[%c0_130, %c0_131] : memref<1x1xf32, #tpu.memory_space<vmem>>, vector<1x1xf32>
    %375 = vector.broadcast %374 : vector<1x1xf32> to vector<8x1xf32>
    %376 = arith.addf %373, %375 : vector<8x1xf32>
    %c0_132 = arith.constant 0 : index
    %c0_133 = arith.constant 0 : index
    %377 = vector.load %arg15[%c0_132, %c0_133] : memref<8x1xf32, #tpu.memory_space<vmem>>, vector<8x1xf32>
    tpu.vector_store %arg15[%c0_132, %c0_133], %376 {strides = array<i32>} : memref<8x1xf32, #tpu.memory_space<vmem>>, vector<8x1xf32>,
    return
  }
  func.func @transform_0(%arg0: i32) -> (i32, i32, i32) {
    %c0_i32 = arith.constant 0 : i32
    %c0_i32_0 = arith.constant 0 : i32
    %c0_i32_1 = arith.constant 0 : i32
    return %c0_i32, %arg0, %c0_i32_0 : i32, i32, i32
  }
  func.func @transform_1(%arg0: i32) -> (i32, i32, i32) {
    %c0_i32 = arith.constant 0 : i32
    %c0_i32_0 = arith.constant 0 : i32
    %c0_i32_1 = arith.constant 0 : i32
    %c0_i32_2 = arith.constant 0 : i32
    return %c0_i32, %c0_i32_0, %c0_i32_1 : i32, i32, i32
  }
  func.func @transform_2(%arg0: i32) -> (i32, i32) {
    %c0_i32 = arith.constant 0 : i32
    %c0_i32_0 = arith.constant 0 : i32
    %c0_i32_1 = arith.constant 0 : i32
    return %c0_i32, %c0_i32_0 : i32, i32
  }
  func.func @transform_3(%arg0: i32) -> (i32, i32) {
    %c0_i32 = arith.constant 0 : i32
    %c0_i32_0 = arith.constant 0 : i32
    %c0_i32_1 = arith.constant 0 : i32
    return %c0_i32, %c0_i32_0 : i32, i32
  }
  func.func @transform_4(%arg0: i32) -> (i32, i32) {
    %c0_i32 = arith.constant 0 : i32
    %c0_i32_0 = arith.constant 0 : i32
    %c0_i32_1 = arith.constant 0 : i32
    return %c0_i32, %c0_i32_0 : i32, i32
  }
  func.func @transform_5(%arg0: i32) -> (i32, i32) {
    %c0_i32 = arith.constant 0 : i32
    %c0_i32_0 = arith.constant 0 : i32
    %c0_i32_1 = arith.constant 0 : i32
    return %c0_i32, %c0_i32_0 : i32, i32
  }
  func.func @transform_6(%arg0: i32) -> (i32, i32) {
    %c0_i32 = arith.constant 0 : i32
    %c0_i32_0 = arith.constant 0 : i32
    %c0_i32_1 = arith.constant 0 : i32
    return %c0_i32, %c0_i32_0 : i32, i32
  }
  func.func @transform_7(%arg0: i32) -> (i32, i32) {
    %c0_i32 = arith.constant 0 : i32
    %c0_i32_0 = arith.constant 0 : i32
    %c0_i32_1 = arith.constant 0 : i32
    return %c0_i32, %c0_i32_0 : i32, i32
  }
  func.func @transform_8(%arg0: i32) -> (i32, i32) {
    %c0_i32 = arith.constant 0 : i32
    %c0_i32_0 = arith.constant 0 : i32
    %c0_i32_1 = arith.constant 0 : i32
    return %c0_i32, %c0_i32_0 : i32, i32
  }
  func.func @transform_9(%arg0: i32) -> (i32, i32) {
    %c0_i32 = arith.constant 0 : i32
    %c0_i32_0 = arith.constant 0 : i32
    %c0_i32_1 = arith.constant 0 : i32
    return %c0_i32, %c0_i32_0 : i32, i32
  }
  func.func @transform_10(%arg0: i32) -> (i32, i32, i32) {
    %c0_i32 = arith.constant 0 : i32
    %c0_i32_0 = arith.constant 0 : i32
    %c0_i32_1 = arith.constant 0 : i32
    %c0_i32_2 = arith.constant 0 : i32
    return %c0_i32, %c0_i32_0, %c0_i32_1 : i32, i32, i32
  }
  func.func @transform_11(%arg0: i32) -> (i32, i32) {
    %c0_i32 = arith.constant 0 : i32
    %c0_i32_0 = arith.constant 0 : i32
    %c0_i32_1 = arith.constant 0 : i32
    return %c0_i32, %c0_i32_0 : i32, i32
  }
  func.func @transform_12(%arg0: i32) -> (i32, i32) {
    %c0_i32 = arith.constant 0 : i32
    %c0_i32_0 = arith.constant 0 : i32
    %c0_i32_1 = arith.constant 0 : i32
    return %c0_i32, %c0_i32_0 : i32, i32
  }
  func.func @transform_13(%arg0: i32) -> (i32, i32) {
    %c0_i32 = arith.constant 0 : i32
    %c0_i32_0 = arith.constant 0 : i32
    %c0_i32_1 = arith.constant 0 : i32
    return %c0_i32, %c0_i32_0 : i32, i32
  }
  func.func @transform_14(%arg0: i32) -> (i32, i32) {
    %c0_i32 = arith.constant 0 : i32
    %c0_i32_0 = arith.constant 0 : i32
    return %arg0, %c0_i32 : i32, i32
  }
}

</mosaic_0001>

<bundles_post_ra>
// kernel: neurlux_forward.1
= control target key start
LH: loop header
LB: loop body
LE: loop exit
PB: predicated region body
PF: predicated region fallthrough
CT: control target
= control target key end

     0   :  { %s7852_s0 = inlined_call_operand.vmem [shape: f32[35,16,32], index: 0, kind: input, shape index: {}]   ;;  %s7853_s1 = inlined_call_operand.vmem [shape: f32[4,32,128], index: 1, kind: input, shape index: {}]   ;;  %s7854_s2 = inlined_call_operand.vmem [shape: f32[1,128], index: 2, kind: input, shape index: {}]   ;;  %s7855_s3 = inlined_call_operand.vmem [shape: f32[128,256], index: 3, kind: input, shape index: {}]   ;;  %s7856_s4 = inlined_call_operand.vmem [shape: f32[1,256], index: 4, kind: input, shape index: {}]   ;;  %s7857_s5 = inlined_call_operand.vmem [shape: f32[64,256], index: 5, kind: input, shape index: {}]   ;;  %s7858_s6 = inlined_call_operand.vmem [shape: f32[64,192], index: 6, kind: input, shape index: {}]   ;;  %s7859_s7 = inlined_call_operand.vmem [shape: f32[1,192], index: 7, kind: input, shape index: {}]   ;;  %s7860_s8 = inlined_call_operand.vmem [shape: f32[64,64], index: 8, kind: input, shape index: {}]   ;;  %s7861_s9 = inlined_call_operand.vmem [shape: f32[1,64], index: 9, kind: input, shape index: {}]   ;;  %s7862_s10 = inlined_call_operand.vmem [shape: f32[8,64,10], index: 10, kind: input, shape index: {}]   ;;  %s7863_s11 = inlined_call_operand.vmem [shape: f32[1,10], index: 11, kind: input, shape index: {}]   ;;  %s7864_s12 = inlined_call_operand.vmem [shape: f32[10,1], index: 12, kind: input, shape index: {}]   ;;  %s7865_s13 = inlined_call_operand.<no memory space> [shape: f32[1,1], index: 13, kind: input, shape index: {}]   ;;  %s7866_s14 = inlined_call_operand.vmem [shape: f32[16,1], index: 14, kind: output, shape index: {}]  }
   0x1   :  { %v19_v0 = vstv %s7865_s13 }
   0x2   :  { %20 = vst [vmem:[#allocation4] sm:$0x1] %v19_v0 }
   0x3   :  { %s6339_s15 = smov 0   ;;  %s6341_s16 = smov 0  }
   0x4   :  { %s6343_s17 = smov 0  }
   0x5 LB: > { %s4601_s13 = sadd.s32 4294967295, %s6254_s17   ;;  %s6356_s18 = sadd.s32 1, %s6254_s17   ;;  %s6254_s17 = sphi %s6343_s17, %s7875_s17   ;;  %s6250_s16 = sphi %s6341_s16, %s7874_s16   ;;  %s6246_s15 = sphi %s6339_s15, %s7873_s15  }
   0x6   : > { %s30_s19 = ssub.s32 %s6254_s17, %s6356_s18  ;;  %s33_s20 = sadd.s32 1, %s6250_s16 }
   0x7   : > { %p31_p0 = scmp.eq.s32.totalorder %s30_s19, 0  ;;  %p40_p1 = scmp.ne.s32.totalorder %s6250_s16, %s6246_s15 }
   0x8   : > { %p41_p2 = scmp.eq.s32.totalorder %s6254_s17, 0  ;;  %p4604_p4 = scmp.ge.s32.totalorder %s6254_s17, 2 }
   0x9   : > { %s6365_s21 = scalar_select %p31_p0, %s6250_s16, %s33_s20  }
   0xa   : > { %p42_p3 = por %p41_p2, %p40_p1  ;;  %404 = sbr.rel (%p4604_p4) target bundleno = 39 (0x27), region = 68 }
  0x11   : > { %407 = sbr.rel (!%p42_p3) target bundleno = 39 (0x27), region = 72  ;;  %s409_s22 = sand.u32 (%p42_p3), 1, %s6250_s16  }
  0x12   : > { %s4605_s23 = sshll.u32 (%p42_p3), %s6254_s17, 3  ;;  %s6053_s24 = smul.u32 (%p42_p3), 280, %s409_s22 }
  0x13   : > { %s6373_s27 = scalar_lea.vmem (%p42_p3), %s7852_s0, %s4605_s23 }
  0x14   : > { %v509_v1 = vld [vmem:[%s6373_s27] sm:$0xff] (%p42_p3)  ;;  %v511_v2 = vld [vmem:[%s6373_s27 + $0x10] sm:$0xff] (%p42_p3)  ;;  %s6381_s28 = scalar_lea.vmem (%p42_p3), [#allocation5], %s6053_s24 }
  0x15   : > { %v513_v3 = vld [vmem:[%s6373_s27 + $0x20] sm:$0xff] (%p42_p3)  ;;  %v515_v4 = vld [vmem:[%s6373_s27 + $0x30] sm:$0xff] (%p42_p3)  ;;  %510 = vst [vmem:[%s6381_s28] sm:$0xff] (%p42_p3), %v509_v1  ;;  %512 = vst [vmem:[%s6381_s28 + $0x8] sm:$0xff] (%p42_p3), %v511_v2 }
  0x16   : > { %v517_v5 = vld [vmem:[%s6373_s27 + $0x40] sm:$0xff] (%p42_p3)  ;;  %v519_v6 = vld [vmem:[%s6373_s27 + $0x50] sm:$0xff] (%p42_p3)  ;;  %514 = vst [vmem:[%s6381_s28 + $0x10] sm:$0xff] (%p42_p3), %v513_v3  ;;  %516 = vst [vmem:[%s6381_s28 + $0x18] sm:$0xff] (%p42_p3), %v515_v4 }
  0x17   : > { %518 = vst [vmem:[%s6381_s28 + $0x20] sm:$0xff] (%p42_p3), %v517_v5  ;;  %520 = vst [vmem:[%s6381_s28 + $0x28] sm:$0xff] (%p42_p3), %v519_v6  ;;  %v521_v7 = vld [vmem:[%s6373_s27 + $0x60] sm:$0xff] (%p42_p3)  ;;  %v523_v8 = vld [vmem:[%s6373_s27 + $0x70] sm:$0xff] (%p42_p3) }
  0x18   : > { %v525_v9 = vld [vmem:[%s6373_s27 + $0x80] sm:$0xff]  ;;  %522 = vst [vmem:[%s6381_s28 + $0x30] sm:$0xff] %v521_v7  ;;  %524 = vst [vmem:[%s6381_s28 + $0x38] sm:$0xff] %v523_v8  ;;  %v527_v10 = vld [vmem:[%s6373_s27 + $0x90] sm:$0xff] }
  0x19   : > { %526 = vst [vmem:[%s6381_s28 + $0x40] sm:$0xff] %v525_v9  ;;  %v529_v11 = vld [vmem:[%s6373_s27 + $0xa0] sm:$0xff]  ;;  %v531_v12 = vld [vmem:[%s6373_s27 + $0xb0] sm:$0xff]  ;;  %528 = vst [vmem:[%s6381_s28 + $0x48] sm:$0xff] %v527_v10 }
  0x1a   : > { %530 = vst [vmem:[%s6381_s28 + $0x50] sm:$0xff] %v529_v11  ;;  %532 = vst [vmem:[%s6381_s28 + $0x58] sm:$0xff] %v531_v12  ;;  %v533_v13 = vld [vmem:[%s6373_s27 + $0xc0] sm:$0xff]  ;;  %v535_v14 = vld [vmem:[%s6373_s27 + $0xd0] sm:$0xff] }
  0x1b   : > { %v537_v15 = vld [vmem:[%s6373_s27 + $0xe0] sm:$0xff]  ;;  %534 = vst [vmem:[%s6381_s28 + $0x60] sm:$0xff] %v533_v13  ;;  %536 = vst [vmem:[%s6381_s28 + $0x68] sm:$0xff] %v535_v14  ;;  %v539_v16 = vld [vmem:[%s6373_s27 + $0xf0] sm:$0xff] }
  0x1c   : > { %538 = vst [vmem:[%s6381_s28 + $0x70] sm:$0xff] %v537_v15  ;;  %v541_v17 = vld [vmem:[%s6373_s27 + $0x100] sm:$0xff]  ;;  %v543_v18 = vld [vmem:[%s6373_s27 + $0x110] sm:$0xff]  ;;  %540 = vst [vmem:[%s6381_s28 + $0x78] sm:$0xff] %v539_v16 }
  0x1d   : > { %542 = vst [vmem:[%s6381_s28 + $0x80] sm:$0xff] %v541_v17  ;;  %544 = vst [vmem:[%s6381_s28 + $0x88] sm:$0xff] %v543_v18  ;;  %v545_v19 = vld [vmem:[%s6373_s27 + $0x120] sm:$0xff]  ;;  %v547_v20 = vld [vmem:[%s6373_s27 + $0x130] sm:$0xff] }
  0x1e   : > { %v549_v21 = vld [vmem:[%s6373_s27 + $0x140] sm:$0xff]  ;;  %546 = vst [vmem:[%s6381_s28 + $0x90] sm:$0xff] %v545_v19  ;;  %548 = vst [vmem:[%s6381_s28 + $0x98] sm:$0xff] %v547_v20  ;;  %v551_v22 = vld [vmem:[%s6373_s27 + $0x150] sm:$0xff] }
  0x1f   : > { %550 = vst [vmem:[%s6381_s28 + $0xa0] sm:$0xff] %v549_v21  ;;  %v553_v23 = vld [vmem:[%s6373_s27 + $0x160] sm:$0xff]  ;;  %v555_v24 = vld [vmem:[%s6373_s27 + $0x170] sm:$0xff]  ;;  %552 = vst [vmem:[%s6381_s28 + $0xa8] sm:$0xff] %v551_v22 }
  0x20   : > { %554 = vst [vmem:[%s6381_s28 + $0xb0] sm:$0xff] %v553_v23  ;;  %556 = vst [vmem:[%s6381_s28 + $0xb8] sm:$0xff] %v555_v24  ;;  %v557_v25 = vld [vmem:[%s6373_s27 + $0x180] sm:$0xff]  ;;  %v559_v26 = vld [vmem:[%s6373_s27 + $0x190] sm:$0xff] }
  0x21   : > { %v561_v27 = vld [vmem:[%s6373_s27 + $0x1a0] sm:$0xff]  ;;  %558 = vst [vmem:[%s6381_s28 + $0xc0] sm:$0xff] %v557_v25  ;;  %560 = vst [vmem:[%s6381_s28 + $0xc8] sm:$0xff] %v559_v26  ;;  %v563_v28 = vld [vmem:[%s6373_s27 + $0x1b0] sm:$0xff] }
  0x22   : > { %562 = vst [vmem:[%s6381_s28 + $0xd0] sm:$0xff] %v561_v27  ;;  %v565_v29 = vld [vmem:[%s6373_s27 + $0x1c0] sm:$0xff]  ;;  %v567_v30 = vld [vmem:[%s6373_s27 + $0x1d0] sm:$0xff]  ;;  %564 = vst [vmem:[%s6381_s28 + $0xd8] sm:$0xff] %v563_v28 }
  0x23   : > { %566 = vst [vmem:[%s6381_s28 + $0xe0] sm:$0xff] %v565_v29  ;;  %568 = vst [vmem:[%s6381_s28 + $0xe8] sm:$0xff] %v567_v30  ;;  %v569_v31 = vld [vmem:[%s6373_s27 + $0x1e0] sm:$0xff]  ;;  %v571_v32 = vld [vmem:[%s6373_s27 + $0x1f0] sm:$0xff] }
  0x24   : > { %v573_v33 = vld [vmem:[%s6373_s27 + $0x200] sm:$0xff]  ;;  %570 = vst [vmem:[%s6381_s28 + $0xf0] sm:$0xff] %v569_v31  ;;  %572 = vst [vmem:[%s6381_s28 + $0xf8] sm:$0xff] %v571_v32  ;;  %v575_v34 = vld [vmem:[%s6373_s27 + $0x210] sm:$0xff] }
  0x25   : > { %574 = vst [vmem:[%s6381_s28 + $0x100] sm:$0xff] %v573_v33  ;;  %v577_v35 = vld [vmem:[%s6373_s27 + $0x220] sm:$0xff]  ;;  %576 = vst [vmem:[%s6381_s28 + $0x108] sm:$0xff] %v575_v34 }
  0x26   : > { %578 = vst [vmem:[%s6381_s28 + $0x110] sm:$0xff] %v577_v35 }
  0x27 PF: > { %p4606_p5 = scmp.ge.s32.totalorder %s6254_s17, 1  ;;  %p583_p6 = scmp.lt.s32.totalorder %s6254_s17, 3 }
  0x29   : > { %p584_p7 = pnand %p4606_p5, %p583_p6 }
  0x2a   : > { %v674_v36 = vld [vmem:[%s7853_s1] sm:$0xff] (!%p584_p7)  ;;  %v675_v37 = vld [vmem:[%s7853_s1 + $0x8] sm:$0xff] (!%p584_p7)  ;;  %v676_v38 = vld [vmem:[%s7853_s1 + $0x10] sm:$0xff] (!%p584_p7)  ;;  %s590_s24 = sand.u32 (!%p584_p7), 1, %s6246_s15   ;;  %vm678_vm0 = vcmask (!%p584_p7), 261120   ;;  %s6257_s26 = smov (!%p584_p7), 64  }
  0x2b   : > { %587 = sbr.rel (%p584_p7) target bundleno = 7058 (0x1b92), region = 110  ;;  %v5561_v39 = vpack.c.bf16 (!%p584_p7), %v675_v37, %v674_v36  ;;  %v677_v40 = vld [vmem:[%s7853_s1 + $0x18] sm:$0xff] (!%p584_p7)  ;;  %v4641_v42 = vld [vmem:[%s7853_s1 + $0x20] sm:$0xff] (!%p584_p7)  ;;  %v4642_v43 = vld [vmem:[%s7853_s1 + $0x28] sm:$0xff] (!%p584_p7)  ;;  %vm2206_vm3 = vcmask (!%p584_p7), 523520   ;;  %vm2097_vm4 = vcmask (!%p584_p7), 523264  }
  0x2c   : > { %s6054_s27 = smul.u32 (!%p584_p7), 280, %s590_s24  ;;  %v5565_v41 = vpack.c.bf16 (!%p584_p7), %v677_v40, %v676_v38  ;;  %v5569_v45 = vpack.c.bf16 (!%p584_p7), %v4642_v43, %v4641_v42  ;;  %v4643_v46 = vld [vmem:[%s7853_s1 + $0x30] sm:$0xff] (!%p584_p7)  ;;  %v4644_v47 = vld [vmem:[%s7853_s1 + $0x38] sm:$0xff] (!%p584_p7)  ;;  %v4677_v51 = vld [vmem:[%s7853_s1 + $0x40] sm:$0xff] (!%p584_p7)  ;;  %vm6259_vm14 = vmmov (!%p584_p7), 0   ;;  %vm4459_vm15 = vcmask (!%p584_p7), 1041408  }
  0x2d   : > { %5562 = vmatprep.subr.bf16.mxu0 (!%p584_p7), %v5561_v39  ;;  %v5573_v50 = vpack.c.bf16 (!%p584_p7), %v4644_v47, %v4643_v46  ;;  %v4678_v52 = vld [vmem:[%s7853_s1 + $0x48] sm:$0xff] (!%p584_p7)  ;;  %v4679_v19 = vld [vmem:[%s7853_s1 + $0x50] sm:$0xff] (!%p584_p7)  ;;  %v4680_v20 = vld [vmem:[%s7853_s1 + $0x58] sm:$0xff] (!%p584_p7)  ;;  %p634_p8 = scmp.lt.s32.totalorder (!%p584_p7), %s4601_s13, 1 }
  0x2e   : > { %5564 = vmatpush3.bf16.msra.mxu0 (!%p584_p7), %v5561_v39  ;;  %s6468_s20 = scalar_lea.vmem (!%p584_p7), [#allocation5], %s6054_s27  ;;  %v6500_v55 = vpack.c.bf16 (!%p584_p7), %v4678_v52, %v4677_v51  ;;  %v5581_v21 = vpack.c.bf16 (!%p584_p7), %v4680_v20, %v4679_v19  ;;  %v4713_v22 = vld [vmem:[%s7853_s1 + $0x60] sm:$0xff] (!%p584_p7)  ;;  %v4714_v23 = vld [vmem:[%s7853_s1 + $0x68] sm:$0xff] (!%p584_p7)  ;;  %v4715_v26 = vld [vmem:[%s7853_s1 + $0x70] sm:$0xff] (!%p584_p7) }
  0x2f   : > { %v638_v44 = vld [vmem:[%s6468_s20] sm:$0xff] (!%p584_p7)  ;;  %5566 = vmatprep.subr.bf16.mxu0 (!%p584_p7), %v5565_v41  ;;  %v6479_v48 = vld [vmem:[%s6468_s20 + $0x8] sm:$0xff] (!%p584_p7)  ;;  %v6482_v49 = vld [vmem:[%s6468_s20 + $0x10] sm:$0xff] (!%p584_p7)  ;;  %v5585_v24 = vpack.c.bf16 (!%p584_p7), %v4714_v23, %v4713_v22 }
  0x30   : > { %5102 = vmatprep.mubr.msk.f32.mxu0 (!%p584_p7), %vm678_vm0, %v638_v44  ;;  %v6495_v53 = vld [vmem:[%s6468_s20 + $0x18] sm:$0xff] (!%p584_p7)  ;;  %v6498_v54 = vld [vmem:[%s6468_s20 + $0x20] sm:$0xff] (!%p584_p7)  ;;  %v6507_v56 = vld [vmem:[%s6468_s20 + $0x28] sm:$0xff] (!%p584_p7) }
  0x31   : > { %v6510_v57 = vld [vmem:[%s6468_s20 + $0x30] sm:$0xff] (!%p584_p7)  ;;  %v6518_v58 = vld [vmem:[%s6468_s20 + $0x38] sm:$0xff] (!%p584_p7)  ;;  %v6521_v59 = vld [vmem:[%s6468_s20 + $0x40] sm:$0xff] (!%p584_p7) }
  0x32   : > { %5568 = vmatpush3.bf16.msra.mxu0 %v5565_v41  ;;  %v6528_v60 = vld [vmem:[%s6468_s20 + $0x48] sm:$0xff]  ;;  %v6531_v61 = vld [vmem:[%s6468_s20 + $0x50] sm:$0xff]  ;;  %v6538_v62 = vld [vmem:[%s6468_s20 + $0x58] sm:$0xff]  ;;  %s7877_s13 = smov (!%p634_p8, %s4601_s13), 1 }
  0x33   : > { %5570 = vmatprep.subr.bf16.mxu0 %v5569_v45  ;;  %v6541_v63 = vld [vmem:[%s6468_s20 + $0x60] sm:$0xff]  ;;  %v6548_v0 = vld [vmem:[%s6468_s20 + $0x68] sm:$0xff]  ;;  %v6551_v1 = vld [vmem:[%s6468_s20 + $0x70] sm:$0xff]  ;;  %s4607_s23 = sshll.u32 %s7877_s13, 3 }
  0x34   : > { %v6558_v2 = vld [vmem:[%s6468_s20 + $0x78] sm:$0xff]  ;;  %v6561_v3 = vld [vmem:[%s6468_s20 + $0x80] sm:$0xff]  ;;  %v6568_v4 = vld [vmem:[%s6468_s20 + $0x88] sm:$0xff]  ;;  %s637_s27 = scalar_lea.vmem %s7866_s14, %s4607_s23 }
  0x35   : > { %5103 = vmatmul.mubr.msk.f32.vlgmr.msra.gmra.mrb[0].mxu0 %vm678_vm0, %v6479_v48  ;;  %v6571_v5 = vld [vmem:[%s6468_s20 + $0x90] sm:$0xff]  ;;  %v6578_v6 = vld [vmem:[%s6468_s20 + $0x98] sm:$0xff]  ;;  %v6581_v7 = vld [vmem:[%s6468_s20 + $0xa0] sm:$0xff] }
  0x36   : > { %5572 = vmatpush3.bf16.msra.mxu0 %v5569_v45  ;;  %5105 = vmatprep.mubr.msk.f32.mxu0 %vm678_vm0, %v6482_v49  ;;  %v6588_v8 = vld [vmem:[%s6468_s20 + $0xa8] sm:$0xff]  ;;  %v6591_v9 = vld [vmem:[%s6468_s20 + $0xb0] sm:$0xff]  ;;  %v6598_v10 = vld [vmem:[%s6468_s20 + $0xb8] sm:$0xff] }
  0x37   : > { %5574 = vmatprep.subr.bf16.mxu0 %v5573_v50  ;;  %v6601_v11 = vld [vmem:[%s6468_s20 + $0xc0] sm:$0xff]  ;;  %v6608_v12 = vld [vmem:[%s6468_s20 + $0xc8] sm:$0xff]  ;;  %v6611_v13 = vld [vmem:[%s6468_s20 + $0xd0] sm:$0xff] }
  0x38   : > { %v6618_v14 = vld [vmem:[%s6468_s20 + $0xd8] sm:$0xff]  ;;  %v6621_v15 = vld [vmem:[%s6468_s20 + $0xe0] sm:$0xff]  ;;  %v6628_v16 = vld [vmem:[%s6468_s20 + $0xe8] sm:$0xff] }
  0x39   : > { %5106 = vmatmul.mubr.msk.f32.gmra.mrb[2].mxu0 %vm678_vm0, %v6495_v53  ;;  %v6631_v17 = vld [vmem:[%s6468_s20 + $0xf0] sm:$0xff]  ;;  %v6638_v18 = vld [vmem:[%s6468_s20 + $0xf8] sm:$0xff]  ;;  %v6718_v25 = vld [vmem:[%s6468_s20 + $0x100] sm:$0xff] }
  0x3a   : > { %5108 = vmatprep.mubr.msk.f32.mxu0 %vm678_vm0, %v6498_v54  ;;  %5576 = vmatpush3.bf16.msra.mxu0 %v5573_v50  ;;  %v4716_v27 = vld [vmem:[%s7853_s1 + $0x78] sm:$0xff]  ;;  %v1890_v28 = vld [vmem:[%s7855_s3 + $0x8] sm:$0xff]  ;;  %v1889_v30 = vld [vmem:[%s7855_s3] sm:$0xff] }
  0x3b   : > { %5578 = vmatprep.subr.bf16.mxu0 %v6500_v55  ;;  %v1892_v29 = vld [vmem:[%s7855_s3 + $0x18] sm:$0xff]  ;;  %v1891_v32 = vld [vmem:[%s7855_s3 + $0x10] sm:$0xff]  ;;  %v1894_v33 = vld [vmem:[%s7855_s3 + $0x28] sm:$0xff]  ;;  %v5589_v35 = vpack.c.bf16 %v4716_v27, %v4715_v26 }
  0x3c   : > { %v5593_v31 = vpack.c.bf16 %v1892_v29, %v1890_v28  ;;  %v1896_v34 = vld [vmem:[%s7855_s3 + $0x38] sm:$0xff]  ;;  %v5595_v36 = vpack.c.bf16 %v1891_v32, %v1889_v30  ;;  %v1893_v38 = vld [vmem:[%s7855_s3 + $0x20] sm:$0xff]  ;;  %v1895_v39 = vld [vmem:[%s7855_s3 + $0x30] sm:$0xff] }
  0x3d   : > { %5109 = vmatmul.mubr.msk.f32.gmra.mrb[4].mxu0 %vm678_vm0, %v6507_v56  ;;  %v5597_v37 = vpack.c.bf16 %v1896_v34, %v1894_v33  ;;  %v1898_v40 = vld [vmem:[%s7855_s3 + $0x48] sm:$0xff]  ;;  %v1900_v41 = vld [vmem:[%s7855_s3 + $0x58] sm:$0xff]  ;;  %v5599_v42 = vpack.c.bf16 %v1895_v39, %v1893_v38  ;;  %v1897_v43 = vld [vmem:[%s7855_s3 + $0x40] sm:$0xff] }
  0x3e   : > { %5111 = vmatprep.mubr.msk.f32.mxu0 %vm678_vm0, %v6510_v57  ;;  %5594 = vmatprep.subr.bf16.mxu1 %v5593_v31  ;;  %v1899_v44 = vld [vmem:[%s7855_s3 + $0x50] sm:$0xff]  ;;  %v5601_v45 = vpack.c.bf16 %v1900_v41, %v1898_v40  ;;  %v1902_v46 = vld [vmem:[%s7855_s3 + $0x68] sm:$0xff]  ;;  %v1904_v47 = vld [vmem:[%s7855_s3 + $0x78] sm:$0xff] }
  0x3f   : > { %5596 = vmatpush1.bf16.msra.mxu1 %v5595_v36  ;;  %v1901_v50 = vld [vmem:[%s7855_s3 + $0x60] sm:$0xff]  ;;  %v1903_v51 = vld [vmem:[%s7855_s3 + $0x70] sm:$0xff]  ;;  %v1906_v52 = vld [vmem:[%s7855_s3 + $0x88] sm:$0xff] }
  0x40   : > { %5598 = vmatprep.subr.bf16.mxu1 %v5597_v37  ;;  %v5607_v19 = vpack.c.bf16 %v1903_v51, %v1901_v50  ;;  %v1907_v22 = vld [vmem:[%s7855_s3 + $0x90] sm:$0xff]  ;;  %v2062_v34 = vld [vmem:[%s7857_s5] sm:$0xff]  ;;  %v2067_v38 = vld [vmem:[%s7857_s5 + $0x28] sm:$0xff] }
  0x41   : > { %5112 = vmatmul.mubr.msk.f32.gmra.mrb[6].mxu0 %vm678_vm0, %v6518_v58  ;;  %v2069_v39 = vld [vmem:[%s7857_s5 + $0x38] sm:$0xff]  ;;  %vm7442_vm5 = vmpackc.low %vm2097_vm4, %vm2097_vm4 }
  0x42   : > { %5114 = vmatprep.mubr.msk.f32.mxu0 %vm678_vm0, %v6521_v59 }
  0x43   : > { %5600 = vmatpush1.bf16.msra.mxu1 %v5599_v42 }
  0x44   : > { %5602 = vmatprep.subr.bf16.mxu1 %v5601_v45 }
  0x45   : > { %5115 = vmatmul.mubr.msk.f32.gmra.mrb[8].mxu0 %vm678_vm0, %v6528_v60 }
  0x46   : > { %5117 = vmatprep.mubr.msk.f32.mxu0 %vm678_vm0, %v6531_v61 }
  0x49   : > { %5118 = vmatmul.mubr.msk.f32.gmra.mrb[10].mxu0 %vm678_vm0, %v6538_v62 }
  0x4a   : > { %5120 = vmatprep.mubr.msk.f32.mxu0 %vm678_vm0, %v6541_v63 }
  0x4d   : > { %5121 = vmatmul.mubr.msk.f32.gmra.mrb[12].mxu0 %vm678_vm0, %v6548_v0 }
  0x4e   : > { %5123 = vmatprep.mubr.msk.f32.mxu0 %vm678_vm0, %v6551_v1 }
  0x51   : > { %5124 = vmatmul.mubr.msk.f32.gmra.mrb[14].mxu0 %vm678_vm0, %v6558_v2 }
  0x52   : > { %5126 = vmatprep.mubr.msk.f32.mxu0 %vm678_vm0, %v6561_v3 }
  0x55   : > { %5127 = vmatmul.mubr.msk.f32.gmra.mrb[16].mxu0 %vm678_vm0, %v6568_v4 }
  0x56   : > { %5129 = vmatprep.mubr.msk.f32.mxu0 %vm678_vm0, %v6571_v5 }
  0x59   : > { %5130 = vmatmul.mubr.msk.f32.gmra.mrb[18].mxu0 %vm678_vm0, %v6578_v6 }
  0x5a   : > { %5132 = vmatprep.mubr.msk.f32.mxu0 %vm678_vm0, %v6581_v7 }
  0x5d   : > { %5133 = vmatmul.mubr.msk.f32.gmra.mrb[20].mxu0 %vm678_vm0, %v6588_v8 }
  0x5e   : > { %5135 = vmatprep.mubr.msk.f32.mxu0 %vm678_vm0, %v6591_v9 }
  0x61   : > { %5136 = vmatmul.mubr.msk.f32.gmra.mrb[22].mxu0 %vm678_vm0, %v6598_v10 }
  0x62   : > { %5138 = vmatprep.mubr.msk.f32.mxu0 %vm678_vm0, %v6601_v11 }
  0x65   : > { %5139 = vmatmul.mubr.msk.f32.gmra.mrb[24].mxu0 %vm678_vm0, %v6608_v12 }
  0x66   : > { %5141 = vmatprep.mubr.msk.f32.mxu0 %vm678_vm0, %v6611_v13 }
  0x69   : > { %5142 = vmatmul.mubr.msk.f32.gmra.mrb[26].mxu0 %vm678_vm0, %v6618_v14 }
  0x6a   : > { %5144 = vmatprep.mubr.msk.f32.mxu0 %vm678_vm0, %v6621_v15 }
  0x6d   : > { %5145 = vmatmul.mubr.msk.f32.gmra.mrb[28].mxu0 %vm678_vm0, %v6628_v16 }
  0x6e   : > { %5147 = vmatprep.mubr.msk.f32.mxu0 %vm678_vm0, %v6631_v17 }
  0x71   : > { %5148 = vmatmul.mubr.msk.f32.gmra.mrb[30].mxu0 %vm678_vm0, %v6638_v18 }
  0x72   : > { %5158 = vmatprep.mubr.msk.f32.mxu0 %vm678_vm0, %v6479_v48  ;;  %v5603_v48 = vpack.c.bf16 %v1899_v44, %v1897_v43 }
  0x74   : > { %5604 = vmatpush1.bf16.msra.mxu1 %v5603_v48  ;;  %v2066_v48 = vld [vmem:[%s7857_s5 + $0x20] sm:$0xff] }
  0x75   : > { %5159 = vmatmul.mubr.msk.f32.vlgmr.msra.gmra.mrb[0].mxu0 %vm678_vm0, %v6482_v49 }
  0x76   : > { %5580 = vmatpush3.bf16.msra.mxu0 %v6500_v55  ;;  %5161 = vmatprep.mubr.msk.f32.mxu0 %vm678_vm0, %v6495_v53  ;;  %v1908_v55 = vld [vmem:[%s7855_s3 + $0x98] sm:$0xff] }
  0x77   : > { %5582 = vmatprep.subr.bf16.mxu0 %v5581_v21  ;;  %v5609_v20 = vpack.c.bf16 %v1908_v55, %v1906_v52  ;;  %v2071_v52 = vld [vmem:[%s7857_s5 + $0x48] sm:$0xff]  ;;  %v2073_v55 = vld [vmem:[%s7857_s5 + $0x58] sm:$0xff] }
  0x79   : > { %5162 = vmatmul.mubr.msk.f32.gmra.mrb[2].mxu0 %vm678_vm0, %v6498_v54 }
  0x7a   : > { %5164 = vmatprep.mubr.msk.f32.mxu0 %vm678_vm0, %v6507_v56  ;;  %5584 = vmatpush3.bf16.msra.mxu0 %v5581_v21  ;;  %v1905_v21 = vld [vmem:[%s7855_s3 + $0x80] sm:$0xff] }
  0x7b   : > { %5586 = vmatprep.subr.bf16.mxu0 %v5585_v24  ;;  %v5611_v23 = vpack.c.bf16 %v1907_v22, %v1905_v21 }
  0x7d   : > { %5165 = vmatmul.mubr.msk.f32.gmra.mrb[4].mxu0 %vm678_vm0, %v6510_v57 }
  0x7e   : > { %5167 = vmatprep.mubr.msk.f32.mxu0 %vm678_vm0, %v6518_v58 }
  0x81   : > { %5168 = vmatmul.mubr.msk.f32.gmra.mrb[6].mxu0 %vm678_vm0, %v6521_v59 }
  0x82   : > { %5170 = vmatprep.mubr.msk.f32.mxu0 %vm678_vm0, %v6528_v60 }
  0x85   : > { %5171 = vmatmul.mubr.msk.f32.gmra.mrb[8].mxu0 %vm678_vm0, %v6531_v61 }
  0x86   : > { %5173 = vmatprep.mubr.msk.f32.mxu0 %vm678_vm0, %v6538_v62 }
  0x89   : > { %5174 = vmatmul.mubr.msk.f32.gmra.mrb[10].mxu0 %vm678_vm0, %v6541_v63 }
  0x8a   : > { %5176 = vmatprep.mubr.msk.f32.mxu0 %vm678_vm0, %v6548_v0 }
  0x8d   : > { %5177 = vmatmul.mubr.msk.f32.gmra.mrb[12].mxu0 %vm678_vm0, %v6551_v1 }
  0x8e   : > { %5179 = vmatprep.mubr.msk.f32.mxu0 %vm678_vm0, %v6558_v2 }
  0x91   : > { %5180 = vmatmul.mubr.msk.f32.gmra.mrb[14].mxu0 %vm678_vm0, %v6561_v3 }
  0x92   : > { %5182 = vmatprep.mubr.msk.f32.mxu0 %vm678_vm0, %v6568_v4 }
  0x95   : > { %5183 = vmatmul.mubr.msk.f32.gmra.mrb[16].mxu0 %vm678_vm0, %v6571_v5 }
  0x96   : > { %5185 = vmatprep.mubr.msk.f32.mxu0 %vm678_vm0, %v6578_v6 }
  0x99   : > { %5186 = vmatmul.mubr.msk.f32.gmra.mrb[18].mxu0 %vm678_vm0, %v6581_v7 }
  0x9a   : > { %5188 = vmatprep.mubr.msk.f32.mxu0 %vm678_vm0, %v6588_v8 }
  0x9d   : > { %5189 = vmatmul.mubr.msk.f32.gmra.mrb[20].mxu0 %vm678_vm0, %v6591_v9 }
  0x9e   : > { %5191 = vmatprep.mubr.msk.f32.mxu0 %vm678_vm0, %v6598_v10 }
  0xa1   : > { %5192 = vmatmul.mubr.msk.f32.gmra.mrb[22].mxu0 %vm678_vm0, %v6601_v11 }
  0xa2   : > { %5194 = vmatprep.mubr.msk.f32.mxu0 %vm678_vm0, %v6608_v12 }
  0xa5   : > { %5195 = vmatmul.mubr.msk.f32.gmra.mrb[24].mxu0 %vm678_vm0, %v6611_v13 }
  0xa6   : > { %5197 = vmatprep.mubr.msk.f32.mxu0 %vm678_vm0, %v6618_v14 }
  0xa9   : > { %5198 = vmatmul.mubr.msk.f32.gmra.mrb[26].mxu0 %vm678_vm0, %v6621_v15 }
  0xaa   : > { %5200 = vmatprep.mubr.msk.f32.mxu0 %vm678_vm0, %v6628_v16 }
  0xad   : > { %5201 = vmatmul.mubr.msk.f32.gmra.mrb[28].mxu0 %vm678_vm0, %v6631_v17 }
  0xae   : > { %5203 = vmatprep.mubr.msk.f32.mxu0 %vm678_vm0, %v6638_v18 }
  0xb1   : > { %5204 = vmatmul.mubr.msk.f32.gmra.mrb[30].mxu0 %vm678_vm0, %v6718_v25 }
  0xb2   : > { %5214 = vmatprep.mubr.msk.f32.mxu0 %vm678_vm0, %v6482_v49  ;;  %v5605_v49 = vpack.c.bf16 %v1904_v47, %v1902_v46  ;;  %v6986_v47 = vpack.c.bf16 %v2069_v39, %v2067_v38 }
  0xb4   : > { %5606 = vmatprep.subr.bf16.mxu1 %v5605_v49  ;;  %v2068_v49 = vld [vmem:[%s7857_s5 + $0x30] sm:$0xff] }
  0xb5   : > { %5215 = vmatmul.mubr.msk.f32.vlgmr.msra.gmra.mrb[0].mxu0 %vm678_vm0, %v6495_v53  ;;  %5608 = vmatpush1.bf16.msra.mxu1 %v5607_v19  ;;  %v7004_v22 = vpack.c.bf16 %v2068_v49, %v2066_v48 }
  0xb6   : > { %5588 = vmatpush3.bf16.msra.mxu0 %v5585_v24  ;;  %5217 = vmatprep.mubr.msk.f32.mxu0 %vm678_vm0, %v6498_v54  ;;  %v671_v24 = vld [vmem:[%s6468_s20 + $0x108] sm:$0xff] }
  0xb7   : > { %5590 = vmatprep.subr.bf16.mxu0 %v5589_v35  ;;  %5610 = vmatprep.subr.bf16.mxu1 %v5609_v20 }
  0xb9   : > { %5218 = vmatmul.mubr.msk.f32.gmra.mrb[2].mxu0 %vm678_vm0, %v6507_v56  ;;  %5612 = vmatpush1.bf16.msra.mxu1 %v5611_v23 }
  0xba   : > { %5220 = vmatprep.mubr.msk.f32.mxu0 %vm678_vm0, %v6510_v57  ;;  %5592 = vmatpush3.bf16.msra.mxu0 %v5589_v35  ;;  %v2064_v35 = vld [vmem:[%s7857_s5 + $0x10] sm:$0xff] }
  0xbb   : > { %v6984_v43 = vpack.c.bf16 %v2064_v35, %v2062_v34 }
  0xbd   : > { %5221 = vmatmul.mubr.msk.f32.gmra.mrb[4].mxu0 %vm678_vm0, %v6518_v58 }
  0xbe   : > { %5223 = vmatprep.mubr.msk.f32.mxu0 %vm678_vm0, %v6521_v59 }
  0xc1   : > { %5224 = vmatmul.mubr.msk.f32.gmra.mrb[6].mxu0 %vm678_vm0, %v6528_v60 }
  0xc2   : > { %5226 = vmatprep.mubr.msk.f32.mxu0 %vm678_vm0, %v6531_v61 }
  0xc5   : > { %5227 = vmatmul.mubr.msk.f32.gmra.mrb[8].mxu0 %vm678_vm0, %v6538_v62 }
  0xc6   : > { %5229 = vmatprep.mubr.msk.f32.mxu0 %vm678_vm0, %v6541_v63 }
  0xc9   : > { %5230 = vmatmul.mubr.msk.f32.gmra.mrb[10].mxu0 %vm678_vm0, %v6548_v0 }
  0xca   : > { %5232 = vmatprep.mubr.msk.f32.mxu0 %vm678_vm0, %v6551_v1 }
  0xcd   : > { %5233 = vmatmul.mubr.msk.f32.gmra.mrb[12].mxu0 %vm678_vm0, %v6558_v2 }
  0xce   : > { %5235 = vmatprep.mubr.msk.f32.mxu0 %vm678_vm0, %v6561_v3 }
  0xd1   : > { %5236 = vmatmul.mubr.msk.f32.gmra.mrb[14].mxu0 %vm678_vm0, %v6568_v4 }
  0xd2   : > { %5238 = vmatprep.mubr.msk.f32.mxu0 %vm678_vm0, %v6571_v5 }
  0xd5   : > { %5239 = vmatmul.mubr.msk.f32.gmra.mrb[16].mxu0 %vm678_vm0, %v6578_v6 }
  0xd6   : > { %5241 = vmatprep.mubr.msk.f32.mxu0 %vm678_vm0, %v6581_v7 }
  0xd9   : > { %5242 = vmatmul.mubr.msk.f32.gmra.mrb[18].mxu0 %vm678_vm0, %v6588_v8 }
  0xda   : > { %5244 = vmatprep.mubr.msk.f32.mxu0 %vm678_vm0, %v6591_v9 }
  0xdd   : > { %5245 = vmatmul.mubr.msk.f32.gmra.mrb[20].mxu0 %vm678_vm0, %v6598_v10 }
  0xde   : > { %5247 = vmatprep.mubr.msk.f32.mxu0 %vm678_vm0, %v6601_v11 }
  0xe1   : > { %5248 = vmatmul.mubr.msk.f32.gmra.mrb[22].mxu0 %vm678_vm0, %v6608_v12 }
  0xe2   : > { %5250 = vmatprep.mubr.msk.f32.mxu0 %vm678_vm0, %v6611_v13 }
  0xe5   : > { %5251 = vmatmul.mubr.msk.f32.gmra.mrb[24].mxu0 %vm678_vm0, %v6618_v14 }
  0xe6   : > { %5253 = vmatprep.mubr.msk.f32.mxu0 %vm678_vm0, %v6621_v15 }
  0xe9   : > { %5254 = vmatmul.mubr.msk.f32.gmra.mrb[26].mxu0 %vm678_vm0, %v6628_v16 }
  0xea   : > { %5256 = vmatprep.mubr.msk.f32.mxu0 %vm678_vm0, %v6631_v17 }
  0xed   : > { %5257 = vmatmul.mubr.msk.f32.gmra.mrb[28].mxu0 %vm678_vm0, %v6638_v18 }
  0xee   : > { %5259 = vmatprep.mubr.msk.f32.mxu0 %vm678_vm0, %v6718_v25 }
  0xf1   : > { %5260 = vmatmul.mubr.msk.f32.gmra.mrb[30].mxu0 %vm678_vm0, %v671_v24 }
  0xf2   : > { %5270 = vmatprep.mubr.msk.f32.mxu0 %vm678_vm0, %v6495_v53  ;;  %v672_v53 = vld [vmem:[%s6468_s20 + $0x110] sm:$0xff] }
  0xf5   : > { %5271 = vmatmul.mubr.msk.f32.vlgmr.msra.gmra.mrb[0].mxu0 %vm678_vm0, %v6498_v54  ;;  %v1910_v54 = vld [vmem:[%s7855_s3 + $0xa8] sm:$0xff] }
  0xf6   : > { %5273 = vmatprep.mubr.msk.f32.mxu0 %vm678_vm0, %v6507_v56  ;;  %v1912_v56 = vld [vmem:[%s7855_s3 + $0xb8] sm:$0xff] }
  0xf9   : > { %5274 = vmatmul.mubr.msk.f32.gmra.mrb[2].mxu0 %vm678_vm0, %v6510_v57  ;;  %v5613_v57 = vpack.c.bf16 %v1912_v56, %v1910_v54  ;;  %v2070_v54 = vld [vmem:[%s7857_s5 + $0x40] sm:$0xff]  ;;  %v2072_v56 = vld [vmem:[%s7857_s5 + $0x50] sm:$0xff] }
  0xfa   : > { %5276 = vmatprep.mubr.msk.f32.mxu0 %vm678_vm0, %v6518_v58  ;;  %v1909_v58 = vld [vmem:[%s7855_s3 + $0xa0] sm:$0xff] }
  0xfb   : > { %5614 = vmatprep.subr.bf16.mxu1 %v5613_v57 }
  0xfd   : > { %5277 = vmatmul.mubr.msk.f32.gmra.mrb[4].mxu0 %vm678_vm0, %v6521_v59  ;;  %v1911_v59 = vld [vmem:[%s7855_s3 + $0xb0] sm:$0xff] }
  0xfe   : > { %5279 = vmatprep.mubr.msk.f32.mxu0 %vm678_vm0, %v6528_v60  ;;  %v5615_v60 = vpack.c.bf16 %v1911_v59, %v1909_v58  ;;  %v2075_v59 = vld [vmem:[%s7857_s5 + $0x68] sm:$0xff] }
 0x100   : > { %5616 = vmatpush1.bf16.msra.mxu1 %v5615_v60  ;;  %v2077_v60 = vld [vmem:[%s7857_s5 + $0x78] sm:$0xff] }
 0x101   : > { %5280 = vmatmul.mubr.msk.f32.gmra.mrb[6].mxu0 %vm678_vm0, %v6531_v61  ;;  %v1914_v61 = vld [vmem:[%s7855_s3 + $0xc8] sm:$0xff] }
 0x102   : > { %5282 = vmatprep.mubr.msk.f32.mxu0 %vm678_vm0, %v6538_v62  ;;  %v1916_v62 = vld [vmem:[%s7855_s3 + $0xd8] sm:$0xff] }
 0x105   : > { %5283 = vmatmul.mubr.msk.f32.gmra.mrb[8].mxu0 %vm678_vm0, %v6541_v63  ;;  %v5617_v63 = vpack.c.bf16 %v1916_v62, %v1914_v61 }
 0x106   : > { %5285 = vmatprep.mubr.msk.f32.mxu0 %vm678_vm0, %v6548_v0  ;;  %v1913_v0 = vld [vmem:[%s7855_s3 + $0xc0] sm:$0xff] }
 0x107   : > { %5618 = vmatprep.subr.bf16.mxu1 %v5617_v63 }
 0x109   : > { %5286 = vmatmul.mubr.msk.f32.gmra.mrb[10].mxu0 %vm678_vm0, %v6551_v1  ;;  %v1915_v1 = vld [vmem:[%s7855_s3 + $0xd0] sm:$0xff] }
 0x10a   : > { %5288 = vmatprep.mubr.msk.f32.mxu0 %vm678_vm0, %v6558_v2  ;;  %v5619_v2 = vpack.c.bf16 %v1915_v1, %v1913_v0  ;;  %v7024_v0 = vpack.c.bf16 %v2072_v56, %v2070_v54 }
 0x10c   : > { %5620 = vmatpush1.bf16.msra.mxu1 %v5619_v2 }
 0x10d   : > { %5289 = vmatmul.mubr.msk.f32.gmra.mrb[12].mxu0 %vm678_vm0, %v6561_v3  ;;  %v1918_v3 = vld [vmem:[%s7855_s3 + $0xe8] sm:$0xff] }
 0x10e   : > { %5291 = vmatprep.mubr.msk.f32.mxu0 %vm678_vm0, %v6568_v4  ;;  %v1920_v4 = vld [vmem:[%s7855_s3 + $0xf8] sm:$0xff] }
 0x111   : > { %5292 = vmatmul.mubr.msk.f32.gmra.mrb[14].mxu0 %vm678_vm0, %v6571_v5  ;;  %v5621_v5 = vpack.c.bf16 %v1920_v4, %v1918_v3  ;;  %v7027_v4 = vpack.c.bf16 %v2077_v60, %v2075_v59 }
 0x112   : > { %5294 = vmatprep.mubr.msk.f32.mxu0 %vm678_vm0, %v6578_v6  ;;  %v1917_v6 = vld [vmem:[%s7855_s3 + $0xe0] sm:$0xff] }
 0x113   : > { %5622 = vmatprep.subr.bf16.mxu1 %v5621_v5  ;;  %v2074_v5 = vld [vmem:[%s7857_s5 + $0x60] sm:$0xff] }
 0x115   : > { %5295 = vmatmul.mubr.msk.f32.gmra.mrb[16].mxu0 %vm678_vm0, %v6581_v7  ;;  %v1919_v7 = vld [vmem:[%s7855_s3 + $0xf0] sm:$0xff] }
 0x116   : > { %5297 = vmatprep.mubr.msk.f32.mxu0 %vm678_vm0, %v6588_v8  ;;  %v5623_v8 = vpack.c.bf16 %v1919_v7, %v1917_v6  ;;  %v2076_v6 = vld [vmem:[%s7857_s5 + $0x70] sm:$0xff] }
 0x118   : > { %5624 = vmatpush1.bf16.msra.mxu1 %v5623_v8 }
 0x119   : > { %5298 = vmatmul.mubr.msk.f32.gmra.mrb[18].mxu0 %vm678_vm0, %v6591_v9  ;;  %v6256_v9 = vmov 0.0  }
 0x11a   : > { %5300 = vmatprep.mubr.msk.f32.mxu0 %vm678_vm0, %v6598_v10  ;;  %1997 = vmatprep.mubr.f32.mxu1 %v6256_v9  ;;  %v2063_v10 = vld [vmem:[%s7857_s5 + $0x8] sm:$0xff] }
 0x11d   : > { %5301 = vmatmul.mubr.msk.f32.gmra.mrb[20].mxu0 %vm678_vm0, %v6601_v11  ;;  %v2065_v11 = vld [vmem:[%s7857_s5 + $0x18] sm:$0xff] }
 0x11e   : > { %5303 = vmatprep.mubr.msk.f32.mxu0 %vm678_vm0, %v6608_v12  ;;  %v6958_v12 = vpack.c.bf16 %v2065_v11, %v2063_v10 }
 0x120   : > { %5626 = vmatprep.subr.bf16.mxu1 %v6958_v12 }
 0x121   : > { %5304 = vmatmul.mubr.msk.f32.gmra.mrb[22].mxu0 %vm678_vm0, %v6611_v13  ;;  %v6964_v13 = vld [vmem:[%s7854_s2] ss:$0 sm:$0xff] }
 0x122   : > { %5306 = vmatprep.mubr.msk.f32.mxu0 %vm678_vm0, %v6618_v14 }
 0x125   : > { %5307 = vmatmul.mubr.msk.f32.gmra.mrb[24].mxu0 %vm678_vm0, %v6621_v15 }
 0x126   : > { %5309 = vmatprep.mubr.msk.f32.mxu0 %vm678_vm0, %v6628_v16 }
 0x129   : > { %5310 = vmatmul.mubr.msk.f32.gmra.mrb[26].mxu0 %vm678_vm0, %v6631_v17 }
 0x12a   : > { %5312 = vmatprep.mubr.msk.f32.mxu0 %vm678_vm0, %v6638_v18 }
 0x12d   : > { %5313 = vmatmul.mubr.msk.f32.gmra.mrb[28].mxu0 %vm678_vm0, %v6718_v25 }
 0x12e   : > { %5315 = vmatprep.mubr.msk.f32.mxu0 %vm678_vm0, %v671_v24 }
 0x131   : > { %5316 = vmatmul.mubr.msk.f32.gmra.mrb[30].mxu0 %vm678_vm0, %v672_v53  ;;  %v7007_v53 = vpack.c.bf16 %v2073_v55, %v2071_v52 }
 0x132   : > { %5418 = vmatprep.mubr.msk.f32.mxu0 %vm6259_vm14, %v6256_v9 }
 0x1c8   : > { %v5272_v14 = vpop.f32.mrb[0].mxu0 }
 0x1c9   : > { %v5925_v15 = vadd.f32 %v5272_v14, %v6964_v13  ;;  %v1642_v16 = vpop.f32.mrb[1].mxu0 }
 0x1ca   : > { %v5926_v17 = vadd.f32 %v6964_v13, %v1642_v16 }
 0x1cb   : > { %v1834_v18 = vmax.f32 %v5925_v15, 0.0  ;;  %v7039_v15 = vpack.c.bf16 %v2076_v6, %v2074_v5 }
 0x1cc   : > { %v1833_v25 = vmax.f32 %v5926_v17, 0.0  ;;  %v5275_v26 = vpop.f32.mrb[2].mxu0 }
 0x1cd   : > { %v5927_v27 = vadd.f32 %v5275_v26, %v6964_v13  ;;  %v1652_v28 = vpop.f32.mrb[3].mxu0 }
 0x1ce   : > { %v1865_v29 = vmax.f32 %v1833_v25, %v1834_v18  ;;  %v5928_v30 = vadd.f32 %v6964_v13, %v1652_v28 }
 0x1cf   : > { %v1836_v31 = vmax.f32 %v5927_v27, 0.0 }
 0x1d0   : > { %v1835_v32 = vmax.f32 %v5928_v30, 0.0  ;;  %v5278_v33 = vpop.f32.mrb[4].mxu0 }
 0x1d1   : > { %v5929_v36 = vadd.f32 %v5278_v33, %v6964_v13  ;;  %v1662_v37 = vpop.f32.mrb[5].mxu0 }
 0x1d2   : > { %v1873_v40 = vmax.f32 %v1835_v32, %v1836_v31  ;;  %v5930_v41 = vadd.f32 %v6964_v13, %v1662_v37 }
 0x1d3   : > { %v1838_v42 = vmax.f32 %v5929_v36, 0.0 }
 0x1d4   : > { %v1837_v44 = vmax.f32 %v5930_v41, 0.0  ;;  %v5281_v45 = vpop.f32.mrb[6].mxu0  ;;  %v1881_v46 = vmax.f32 %v1865_v29, %v1873_v40 }
 0x1d5   : > { %v5931_v50 = vadd.f32 %v5281_v45, %v6964_v13  ;;  %v1672_v51 = vpop.f32.mrb[7].mxu0 }
 0x1d6   : > { %v1866_v19 = vmax.f32 %v1837_v44, %v1838_v42  ;;  %v5932_v20 = vadd.f32 %v6964_v13, %v1672_v51  ;;  %1998 = vmatmul.mubr.f32.vlgmr.msra.gmra.mrb[0].mxu1 %v1881_v46 }
 0x1d7   : > { %v1840_v21 = vmax.f32 %v5931_v50, 0.0  ;;  %2003 = vmatprep.mubr.f32.mxu1 %v6256_v9  ;;  %5628 = vmatpush1.bf16.msra.mxu1 %v6984_v43 }
 0x1d8   : > { %v1839_v23 = vmax.f32 %v5932_v20, 0.0  ;;  %v5284_v24 = vpop.f32.mrb[8].mxu0  ;;  %5630 = vmatprep.subr.bf16.mxu1 %v6986_v47 }
 0x1d9   : > { %v5933_v57 = vadd.f32 %v5284_v24, %v6964_v13  ;;  %v1682_v58 = vpop.f32.mrb[9].mxu0 }
 0x1da   : > { %v1874_v61 = vmax.f32 %v1839_v23, %v1840_v21  ;;  %v5934_v62 = vadd.f32 %v6964_v13, %v1682_v58 }
 0x1db   : > { %v1842_v63 = vmax.f32 %v5933_v57, 0.0  ;;  %5632 = vmatpush1.bf16.msra.mxu1 %v7004_v22 }
 0x1dc   : > { %v1841_v1 = vmax.f32 %v5934_v62, 0.0  ;;  %v5287_v2 = vpop.f32.mrb[10].mxu0  ;;  %v1882_v3 = vmax.f32 %v1866_v19, %v1874_v61  ;;  %5634 = vmatprep.subr.bf16.mxu1 %v7007_v53 }
 0x1dd   : > { %v5935_v7 = vadd.f32 %v5287_v2, %v6964_v13  ;;  %v1692_v8 = vpop.f32.mrb[11].mxu0 }
 0x1de   : > { %v1867_v10 = vmax.f32 %v1841_v1, %v1842_v63  ;;  %v5936_v11 = vadd.f32 %v6964_v13, %v1692_v8  ;;  %2004 = vmatmul.mubr.f32.gmra.mrb[2].mxu1 %v1882_v3 }
 0x1df   : > { %v1844_v14 = vmax.f32 %v5935_v7, 0.0  ;;  %2009 = vmatprep.mubr.f32.mxu1 %v6256_v9  ;;  %5636 = vmatpush1.bf16.msra.mxu1 %v7024_v0 }
 0x1e0   : > { %v1843_v16 = vmax.f32 %v5936_v11, 0.0  ;;  %v5290_v17 = vpop.f32.mrb[12].mxu0  ;;  %5638 = vmatprep.subr.bf16.mxu1 %v7027_v4 }
 0x1e1   : > { %v5937_v18 = vadd.f32 %v5290_v17, %v6964_v13  ;;  %v1702_v25 = vpop.f32.mrb[13].mxu0 }
 0x1e2   : > { %v1875_v26 = vmax.f32 %v1843_v16, %v1844_v14  ;;  %v5938_v27 = vadd.f32 %v6964_v13, %v1702_v25 }
 0x1e3   : > { %v1846_v28 = vmax.f32 %v5937_v18, 0.0  ;;  %5640 = vmatpush1.bf16.msra.mxu1 %v7039_v15 }
 0x1e4   : > { %v1845_v29 = vmax.f32 %v5938_v27, 0.0  ;;  %v5293_v30 = vpop.f32.mrb[14].mxu0  ;;  %v1883_v31 = vmax.f32 %v1867_v10, %v1875_v26  ;;  %5642 = vmatprep.subr.bf16.mxu1 %v6958_v12 }
 0x1e5   : > { %v5939_v32 = vadd.f32 %v5293_v30, %v6964_v13  ;;  %v1712_v33 = vpop.f32.mrb[15].mxu0 }
 0x1e6   : > { %v1868_v34 = vmax.f32 %v1845_v29, %v1846_v28  ;;  %v5940_v35 = vadd.f32 %v6964_v13, %v1712_v33  ;;  %2010 = vmatmul.mubr.f32.gmra.mrb[4].mxu1 %v1883_v31 }
 0x1e7   : > { %v1848_v36 = vmax.f32 %v5939_v32, 0.0  ;;  %2015 = vmatprep.mubr.f32.mxu1 %v6256_v9 }
 0x1e8   : > { %v1847_v37 = vmax.f32 %v5940_v35, 0.0  ;;  %v5296_v38 = vpop.f32.mrb[16].mxu0 }
 0x1e9   : > { %v5941_v39 = vadd.f32 %v5296_v38, %v6964_v13  ;;  %v1722_v40 = vpop.f32.mrb[17].mxu0 }
 0x1ea   : > { %v1876_v41 = vmax.f32 %v1847_v37, %v1848_v36  ;;  %v5942_v42 = vadd.f32 %v6964_v13, %v1722_v40 }
 0x1eb   : > { %v1850_v44 = vmax.f32 %v5941_v39, 0.0 }
 0x1ec   : > { %v1849_v45 = vmax.f32 %v5942_v42, 0.0  ;;  %v5299_v46 = vpop.f32.mrb[18].mxu0  ;;  %v1884_v48 = vmax.f32 %v1868_v34, %v1876_v41 }
 0x1ed   : > { %v5943_v49 = vadd.f32 %v5299_v46, %v6964_v13  ;;  %v1732_v50 = vpop.f32.mrb[19].mxu0 }
 0x1ee   : > { %v1869_v51 = vmax.f32 %v1849_v45, %v1850_v44  ;;  %v5944_v52 = vadd.f32 %v6964_v13, %v1732_v50  ;;  %2016 = vmatmul.mubr.f32.gmra.mrb[6].mxu1 %v1884_v48 }
 0x1ef   : > { %v1852_v55 = vmax.f32 %v5943_v49, 0.0  ;;  %2021 = vmatprep.mubr.f32.mxu1 %v6256_v9 }
 0x1f0   : > { %v1851_v19 = vmax.f32 %v5944_v52, 0.0  ;;  %v5302_v20 = vpop.f32.mrb[20].mxu0  ;;  %v1921_v52 = vld [vmem:[%s7856_s4] sm:$0x3] }
 0x1f1   : > { %v5945_v21 = vadd.f32 %v5302_v20, %v6964_v13  ;;  %v1742_v23 = vpop.f32.mrb[21].mxu0 }
 0x1f2   : > { %v1877_v24 = vmax.f32 %v1851_v19, %v1852_v55  ;;  %v5946_v54 = vadd.f32 %v6964_v13, %v1742_v23 }
 0x1f3   : > { %v1854_v56 = vmax.f32 %v5945_v21, 0.0 }
 0x1f4   : > { %v1853_v57 = vmax.f32 %v5946_v54, 0.0  ;;  %v5305_v58 = vpop.f32.mrb[22].mxu0  ;;  %v1885_v59 = vmax.f32 %v1869_v51, %v1877_v24 }
 0x1f5   : > { %v5947_v60 = vadd.f32 %v5305_v58, %v6964_v13  ;;  %v1752_v61 = vpop.f32.mrb[23].mxu0 }
 0x1f6   : > { %v1870_v62 = vmax.f32 %v1853_v57, %v1854_v56  ;;  %v5948_v63 = vadd.f32 %v6964_v13, %v1752_v61  ;;  %2022 = vmatmul.mubr.f32.gmra.mrb[8].mxu1 %v1885_v59 }
 0x1f7   : > { %v1856_v1 = vmax.f32 %v5947_v60, 0.0  ;;  %2027 = vmatprep.mubr.f32.mxu1 %v6256_v9 }
 0x1f8   : > { %v1855_v2 = vmax.f32 %v5948_v63, 0.0  ;;  %v5308_v3 = vpop.f32.mrb[24].mxu0 }
 0x1f9   : > { %v5949_v5 = vadd.f32 %v5308_v3, %v6964_v13  ;;  %v1762_v6 = vpop.f32.mrb[25].mxu0 }
 0x1fa   : > { %v1878_v7 = vmax.f32 %v1855_v2, %v1856_v1  ;;  %v5950_v8 = vadd.f32 %v6964_v13, %v1762_v6 }
 0x1fb   : > { %v1858_v10 = vmax.f32 %v5949_v5, 0.0 }
 0x1fc   : > { %v1857_v11 = vmax.f32 %v5950_v8, 0.0  ;;  %v5311_v14 = vpop.f32.mrb[26].mxu0  ;;  %v1886_v16 = vmax.f32 %v1870_v62, %v1878_v7 }
 0x1fd   : > { %v5951_v17 = vadd.f32 %v5311_v14, %v6964_v13  ;;  %v1772_v18 = vpop.f32.mrb[27].mxu0 }
 0x1fe   : > { %v1871_v25 = vmax.f32 %v1857_v11, %v1858_v10  ;;  %v5952_v26 = vadd.f32 %v6964_v13, %v1772_v18  ;;  %2028 = vmatmul.mubr.f32.gmra.mrb[10].mxu1 %v1886_v16  ;;  %v3039_v11 = vld [vmem:[%s7858_s6 + $0x8] sm:$0xff] }
 0x1ff   : > { %v1860_v27 = vmax.f32 %v5951_v17, 0.0  ;;  %2033 = vmatprep.mubr.f32.mxu1 %v6256_v9 }
 0x200   : > { %v1859_v28 = vmax.f32 %v5952_v26, 0.0  ;;  %v5314_v29 = vpop.f32.mrb[28].mxu0 }
 0x201   : > { %v5953_v30 = vadd.f32 %v5314_v29, %v6964_v13  ;;  %v1782_v31 = vpop.f32.mrb[29].mxu0 }
 0x202   : > { %v1879_v32 = vmax.f32 %v1859_v28, %v1860_v27  ;;  %v5954_v33 = vadd.f32 %v6964_v13, %v1782_v31 }
 0x203   : > { %v1862_v34 = vmax.f32 %v5953_v30, 0.0 }
 0x204   : > { %v1861_v35 = vmax.f32 %v5954_v33, 0.0  ;;  %v5317_v36 = vpop.f32.mrb[30].mxu0  ;;  %v1887_v37 = vmax.f32 %v1871_v25, %v1879_v32 }
 0x205   : > { %v5955_v38 = vadd.f32 %v5317_v36, %v6964_v13  ;;  %v1792_v39 = vpop.f32.mrb[31].mxu0 }
 0x206   : > { %v1872_v40 = vmax.f32 %v1861_v35, %v1862_v34  ;;  %v5956_v41 = vadd.f32 %v6964_v13, %v1792_v39  ;;  %2034 = vmatmul.mubr.f32.gmra.mrb[12].mxu1 %v1887_v37  ;;  %v1923_v13 = vlaneseq }
 0x207   : > { %v1864_v42 = vmax.f32 %v5955_v38, 0.0  ;;  %2039 = vmatprep.mubr.f32.mxu1 %v6256_v9 }
 0x208   : > { %v1863_v44 = vmax.f32 %v5956_v41, 0.0  ;;  %v7080_v48 = vshrl.u32 %v1923_v13, 7  ;;  %v7099_v60 = vand.u32 127, %v1923_v13 }
 0x20a   : > { %v1880_v45 = vmax.f32 %v1863_v44, %v1864_v42  ;;  %v1925_v51 = vsub.s32 0, %v7080_v48  ;;  %v1929_v55 = vsub.s32 1, %v7080_v48  ;;  %v2080_v1 = vadd.s32 128, %v7099_v60 }
 0x20b   : > { %v2081_v3 = vand.u32 32, %v7099_v60 }
 0x20c   : > { %v1888_v46 = vmax.f32 %v1872_v40, %v1880_v45  ;;  %v1926_v19 = vrot.slane %v1921_v52, %v1925_v51  ;;  %v1930_v20 = vrot.slane %v1921_v52, %v1929_v55  ;;  %v2082_v5 = vand.u32 32, %v2080_v1 }
 0x20d   : > { %vm7107_vm1 = vcmp.eq.s32.totalorder %v2081_v3, 0 }
 0x20e   : > { %2040 = vmatmul.mubr.f32.gmra.mrb[14].mxu1 %v1888_v46  ;;  %vm7113_vm2 = vcmp.eq.s32.totalorder %v2082_v5, 0 }
 0x20f   : > { %2165 = vmatprep.mubr.f32.mxu1 %v6256_v9 }
 0x212   : > { %2166 = vmatmul.mubr.f32.vlgmr.msra.gmra.mrb[16].mxu1 %v6256_v9 }
 0x213   : > { %5644 = vmatpush1.bf16.msra.mxu1 %v6984_v43  ;;  %2287 = vmatprep.mubr.f32.mxu1 %v6256_v9 }
 0x214   : > { %5646 = vmatprep.subr.bf16.mxu1 %v6986_v47 }
 0x217   : > { %5648 = vmatpush1.bf16.msra.mxu1 %v7004_v22 }
 0x218   : > { %5650 = vmatprep.subr.bf16.mxu1 %v7007_v53 }
 0x21b   : > { %5652 = vmatpush1.bf16.msra.mxu1 %v7024_v0 }
 0x21c   : > { %5654 = vmatprep.subr.bf16.mxu1 %v7027_v4 }
 0x21f   : > { %5656 = vmatpush1.bf16.msra.mxu1 %v7039_v15 }
 0x220   : > { %5658 = vmatprep.subr.bf16.mxu1 %v6958_v12 }
 0x2a9   : > { %v1999_v49 = vpop.f32.mrb[0].mxu1 }
 0x2aa   : > { %v2001_v50 = vpop.f32.mrb[1].mxu1  ;;  %v7175_v44 = vadd.f32 %v1999_v49, %v1926_v19 }
 0x2ab   : > { %v7179_v13 = vadd.f32 %v2001_v50, %v1930_v20 }
 0x2b1   : > { %v2005_v21 = vpop.f32.mrb[2].mxu1 }
 0x2b2   : > { %v7091_v23 = vadd.f32 %v2005_v21, %v1926_v19  ;;  %v2007_v24 = vpop.f32.mrb[3].mxu1 }
 0x2b3   : > { %v7093_v54 = vadd.f32 %v2007_v24, %v1930_v20 }
 0x2b9   : > { %v2011_v56 = vpop.f32.mrb[4].mxu1 }
 0x2ba   : > { %v7095_v57 = vadd.f32 %v2011_v56, %v1926_v19  ;;  %v2013_v58 = vpop.f32.mrb[5].mxu1 }
 0x2bb   : > { %v7097_v59 = vadd.f32 %v2013_v58, %v1930_v20 }
 0x2c1   : > { %v2017_v61 = vpop.f32.mrb[6].mxu1 }
 0x2c2   : > { %v7101_v62 = vadd.f32 %v2017_v61, %v1926_v19  ;;  %v2019_v63 = vpop.f32.mrb[7].mxu1 }
 0x2c3   : > { %v7104_v2 = vadd.f32 %v2019_v63, %v1930_v20 }
 0x2c9   : > { %v2023_v6 = vpop.f32.mrb[8].mxu1 }
 0x2ca   : > { %v7111_v8 = vadd.f32 %v2023_v6, %v1926_v19  ;;  %v2025_v10 = vpop.f32.mrb[9].mxu1 }
 0x2cb   : > { %v7117_v14 = vadd.f32 %v2025_v10, %v1930_v20 }
 0x2cc   : > { %v2462_v16 = vsel %vm7107_vm1, %v7101_v62, %v7111_v8  ;;  %v2578_v17 = vsel %vm7107_vm1, %v7111_v8, %v7101_v62 }
 0x2cd   : > { %v2463_v18 = vsel %vm7113_vm2, %v7104_v2, %v7117_v14  ;;  %v2579_v25 = vsel %vm7113_vm2, %v7117_v14, %v7104_v2 }
 0x2d1   : > { %v2029_v26 = vpop.f32.mrb[10].mxu1 }
 0x2d2   : > { %v7135_v27 = vadd.f32 %v2029_v26, %v1926_v19  ;;  %v2031_v28 = vpop.f32.mrb[11].mxu1 }
 0x2d3   : > { %v7137_v29 = vadd.f32 %v2031_v28, %v1930_v20 }
 0x2d4   : > { %v2340_v30 = vsel %vm7107_vm1, %v7095_v57, %v7135_v27  ;;  %v2692_v31 = vsel %vm7107_vm1, %v7135_v27, %v7095_v57 }
 0x2d5   : > { %v2341_v32 = vsel %vm7113_vm2, %v7097_v59, %v7137_v29  ;;  %v2693_v33 = vsel %vm7113_vm2, %v7137_v29, %v7097_v59 }
 0x2d9   : > { %v2035_v34 = vpop.f32.mrb[12].mxu1 }
 0x2da   : > { %v7155_v35 = vadd.f32 %v2035_v34, %v1926_v19  ;;  %v2037_v36 = vpop.f32.mrb[13].mxu1 }
 0x2db   : > { %v7157_v37 = vadd.f32 %v2037_v36, %v1930_v20 }
 0x2dc   : > { %v2218_v38 = vsel %vm7107_vm1, %v7091_v23, %v7155_v35  ;;  %v2806_v39 = vsel %vm7107_vm1, %v7155_v35, %v7091_v23 }
 0x2dd   : > { %v2219_v40 = vsel %vm7113_vm2, %v7093_v54, %v7157_v37  ;;  %v2807_v41 = vsel %vm7113_vm2, %v7157_v37, %v7093_v54 }
 0x2e1   : > { %v2041_v42 = vpop.f32.mrb[14].mxu1 }
 0x2e2   : > { %v7177_v45 = vadd.f32 %v2041_v42, %v1926_v19  ;;  %v2043_v46 = vpop.f32.mrb[15].mxu1 }
 0x2e3   : > { %v7181_v52 = vadd.f32 %v2043_v46, %v1930_v20 }
 0x2e4   : > { %v2095_v21 = vsel %vm7107_vm1, %v7175_v44, %v7177_v45  ;;  %v2920_v24 = vsel %vm7107_vm1, %v7177_v45, %v7175_v44  ;;  %v3041_v45 = vld [vmem:[%s7858_s6 + $0x18] sm:$0xff] }
 0x2e5   : > { %v2167_v56 = vpop.f32.mrb[16].mxu1  ;;  %v2096_v49 = vsel %vm7113_vm2, %v7179_v13, %v7181_v52  ;;  %v2921_v50 = vsel %vm7113_vm2, %v7181_v52, %v7179_v13  ;;  %v3038_v13 = vld [vmem:[%s7858_s6] sm:$0xff]  ;;  %v5753_v52 = vpack.c.bf16 %v3041_v45, %v3039_v11  ;;  %vm4422_vm2 = vcmask 80896  }
 0x2e6   : > { %v2172_v19 = vadd.f32 %v2167_v56, %v2095_v21  ;;  %v2169_v20 = vpop.f32.mrb[17].mxu1 }
 0x2e7   : > { %v2173_v58 = vadd.f32 %v2169_v20, %v2096_v49 }
 0x2e8   : > { %v4749_v63 = vmul.f32 -1.442695, %v2172_v19 }
 0x2e9   : > { %6104 = vtanh.f32 %v2173_v58  ;;  %v4750_v42 = vmul.f32 -1.442695, %v2173_v58 }
 0x2ea   : > { %6106 = vpow2.f32 %v4749_v63 }
 0x2f3   : > { %v6105_v61 = vpop.eup %6104 }
 0x2f4   : > { %2189 = vrot.lane.b32.xlu0 %v6105_v61, %s6257_s26  ;;  %v6107_v1 = vpop.eup %6106 }
 0x2f5   : > { %v2180_v3 = vadd.f32 1.0, %v6107_v1 }
 0x2f7   : > { %6108 = vrcp.f32 %v2180_v3 }
 0x301   : > { %v6109_v5 = vpop.eup %6108 }
 0x302   : > { %v2187_v26 = vmul.f32 0.0, %v6109_v5 }
 0x366   : > { %v2190_v6 = vpop.permute.xlu0 %2189 }
 0x367   : > { %v2192_v10 = vmul.f32 %v6109_v5, %v2190_v6 }
 0x369   : > { %2194 = vrot.lane.b32.xlu0 %v2192_v10, %s6257_s26 }
 0x3db   : > { %v2195_v28 = vpop.permute.xlu0 %2194 }
 0x3dc   : > { %v2197_v34 = vadd.f32 %v2195_v28, %v2187_v26 }
 0x3de   : > { %6110 = vtanh.f32 %v2197_v34 }
 0x3df   : > { %6112 = vpow2.f32 %v4750_v42 }
 0x3e8   : > { %v6111_v36 = vpop.eup %6110 }
 0x3e9   : > { %2200 = vrot.lane.b32.xlu1 %v6111_v36, %s6257_s26  ;;  %v6113_v46 = vpop.eup %6112 }
 0x3ea   : > { %v2181_v21 = vadd.f32 1.0, %v6113_v46 }
 0x3ec   : > { %6114 = vrcp.f32 %v2181_v21 }
 0x3f6   : > { %v6115_v56 = vpop.eup %6114 }
 0x45b   : > { %v2201_v49 = vpop.permute.xlu1 %2200 }
 0x45c   : > { %v2203_v19 = vmul.f32 %v6115_v56, %v2201_v49 }
 0x45e   : > { %2204 = vst.msk [vmem:[#allocation3] sm:$0xff] %vm678_vm0, %v2203_v19  ;;  %4751 = vmatmul.mubr.msk.f32.vlgmr.msra.gmra.mrb[18].mxu1 %vm2097_vm4, %v2203_v19 }
 0x45f   : > { %2207 = vst.msk [vmem:[#allocation3 + $0x38] sm:$0xff] %vm2206_vm3, %v2203_v19  ;;  %5660 = vmatpush1.bf16.msra.mxu1 %v6984_v43  ;;  %2409 = vmatprep.mubr.f32.mxu1 %v6256_v9 }
 0x460   : > { %5662 = vmatprep.subr.bf16.mxu1 %v6986_v47 }
 0x463   : > { %5664 = vmatpush1.bf16.msra.mxu1 %v7004_v22 }
 0x464   : > { %5666 = vmatprep.subr.bf16.mxu1 %v7007_v53 }
 0x467   : > { %5668 = vmatpush1.bf16.msra.mxu1 %v7024_v0 }
 0x468   : > { %5670 = vmatprep.subr.bf16.mxu1 %v7027_v4 }
 0x46b   : > { %5672 = vmatpush1.bf16.msra.mxu1 %v7039_v15 }
 0x46c   : > { %5674 = vmatprep.subr.bf16.mxu1 %v6958_v12 }
 0x531   : > { %v2289_v20 = vpop.f32.mrb[18].mxu1 }
 0x532   : > { %v2294_v58 = vadd.f32 %v2289_v20, %v2218_v38  ;;  %v2291_v61 = vpop.f32.mrb[19].mxu1 }
 0x533   : > { %v2295_v63 = vadd.f32 %v2291_v61, %v2219_v40 }
 0x534   : > { %v4752_v3 = vmul.f32 -1.442695, %v2294_v58 }
 0x535   : > { %6116 = vtanh.f32 %v2295_v63  ;;  %v4753_v40 = vmul.f32 -1.442695, %v2295_v63 }
 0x536   : > { %6118 = vpow2.f32 %v4752_v3 }
 0x53f   : > { %v6117_v1 = vpop.eup %6116 }
 0x540   : > { %2311 = vrot.lane.b32.xlu1 %v6117_v1, %s6257_s26  ;;  %v6119_v5 = vpop.eup %6118 }
 0x541   : > { %v2302_v6 = vadd.f32 1.0, %v6119_v5 }
 0x543   : > { %6120 = vrcp.f32 %v2302_v6 }
 0x54d   : > { %v6121_v10 = vpop.eup %6120 }
 0x54e   : > { %v2309_v36 = vmul.f32 %v6121_v10, %v2197_v34 }
 0x5b2   : > { %v2312_v26 = vpop.permute.xlu1 %2311 }
 0x5b3   : > { %v2314_v28 = vmul.f32 %v6121_v10, %v2312_v26 }
 0x5b5   : > { %2316 = vrot.lane.b32.xlu0 %v2314_v28, %s6257_s26 }
 0x627   : > { %v2317_v42 = vpop.permute.xlu0 %2316 }
 0x628   : > { %v2319_v46 = vadd.f32 %v2317_v42, %v2309_v36 }
 0x62a   : > { %6122 = vtanh.f32 %v2319_v46 }
 0x62b   : > { %6124 = vpow2.f32 %v4753_v40 }
 0x634   : > { %v6123_v38 = vpop.eup %6122 }
 0x635   : > { %2322 = vrot.lane.b32.xlu1 %v6123_v38, %s6257_s26  ;;  %v6125_v21 = vpop.eup %6124 }
 0x636   : > { %v2303_v56 = vadd.f32 1.0, %v6125_v21 }
 0x638   : > { %6126 = vrcp.f32 %v2303_v56 }
 0x642   : > { %v6127_v49 = vpop.eup %6126 }
 0x6a7   : > { %v2323_v19 = vpop.permute.xlu1 %2322 }
 0x6a8   : > { %v2325_v20 = vmul.f32 %v6127_v49, %v2323_v19 }
 0x6aa   : > { %2327 = vst.msk [vmem:[#allocation3 + $0x8] sm:$0xff] %vm678_vm0, %v2325_v20  ;;  %4754 = vmatmul.mubr.msk.f32.vlgmr.msra.gmra.mrb[20].mxu1 %vm2097_vm4, %v2325_v20 }
 0x6ab   : > { %2329 = vst.msk [vmem:[#allocation3 + $0x30] sm:$0xff] %vm2206_vm3, %v2325_v20  ;;  %5676 = vmatpush1.bf16.msra.mxu1 %v6984_v43  ;;  %2531 = vmatprep.mubr.f32.mxu1 %v6256_v9 }
 0x6ac   : > { %5678 = vmatprep.subr.bf16.mxu1 %v6986_v47 }
 0x6af   : > { %5680 = vmatpush1.bf16.msra.mxu1 %v7004_v22 }
 0x6b0   : > { %5682 = vmatprep.subr.bf16.mxu1 %v7007_v53 }
 0x6b3   : > { %5684 = vmatpush1.bf16.msra.mxu1 %v7024_v0 }
 0x6b4   : > { %5686 = vmatprep.subr.bf16.mxu1 %v7027_v4 }
 0x6b7   : > { %5688 = vmatpush1.bf16.msra.mxu1 %v7039_v15 }
 0x6b8   : > { %5690 = vmatprep.subr.bf16.mxu1 %v6958_v12 }
 0x77d   : > { %v2411_v34 = vpop.f32.mrb[20].mxu1 }
 0x77e   : > { %v2416_v58 = vadd.f32 %v2411_v34, %v2340_v30  ;;  %v2413_v61 = vpop.f32.mrb[21].mxu1 }
 0x77f   : > { %v2417_v63 = vadd.f32 %v2413_v61, %v2341_v32 }
 0x780   : > { %v4755_v3 = vmul.f32 -1.442695, %v2416_v58 }
 0x781   : > { %6128 = vtanh.f32 %v2417_v63  ;;  %v4756_v32 = vmul.f32 -1.442695, %v2417_v63 }
 0x782   : > { %6130 = vpow2.f32 %v4755_v3 }
 0x78b   : > { %v6129_v1 = vpop.eup %6128 }
 0x78c   : > { %2433 = vrot.lane.b32.xlu0 %v6129_v1, %s6257_s26  ;;  %v6131_v5 = vpop.eup %6130 }
 0x78d   : > { %v2424_v6 = vadd.f32 1.0, %v6131_v5 }
 0x78f   : > { %6132 = vrcp.f32 %v2424_v6 }
 0x799   : > { %v6133_v10 = vpop.eup %6132 }
 0x79a   : > { %v2431_v30 = vmul.f32 %v6133_v10, %v2319_v46 }
 0x7fe   : > { %v2434_v26 = vpop.permute.xlu0 %2433 }
 0x7ff   : > { %v2436_v28 = vmul.f32 %v6133_v10, %v2434_v26 }
 0x801   : > { %2438 = vrot.lane.b32.xlu1 %v2436_v28, %s6257_s26 }
 0x873   : > { %v2439_v36 = vpop.permute.xlu1 %2438 }
 0x874   : > { %v2441_v42 = vadd.f32 %v2439_v36, %v2431_v30 }
 0x876   : > { %6134 = vtanh.f32 %v2441_v42 }
 0x877   : > { %6136 = vpow2.f32 %v4756_v32 }
 0x880   : > { %v6135_v38 = vpop.eup %6134 }
 0x881   : > { %2444 = vrot.lane.b32.xlu0 %v6135_v38, %s6257_s26  ;;  %v6137_v40 = vpop.eup %6136 }
 0x882   : > { %v2425_v21 = vadd.f32 1.0, %v6137_v40 }
 0x884   : > { %6138 = vrcp.f32 %v2425_v21 }
 0x88e   : > { %v6139_v56 = vpop.eup %6138 }
 0x8f3   : > { %v2445_v49 = vpop.permute.xlu0 %2444 }
 0x8f4   : > { %v2447_v19 = vmul.f32 %v6139_v56, %v2445_v49 }
 0x8f6   : > { %2449 = vst.msk [vmem:[#allocation3 + $0x10] sm:$0xff] %vm678_vm0, %v2447_v19  ;;  %4757 = vmatmul.mubr.msk.f32.vlgmr.msra.gmra.mrb[22].mxu1 %vm2097_vm4, %v2447_v19 }
 0x8f7   : > { %2451 = vst.msk [vmem:[#allocation3 + $0x28] sm:$0xff] %vm2206_vm3, %v2447_v19  ;;  %5692 = vmatpush1.bf16.msra.mxu1 %v6984_v43  ;;  %2647 = vmatprep.mubr.f32.mxu1 %v6256_v9 }
 0x8f8   : > { %5694 = vmatprep.subr.bf16.mxu1 %v6986_v47 }
 0x8fb   : > { %5696 = vmatpush1.bf16.msra.mxu1 %v7004_v22 }
 0x8fc   : > { %5698 = vmatprep.subr.bf16.mxu1 %v7007_v53 }
 0x8ff   : > { %5700 = vmatpush1.bf16.msra.mxu1 %v7024_v0 }
 0x900   : > { %5702 = vmatprep.subr.bf16.mxu1 %v7027_v4 }
 0x903   : > { %5704 = vmatpush1.bf16.msra.mxu1 %v7039_v15 }
 0x904   : > { %5706 = vmatprep.subr.bf16.mxu1 %v6958_v12 }
 0x9c9   : > { %v2533_v46 = vpop.f32.mrb[22].mxu1 }
 0x9ca   : > { %v2538_v20 = vadd.f32 %v2533_v46, %v2462_v16  ;;  %v2535_v34 = vpop.f32.mrb[23].mxu1 }
 0x9cb   : > { %v2539_v58 = vadd.f32 %v2535_v34, %v2463_v18 }
 0x9cc   : > { %v4758_v63 = vmul.f32 -1.442695, %v2538_v20 }
 0x9cd   : > { %6140 = vtanh.f32 %v2539_v58  ;;  %v4759_v18 = vmul.f32 -1.442695, %v2539_v58 }
 0x9ce   : > { %6142 = vpow2.f32 %v4758_v63 }
 0x9d7   : > { %v6141_v61 = vpop.eup %6140 }
 0x9d8   : > { %2555 = vrot.lane.b32.xlu1 %v6141_v61, %s6257_s26  ;;  %v6143_v1 = vpop.eup %6142 }
 0x9d9   : > { %v2546_v3 = vadd.f32 1.0, %v6143_v1 }
 0x9db   : > { %6144 = vrcp.f32 %v2546_v3 }
 0x9e5   : > { %v6145_v5 = vpop.eup %6144 }
 0x9e6   : > { %v2553_v16 = vmul.f32 %v6145_v5, %v2441_v42 }
 0xa4a   : > { %v2556_v6 = vpop.permute.xlu1 %2555 }
 0xa4b   : > { %v2558_v10 = vmul.f32 %v6145_v5, %v2556_v6 }
 0xa4d   : > { %2560 = vrot.lane.b32.xlu0 %v2558_v10, %s6257_s26 }
 0xabf   : > { %v2561_v26 = vpop.permute.xlu0 %2560 }
 0xac0   : > { %v2563_v28 = vadd.f32 %v2561_v26, %v2553_v16 }
 0xac2   : > { %6146 = vtanh.f32 %v2563_v28 }
 0xac3   : > { %6148 = vpow2.f32 %v4759_v18 }
 0xacc   : > { %v6147_v30 = vpop.eup %6146 }
 0xacd   : > { %2566 = vrot.lane.b32.xlu1 %v6147_v30, %s6257_s26  ;;  %v6149_v36 = vpop.eup %6148 }
 0xace   : > { %v2547_v38 = vadd.f32 1.0, %v6149_v36 }
 0xad0   : > { %6150 = vrcp.f32 %v2547_v38 }
 0xada   : > { %v6151_v32 = vpop.eup %6150 }
 0xb3f   : > { %v2567_v40 = vpop.permute.xlu1 %2566 }
 0xb40   : > { %v2569_v21 = vmul.f32 %v6151_v32, %v2567_v40 }
 0xb42   : > { %2571 = vst.msk [vmem:[#allocation3 + $0x18] sm:$0xff] %vm678_vm0, %v2569_v21  ;;  %4760 = vmatmul.mubr.msk.f32.vlgmr.msra.gmra.mrb[24].mxu1 %vm2097_vm4, %v2569_v21 }
 0xb43   : > { %2573 = vst.msk [vmem:[#allocation3 + $0x20] sm:$0xff] %vm2206_vm3, %v2569_v21  ;;  %5708 = vmatpush1.bf16.msra.mxu1 %v6984_v43  ;;  %2761 = vmatprep.mubr.f32.mxu1 %v6256_v9 }
 0xb44   : > { %5710 = vmatprep.subr.bf16.mxu1 %v6986_v47 }
 0xb47   : > { %5712 = vmatpush1.bf16.msra.mxu1 %v7004_v22 }
 0xb48   : > { %5714 = vmatprep.subr.bf16.mxu1 %v7007_v53 }
 0xb4b   : > { %5716 = vmatpush1.bf16.msra.mxu1 %v7024_v0 }
 0xb4c   : > { %5718 = vmatprep.subr.bf16.mxu1 %v7027_v4 }
 0xb4f   : > { %5720 = vmatpush1.bf16.msra.mxu1 %v7039_v15 }
 0xb50   : > { %5722 = vmatprep.subr.bf16.mxu1 %v6958_v12 }
 0xc15   : > { %v2649_v42 = vpop.f32.mrb[24].mxu1 }
 0xc16   : > { %v2654_v56 = vadd.f32 %v2649_v42, %v2578_v17  ;;  %v2651_v49 = vpop.f32.mrb[25].mxu1 }
 0xc17   : > { %v2655_v19 = vadd.f32 %v2651_v49, %v2579_v25 }
 0xc18   : > { %v4761_v20 = vmul.f32 -1.442695, %v2654_v56 }
 0xc19   : > { %6152 = vtanh.f32 %v2655_v19  ;;  %v4762_v14 = vmul.f32 -1.442695, %v2655_v19 }
 0xc1a   : > { %6154 = vpow2.f32 %v4761_v20 }
 0xc23   : > { %v6153_v46 = vpop.eup %6152 }
 0xc24   : > { %2671 = vrot.lane.b32.xlu0 %v6153_v46, %s6257_s26  ;;  %v6155_v34 = vpop.eup %6154 }
 0xc25   : > { %v2662_v58 = vadd.f32 1.0, %v6155_v34 }
 0xc27   : > { %6156 = vrcp.f32 %v2662_v58 }
 0xc31   : > { %v6157_v61 = vpop.eup %6156 }
 0xc32   : > { %v2669_v8 = vmul.f32 %v6157_v61, %v2563_v28 }
 0xc96   : > { %v2672_v63 = vpop.permute.xlu0 %2671 }
 0xc97   : > { %v2674_v62 = vmul.f32 %v6157_v61, %v2672_v63 }
 0xc99   : > { %2676 = vrot.lane.b32.xlu1 %v2674_v62, %s6257_s26 }
 0xd0b   : > { %v2677_v17 = vpop.permute.xlu1 %2676 }
 0xd0c   : > { %v2679_v1 = vadd.f32 %v2677_v17, %v2669_v8 }
 0xd0e   : > { %6158 = vtanh.f32 %v2679_v1 }
 0xd0f   : > { %6160 = vpow2.f32 %v4762_v14 }
 0xd18   : > { %v6159_v2 = vpop.eup %6158 }
 0xd19   : > { %2682 = vrot.lane.b32.xlu0 %v6159_v2, %s6257_s26  ;;  %v6161_v25 = vpop.eup %6160 }
 0xd1a   : > { %v2663_v3 = vadd.f32 1.0, %v6161_v25 }
 0xd1c   : > { %6162 = vrcp.f32 %v2663_v3 }
 0xd26   : > { %v6163_v5 = vpop.eup %6162 }
 0xd8b   : > { %v2683_v6 = vpop.permute.xlu0 %2682 }
 0xd8c   : > { %v2685_v10 = vmul.f32 %v6163_v5, %v2683_v6 }
 0xd8e   : > { %2686 = vst.msk [vmem:[#allocation3 + $0x20] sm:$0xff] %vm678_vm0, %v2685_v10  ;;  %4763 = vmatmul.mubr.msk.f32.vlgmr.msra.gmra.mrb[26].mxu1 %vm2097_vm4, %v2685_v10 }
 0xd8f   : > { %2687 = vst.msk [vmem:[#allocation3 + $0x18] sm:$0xff] %vm2206_vm3, %v2685_v10  ;;  %5724 = vmatpush1.bf16.msra.mxu1 %v6984_v43  ;;  %2875 = vmatprep.mubr.f32.mxu1 %v6256_v9 }
 0xd90   : > { %5726 = vmatprep.subr.bf16.mxu1 %v6986_v47 }
 0xd93   : > { %5728 = vmatpush1.bf16.msra.mxu1 %v7004_v22 }
 0xd94   : > { %5730 = vmatprep.subr.bf16.mxu1 %v7007_v53 }
 0xd97   : > { %5732 = vmatpush1.bf16.msra.mxu1 %v7024_v0 }
 0xd98   : > { %5734 = vmatprep.subr.bf16.mxu1 %v7027_v4 }
 0xd9b   : > { %5736 = vmatpush1.bf16.msra.mxu1 %v7039_v15 }
 0xd9c   : > { %5738 = vmatprep.subr.bf16.mxu1 %v6958_v12 }
 0xe61   : > { %v2763_v16 = vpop.f32.mrb[26].mxu1 }
 0xe62   : > { %v2768_v26 = vadd.f32 %v2763_v16, %v2692_v31  ;;  %v2765_v28 = vpop.f32.mrb[27].mxu1  ;;  %v3045_v16 = vld [vmem:[%s7858_s6 + $0x38] sm:$0xff] }
 0xe63   : > { %v2769_v30 = vadd.f32 %v2765_v28, %v2693_v33 }
 0xe64   : > { %v4764_v36 = vmul.f32 -1.442695, %v2768_v26 }
 0xe65   : > { %6164 = vtanh.f32 %v2769_v30  ;;  %v4765_v29 = vmul.f32 -1.442695, %v2769_v30  ;;  %v3042_v30 = vld [vmem:[%s7858_s6 + $0x20] sm:$0xff] }
 0xe66   : > { %6166 = vpow2.f32 %v4764_v36 }
 0xe6f   : > { %v6165_v18 = vpop.eup %6164 }
 0xe70   : > { %2785 = vrot.lane.b32.xlu1 %v6165_v18, %s6257_s26  ;;  %v6167_v12 = vpop.eup %6166  ;;  %v3044_v18 = vld [vmem:[%s7858_s6 + $0x30] sm:$0xff] }
 0xe71   : > { %v2776_v38 = vadd.f32 1.0, %v6167_v12  ;;  %v5759_v36 = vpack.c.bf16 %v3044_v18, %v3042_v30 }
 0xe73   : > { %6168 = vrcp.f32 %v2776_v38 }
 0xe7d   : > { %v6169_v32 = vpop.eup %6168 }
 0xe7e   : > { %v2783_v27 = vmul.f32 %v6169_v32, %v2679_v1 }
 0xee2   : > { %v2786_v40 = vpop.permute.xlu1 %2785 }
 0xee3   : > { %v2788_v57 = vmul.f32 %v6169_v32, %v2786_v40  ;;  %v3047_v32 = vld [vmem:[%s7858_s6 + $0x48] sm:$0xff]  ;;  %v3049_v40 = vld [vmem:[%s7858_s6 + $0x58] sm:$0xff] }
 0xee5   : > { %2790 = vrot.lane.b32.xlu0 %v2788_v57, %s6257_s26 }
 0xf57   : > { %v2791_v31 = vpop.permute.xlu0 %2790 }
 0xf58   : > { %v2793_v21 = vadd.f32 %v2791_v31, %v2783_v27  ;;  %v5761_v27 = vpack.c.bf16 %v3049_v40, %v3047_v32  ;;  %v3046_v31 = vld [vmem:[%s7858_s6 + $0x40] sm:$0xff] }
 0xf5a   : > { %6170 = vtanh.f32 %v2793_v21 }
 0xf5b   : > { %6172 = vpow2.f32 %v4765_v29  ;;  %v3051_v29 = vld [vmem:[%s7858_s6 + $0x68] sm:$0xff] }
 0xf64   : > { %v6171_v59 = vpop.eup %6170 }
 0xf65   : > { %2796 = vrot.lane.b32.xlu1 %v6171_v59, %s6257_s26  ;;  %v6173_v33 = vpop.eup %6172 }
 0xf66   : > { %v2777_v42 = vadd.f32 1.0, %v6173_v33  ;;  %v3053_v33 = vld [vmem:[%s7858_s6 + $0x78] sm:$0xff] }
 0xf68   : > { %6174 = vrcp.f32 %v2777_v42  ;;  %v3050_v42 = vld [vmem:[%s7858_s6 + $0x60] sm:$0xff] }
 0xf72   : > { %v6175_v56 = vpop.eup %6174 }
 0xfd7   : > { %v2797_v49 = vpop.permute.xlu1 %2796 }
 0xfd8   : > { %v2799_v19 = vmul.f32 %v6175_v56, %v2797_v49  ;;  %v5765_v56 = vpack.c.bf16 %v3053_v33, %v3051_v29  ;;  %v3052_v49 = vld [vmem:[%s7858_s6 + $0x70] sm:$0xff] }
 0xfda   : > { %2800 = vst.msk [vmem:[#allocation3 + $0x28] sm:$0xff] %vm678_vm0, %v2799_v19  ;;  %4766 = vmatmul.mubr.msk.f32.vlgmr.msra.gmra.mrb[28].mxu1 %vm2097_vm4, %v2799_v19 }
 0xfdb   : > { %2801 = vst.msk [vmem:[#allocation3 + $0x10] sm:$0xff] %vm2206_vm3, %v2799_v19  ;;  %5740 = vmatpush1.bf16.msra.mxu1 %v6984_v43  ;;  %2989 = vmatprep.mubr.f32.mxu1 %v6256_v9  ;;  %v5767_v19 = vpack.c.bf16 %v3052_v49, %v3050_v42 }
 0xfdc   : > { %5742 = vmatprep.subr.bf16.mxu1 %v6986_v47 }
 0xfdf   : > { %5744 = vmatpush1.bf16.msra.mxu1 %v7004_v22 }
 0xfe0   : > { %5746 = vmatprep.subr.bf16.mxu1 %v7007_v53 }
 0xfe3   : > { %5748 = vmatpush1.bf16.msra.mxu1 %v7024_v0 }
 0xfe4   : > { %5750 = vmatprep.subr.bf16.mxu1 %v7027_v4 }
 0xfe7   : > { %5752 = vmatpush1.bf16.msra.mxu1 %v7039_v15 }
 0xfe8   : > { %5754 = vmatprep.subr.bf16.mxu1 %v5753_v52 }
0x10ad   : > { %v2877_v46 = vpop.f32.mrb[28].mxu1 }
0x10ae   : > { %v2882_v43 = vadd.f32 %v2877_v46, %v2806_v39  ;;  %v2879_v20 = vpop.f32.mrb[29].mxu1 }
0x10af   : > { %v2883_v47 = vadd.f32 %v2879_v20, %v2807_v41 }
0x10b0   : > { %v4767_v53 = vmul.f32 -1.442695, %v2882_v43 }
0x10b1   : > { %6176 = vtanh.f32 %v2883_v47  ;;  %v4768_v37 = vmul.f32 -1.442695, %v2883_v47 }
0x10b2   : > { %6178 = vpow2.f32 %v4767_v53 }
0x10bb   : > { %v6177_v22 = vpop.eup %6176 }
0x10bc   : > { %2899 = vrot.lane.b32.xlu0 %v6177_v22, %s6257_s26  ;;  %v6179_v0 = vpop.eup %6178 }
0x10bd   : > { %v2890_v4 = vadd.f32 1.0, %v6179_v0 }
0x10bf   : > { %6180 = vrcp.f32 %v2890_v4 }
0x10c9   : > { %v6181_v15 = vpop.eup %6180 }
0x10ca   : > { %v2897_v35 = vmul.f32 %v6181_v15, %v2793_v21  ;;  %v3048_v21 = vld [vmem:[%s7858_s6 + $0x50] sm:$0xff] }
0x10cb   : > { %v5763_v59 = vpack.c.bf16 %v3048_v21, %v3046_v31 }
0x112e   : > { %v2900_v34 = vpop.permute.xlu0 %2899 }
0x112f   : > { %v2902_v23 = vmul.f32 %v6181_v15, %v2900_v34  ;;  %v3032_v34 = vld [vmem:[#allocation3 + $0x10] sm:$0xff] }
0x1131   : > { %2904 = vrot.lane.b32.xlu1 %v2902_v23, %s6257_s26  ;;  %v3033_v23 = vld [vmem:[#allocation3 + $0x18] sm:$0xff] }
0x11a3   : > { %v2905_v39 = vpop.permute.xlu1 %2904 }
0x11a4   : > { %v2907_v58 = vadd.f32 %v2905_v39, %v2897_v35  ;;  %v3034_v35 = vld [vmem:[#allocation3 + $0x20] sm:$0xff]  ;;  %v3035_v39 = vld [vmem:[#allocation3 + $0x28] sm:$0xff] }
0x11a6   : > { %6182 = vtanh.f32 %v2907_v58 }
0x11a7   : > { %6184 = vpow2.f32 %v4768_v37  ;;  %v3054_v37 = vld [vmem:[%s7859_s7] sm:$0x3] }
0x11b0   : > { %v6183_v54 = vpop.eup %6182 }
0x11b1   : > { %2910 = vrot.lane.b32.xlu0 %v6183_v54, %s6257_s26  ;;  %v6185_v41 = vpop.eup %6184 }
0x11b2   : > { %v2891_v61 = vadd.f32 1.0, %v6185_v41  ;;  %v3059_v41 = vrot.slane %v3054_v37, %v1925_v51 }
0x11b4   : > { %6186 = vrcp.f32 %v2891_v61 }
0x11be   : > { %v6187_v63 = vpop.eup %6186 }
0x1223   : > { %v2911_v62 = vpop.permute.xlu0 %2910 }
0x1224   : > { %v2913_v8 = vmul.f32 %v6187_v63, %v2911_v62 }
0x1226   : > { %2914 = vst.msk [vmem:[#allocation3 + $0x30] sm:$0xff] %vm678_vm0, %v2913_v8  ;;  %4769 = vmatmul.mubr.msk.f32.vlgmr.msra.gmra.mrb[30].mxu1 %vm2097_vm4, %v2913_v8 }
0x1227   : > { %2915 = vst.msk [vmem:[#allocation3 + $0x8] sm:$0xff] %vm2206_vm3, %v2913_v8  ;;  %3154 = vmatprep.mubr.f32.mxu1 %v6256_v9  ;;  %v3063_v8 = vrot.slane %v3054_v37, %v1929_v55 }
0x122e   : > { %v3031_v15 = vld [vmem:[#allocation3 + $0x8] sm:$0xff] }
0x12f9   : > { %v2991_v17 = vpop.f32.mrb[30].mxu1 }
0x12fa   : > { %v2996_v1 = vadd.f32 %v2991_v17, %v2920_v24  ;;  %v2993_v2 = vpop.f32.mrb[31].mxu1  ;;  %v3040_v24 = vld [vmem:[%s7858_s6 + $0x10] sm:$0xff] }
0x12fb   : > { %v2997_v14 = vadd.f32 %v2993_v2, %v2921_v50  ;;  %v3043_v50 = vld [vmem:[%s7858_s6 + $0x28] sm:$0xff]  ;;  %v5755_v26 = vpack.c.bf16 %v3040_v24, %v3038_v13 }
0x12fc   : > { %v4770_v3 = vmul.f32 -1.442695, %v2996_v1  ;;  %v5757_v28 = vpack.c.bf16 %v3045_v16, %v3043_v50 }
0x12fd   : > { %6188 = vtanh.f32 %v2997_v14  ;;  %5756 = vmatpush1.bf16.msra.mxu1 %v5755_v26  ;;  %v4771_v43 = vmul.f32 -1.442695, %v2997_v14 }
0x12fe   : > { %6190 = vpow2.f32 %v4770_v3  ;;  %5758 = vmatprep.subr.bf16.mxu1 %v5757_v28 }
0x1301   : > { %5760 = vmatpush1.bf16.msra.mxu1 %v5759_v36 }
0x1302   : > { %5762 = vmatprep.subr.bf16.mxu1 %v5761_v27 }
0x1305   : > { %5764 = vmatpush1.bf16.msra.mxu1 %v5763_v59 }
0x1306   : > { %5766 = vmatprep.subr.bf16.mxu1 %v5765_v56 }
0x1307   : > { %v6189_v25 = vpop.eup %6188 }
0x1308   : > { %3013 = vrot.lane.b32.xlu1 %v6189_v25, %s6257_s26  ;;  %v6191_v5 = vpop.eup %6190 }
0x1309   : > { %v3004_v6 = vadd.f32 1.0, %v6191_v5  ;;  %5768 = vmatpush1.bf16.msra.mxu1 %v5767_v19 }
0x130b   : > { %6192 = vrcp.f32 %v3004_v6 }
0x1315   : > { %v6193_v7 = vpop.eup %6192 }
0x1316   : > { %v3011_v12 = vmul.f32 %v6193_v7, %v2907_v58  ;;  %v3036_v58 = vld [vmem:[#allocation3 + $0x30] sm:$0xff] }
0x137a   : > { %v3014_v10 = vpop.permute.xlu1 %3013 }
0x137b   : > { %v3016_v44 = vmul.f32 %v6193_v7, %v3014_v10 }
0x137d   : > { %3018 = vrot.lane.b32.xlu0 %v3016_v44, %s6257_s26 }
0x13ef   : > { %v3019_v38 = vpop.permute.xlu0 %3018 }
0x13f0   : > { %v3021_v57 = vadd.f32 %v3019_v38, %v3011_v12 }
0x13f2   : > { %6194 = vtanh.f32 %v3021_v57 }
0x13f3   : > { %6196 = vpow2.f32 %v4771_v43 }
0x13fc   : > { %v6195_v46 = vpop.eup %6194 }
0x13fd   : > { %3024 = vrot.lane.b32.xlu1 %v6195_v46, %s6257_s26  ;;  %v6197_v20 = vpop.eup %6196 }
0x13fe   : > { %v3005_v47 = vadd.f32 1.0, %v6197_v20 }
0x1400   : > { %6198 = vrcp.f32 %v3005_v47 }
0x140a   : > { %v6199_v22 = vpop.eup %6198 }
0x146f   : > { %v3025_v53 = vpop.permute.xlu1 %3024 }
0x1470   : > { %v3027_v0 = vmul.f32 %v6199_v22, %v3025_v53 }
0x1472   : > { %3028 = vst.msk [vmem:[#allocation3 + $0x38] sm:$0xff] %vm678_vm0, %v3027_v0  ;;  %vm6260_vm0 = vmmov 1  }
0x1473   : > { %3029 = vst.msk [vmem:[#allocation3] sm:$0xff] %vm2206_vm3, %v3027_v0  ;;  %vm5923_vm1 = vmpackc.low %vm4459_vm15, %vm6260_vm0  ;;  %vm4533_vm3 = vcmask 7168  }
0x1479   : > { %v3037_v54 = vld [vmem:[#allocation3 + $0x38] sm:$0xff] }
0x147a   : > { %v3030_v4 = vld [vmem:[#allocation3] sm:$0xff] }
0x147b   : > { %4772 = vmatmul.mubr.msk.f32.vlgmr.msra.gmra.mrb[32].mxu1 %vm2097_vm4, %v3030_v4 }
0x147c   : > { %3160 = vmatprep.mubr.f32.mxu1 %v6256_v9 }
0x147f   : > { %4773 = vmatmul.mubr.msk.f32.gmra.mrb[34].mxu1 %vm2097_vm4, %v3031_v15 }
0x1480   : > { %3166 = vmatprep.mubr.f32.mxu1 %v6256_v9 }
0x1483   : > { %4774 = vmatmul.mubr.msk.f32.gmra.mrb[36].mxu1 %vm2097_vm4, %v3032_v34 }
0x1484   : > { %3172 = vmatprep.mubr.f32.mxu1 %v6256_v9 }
0x1487   : > { %4775 = vmatmul.mubr.msk.f32.gmra.mrb[38].mxu1 %vm2097_vm4, %v3033_v23 }
0x1488   : > { %3178 = vmatprep.mubr.f32.mxu1 %v6256_v9 }
0x148b   : > { %4776 = vmatmul.mubr.msk.f32.gmra.mrb[40].mxu1 %vm2097_vm4, %v3034_v35 }
0x148c   : > { %3184 = vmatprep.mubr.f32.mxu1 %v6256_v9 }
0x148f   : > { %4777 = vmatmul.mubr.msk.f32.gmra.mrb[42].mxu1 %vm2097_vm4, %v3035_v39 }
0x1490   : > { %3190 = vmatprep.mubr.f32.mxu1 %v6256_v9 }
0x1493   : > { %4778 = vmatmul.mubr.msk.f32.gmra.mrb[44].mxu1 %vm2097_vm4, %v3036_v58 }
0x1494   : > { %3196 = vmatprep.mubr.f32.mxu1 %v6256_v9 }
0x1497   : > { %4779 = vmatmul.mubr.msk.f32.gmra.mrb[46].mxu1 %vm2097_vm4, %v3037_v54  ;;  %v3205_v54 = vadd.s32 8, %v7080_v48 }
0x1499   : > { %v3213_v37 = vsub.s32 %v3205_v54, %v7099_v60 }
0x154e   : > { %v3156_v61 = vpop.f32.mrb[32].mxu1 }
0x154f   : > { %v3157_v63 = vadd.f32 %v3156_v61, %v3059_v41  ;;  %v3158_v62 = vpop.f32.mrb[33].mxu1  ;;  %v3206_v61 = vadd.s32 16, %v7080_v48 }
0x1550   : > { %v3159_v14 = vadd.f32 %v3158_v62, %v3063_v8  ;;  %v3221_v62 = vand.u32 7, %v3213_v37 }
0x1551   : > { %5334 = vmatprep.mubr.msk.f32.mxu1 %vm2097_vm4, %v3157_v63 }
0x1552   : > { %v3162_v17 = vpop.f32.mrb[34].mxu1  ;;  %vm3229_vm6 = vcmp.eq.s32.totalorder %v3221_v62, 0 }
0x1553   : > { %v7431_v1 = vadd.f32 %v3162_v17, %v3059_v41  ;;  %v3164_v2 = vpop.f32.mrb[35].mxu1  ;;  %v3214_v17 = vsub.s32 %v3206_v61, %v7099_v60 }
0x1554   : > { %v3165_v25 = vadd.f32 %v3164_v2, %v3063_v8 }
0x1555   : > { %v6084_v3 = vpack.i.bf16 %v7431_v1, %v3157_v63  ;;  %v3207_v63 = vadd.s32 24, %v7080_v48 }
0x1556   : > { %v7434_v5 = vpack.c.bf16 %v3165_v25, %v3159_v14  ;;  %v3168_v6 = vpop.f32.mrb[36].mxu1  ;;  %v3209_v14 = vadd.s32 40, %v7080_v48 }
0x1557   : > { %v3170_v51 = vpop.f32.mrb[37].mxu1  ;;  %6085 = vrot.lane.b32.xlu0 %v6084_v3, %s6257_s26  ;;  %v3169_v10 = vadd.f32 %v3168_v6, %v3059_v41  ;;  %v3215_v2 = vsub.s32 %v3207_v63, %v7099_v60  ;;  %v3222_v6 = vand.u32 7, %v3214_v17 }
0x1558   : > { %v3171_v11 = vadd.f32 %v3170_v51, %v3063_v8 }
0x1559   : > { %vm3230_vm8 = vcmp.eq.s32.totalorder %v3222_v6, 0 }
0x155a   : > { %v3174_v7 = vpop.f32.mrb[38].mxu1 }
0x155b   : > { %v3175_v44 = vadd.f32 %v3174_v7, %v3059_v41  ;;  %v3176_v55 = vpop.f32.mrb[39].mxu1  ;;  %v3210_v7 = vadd.s32 48, %v7080_v48 }
0x155c   : > { %v3177_v45 = vadd.f32 %v3176_v55, %v3063_v8  ;;  %v3223_v55 = vand.u32 7, %v3215_v2 }
0x155d   : > { %v6089_v13 = vpack.i.bf16 %v3175_v44, %v3169_v10 }
0x155e   : > { %v5797_v52 = vpack.c.bf16 %v3177_v45, %v3171_v11  ;;  %v3180_v24 = vpop.f32.mrb[40].mxu1  ;;  %v3217_v11 = vsub.s32 %v3209_v14, %v7099_v60  ;;  %v3211_v45 = vadd.s32 56, %v7080_v48  ;;  %vm3231_vm9 = vcmp.eq.s32.totalorder %v3223_v55, 0 }
0x155f   : > { %v3182_v50 = vpop.f32.mrb[41].mxu1  ;;  %6090 = vrot.lane.b32.xlu1 %v6089_v13, %s6257_s26  ;;  %v3181_v26 = vadd.f32 %v3180_v24, %v3059_v41 }
0x1560   : > { %v3183_v18 = vadd.f32 %v3182_v50, %v3063_v8 }
0x1562   : > { %v3186_v16 = vpop.f32.mrb[42].mxu1 }
0x1563   : > { %v3187_v28 = vadd.f32 %v3186_v16, %v3059_v41  ;;  %v3188_v30 = vpop.f32.mrb[43].mxu1 }
0x1564   : > { %v3189_v36 = vadd.f32 %v3188_v30, %v3063_v8 }
0x1565   : > { %v6094_v12 = vpack.i.bf16 %v3187_v28, %v3181_v26 }
0x1566   : > { %v5801_v38 = vpack.c.bf16 %v3189_v36, %v3183_v18  ;;  %v3192_v32 = vpop.f32.mrb[44].mxu1  ;;  %v3225_v36 = vand.u32 7, %v3217_v11 }
0x1567   : > { %v3194_v40 = vpop.f32.mrb[45].mxu1  ;;  %6095 = vrot.lane.b32.xlu0 %v6094_v12, %s6257_s26  ;;  %v3193_v27 = vadd.f32 %v3192_v32, %v3059_v41  ;;  %v3219_v12 = vsub.s32 %v3211_v45, %v7099_v60 }
0x1568   : > { %v3195_v59 = vadd.f32 %v3194_v40, %v3063_v8  ;;  %vm3233_vm11 = vcmp.eq.s32.totalorder %v3225_v36, 0 }
0x156a   : > { %v3198_v57 = vpop.f32.mrb[46].mxu1 }
0x156b   : > { %v3199_v31 = vadd.f32 %v3198_v57, %v3059_v41  ;;  %v3200_v21 = vpop.f32.mrb[47].mxu1  ;;  %v3212_v41 = vsub.s32 %v7080_v48, %v7099_v60 }
0x156c   : > { %v3201_v29 = vadd.f32 %v3200_v21, %v3063_v8 }
0x156d   : > { %v6099_v33 = vpack.i.bf16 %v3199_v31, %v3193_v27  ;;  %v3220_v8 = vand.u32 7, %v3212_v41 }
0x156e   : > { %v5805_v42 = vpack.c.bf16 %v3201_v29, %v3195_v59  ;;  %v3227_v59 = vand.u32 7, %v3219_v12  ;;  %v3630_v12 = vld [vmem:[%s7860_s8] sm:$0xff] }
0x156f   : > { %6100 = vrot.lane.b32.xlu1 %v6099_v33, %s6257_s26  ;;  %vm3228_vm7 = vcmp.eq.s32.totalorder %v3220_v8, 0 }
0x1570   : > { %vm3235_vm13 = vcmp.eq.s32.totalorder %v3227_v59, 0  ;;  %v3632_v59 = vld [vmem:[%s7860_s8 + $0x10] sm:$0xff] }
0x15c9   : > { %v6086_v56 = vpop.permute.xlu0 %6085 }
0x15ca   : > { %v6088_v49 = vunpack.i.h.bf16 %v6086_v56  ;;  %v6087_v19 = vunpack.i.l.bf16 %v6086_v56 }
0x15cc   : > { %v5769_v43 = vpack.c.bf16 %v6088_v49, %v6087_v19 }
0x15ce   : > { %5771 = vmatprep.subr.msk.bf16.mxu1 %vm7442_vm5, %v5769_v43 }
0x15cf   : > { %5774 = vmatpush3.bf16.xpose.msk.msra.mxu1 %vm7442_vm5, %v5769_v43 }
0x15d1   : > { %v6091_v20 = vpop.permute.xlu1 %6090 }
0x15d2   : > { %v6093_v47 = vunpack.i.h.bf16 %v6091_v20  ;;  %v6092_v22 = vunpack.i.l.bf16 %v6091_v20 }
0x15d4   : > { %v5775_v53 = vpack.c.bf16 %v6093_v47, %v6092_v22 }
0x15d6   : > { %5777 = vmatprep.subr.msk.bf16.mxu1 %vm7442_vm5, %v5775_v53 }
0x15d7   : > { %5780 = vmatpush3.bf16.xpose.msk.msra.mxu1 %vm7442_vm5, %v5775_v53 }
0x15d9   : > { %v6096_v0 = vpop.permute.xlu0 %6095 }
0x15da   : > { %v6098_v4 = vunpack.i.h.bf16 %v6096_v0  ;;  %v6097_v15 = vunpack.i.l.bf16 %v6096_v0 }
0x15dc   : > { %v5781_v34 = vpack.c.bf16 %v6098_v4, %v6097_v15 }
0x15de   : > { %5783 = vmatprep.subr.msk.bf16.mxu1 %vm7442_vm5, %v5781_v34 }
0x15df   : > { %5786 = vmatpush3.bf16.xpose.msk.msra.mxu1 %vm7442_vm5, %v5781_v34 }
0x15e1   : > { %v6101_v23 = vpop.permute.xlu1 %6100 }
0x15e2   : > { %v6103_v35 = vunpack.i.h.bf16 %v6101_v23  ;;  %v6102_v39 = vunpack.i.l.bf16 %v6101_v23 }
0x15e4   : > { %v5787_v58 = vpack.c.bf16 %v6103_v35, %v6102_v39 }
0x15e6   : > { %5789 = vmatprep.subr.msk.bf16.mxu1 %vm7442_vm5, %v5787_v58 }
0x15e7   : > { %5792 = vmatpush3.bf16.xpose.msk.msra.mxu1 %vm7442_vm5, %v5787_v58 }
0x15e8   : > { %5794 = vmatprep.subr.bf16.mxu1 %v7434_v5 }
0x15ee   : > { %5335 = vmatmul.mubr.msk.f32.vlgmr.msra.gmra.mrb[48].mxu1 %vm2097_vm4, %v7431_v1  ;;  %v3208_v1 = vadd.s32 32, %v7080_v48 }
0x15ef   : > { %5337 = vmatprep.mubr.msk.f32.mxu1 %vm2097_vm4, %v3169_v10  ;;  %5796 = vmatpush3.bf16.msra.mxu1 %v7434_v5 }
0x15f0   : > { %5798 = vmatprep.subr.bf16.mxu1 %v5797_v52  ;;  %v3216_v51 = vsub.s32 %v3208_v1, %v7099_v60 }
0x15f2   : > { %5338 = vmatmul.mubr.msk.f32.gmra.mrb[50].mxu1 %vm2097_vm4, %v3175_v44 }
0x15f3   : > { %5340 = vmatprep.mubr.msk.f32.mxu1 %vm2097_vm4, %v3181_v26  ;;  %5800 = vmatpush3.bf16.msra.mxu1 %v5797_v52  ;;  %v3224_v26 = vand.u32 7, %v3216_v51 }
0x15f4   : > { %5802 = vmatprep.subr.bf16.mxu1 %v5801_v38 }
0x15f5   : > { %vm3232_vm10 = vcmp.eq.s32.totalorder %v3224_v26, 0 }
0x15f6   : > { %5341 = vmatmul.mubr.msk.f32.gmra.mrb[52].mxu1 %vm2097_vm4, %v3187_v28  ;;  %v3218_v28 = vsub.s32 %v3210_v7, %v7099_v60 }
0x15f7   : > { %5343 = vmatprep.mubr.msk.f32.mxu1 %vm2097_vm4, %v3193_v27  ;;  %5804 = vmatpush3.bf16.msra.mxu1 %v5801_v38 }
0x15f8   : > { %5806 = vmatprep.subr.bf16.mxu1 %v5805_v42  ;;  %v3226_v57 = vand.u32 7, %v3218_v28 }
0x15fa   : > { %5344 = vmatmul.mubr.msk.f32.gmra.mrb[54].mxu1 %vm2097_vm4, %v3199_v31  ;;  %vm3234_vm12 = vcmp.eq.s32.totalorder %v3226_v57, 0 }
0x15fb   : > { %5808 = vmatpush3.bf16.msra.mxu1 %v5805_v42 }
0x16c1   : > { %v5336_v25 = vpop.f32.mrb[48].mxu1 }
0x16c2   : > { %v3398_v3 = vmul.f32 0.125, %v5336_v25  ;;  %v3358_v5 = vpop.f32.mrb[49].mxu1 }
0x16c3   : > { %v3397_v10 = vmul.f32 0.125, %v3358_v5 }
0x16c4   : > { %v3406_v44 = vsel %vm3229_vm6, %v3398_v3, -1e+30 }
0x16c5   : > { %v5339_v13 = vpop.f32.mrb[50].mxu1  ;;  %v3416_v52 = vsel %vm2097_vm4, %v3406_v44, -inf  ;;  %v3405_v24 = vsel %vm3228_vm7, %v3397_v10, -1e+30 }
0x16c6   : > { %3417 = vmax.xlane.f32.xlu1 %v3416_v52  ;;  %v3368_v50 = vpop.f32.mrb[51].mxu1  ;;  %v3413_v16 = vsel %vm2097_vm4, %v3405_v24, -inf  ;;  %v3400_v30 = vmul.f32 0.125, %v5339_v13 }
0x16c7   : > { %v3399_v18 = vmul.f32 0.125, %v3368_v50  ;;  %3414 = vmax.xlane.f32.xlu0 %v3413_v16 }
0x16c8   : > { %v3408_v21 = vsel %vm3231_vm9, %v3400_v30, -1e+30 }
0x16c9   : > { %v5342_v48 = vpop.f32.mrb[52].mxu1  ;;  %v3407_v38 = vsel %vm3230_vm8, %v3399_v18, -1e+30  ;;  %v3422_v56 = vsel %vm2097_vm4, %v3408_v21, -inf }
0x16ca   : > { %v3378_v32 = vpop.f32.mrb[53].mxu1  ;;  %v3419_v40 = vsel %vm2097_vm4, %v3407_v38, -inf  ;;  %v3402_v27 = vmul.f32 0.125, %v5342_v48  ;;  %v3631_v48 = vld [vmem:[%s7860_s8 + $0x8] sm:$0xff] }
0x16cb   : > { %v3401_v31 = vmul.f32 0.125, %v3378_v32  ;;  %3420 = vmax.xlane.f32.xlu0 %v3419_v40 }
0x16cc   : > { %v3410_v46 = vsel %vm3233_vm11, %v3402_v27, -1e+30 }
0x16cd   : > { %v5345_v29 = vpop.f32.mrb[54].mxu1  ;;  %v3409_v33 = vsel %vm3232_vm10, %v3401_v31, -1e+30  ;;  %v3428_v20 = vsel %vm2097_vm4, %v3410_v46, -inf }
0x16ce   : > { %v3388_v42 = vpop.f32.mrb[55].mxu1  ;;  %v3425_v60 = vsel %vm2097_vm4, %v3409_v33, -inf  ;;  %v3404_v49 = vmul.f32 0.125, %v5345_v29  ;;  %v3633_v29 = vld [vmem:[%s7860_s8 + $0x18] sm:$0xff] }
0x16cf   : > { %v3403_v19 = vmul.f32 0.125, %v3388_v42  ;;  %3423 = vmax.xlane.f32.xlu0 %v3422_v56  ;;  %3426 = vmax.xlane.f32.xlu1 %v3425_v60 }
0x16d0   : > { %v3412_v22 = vsel %vm3235_vm13, %v3404_v49, -1e+30 }
0x16d1   : > { %v3411_v43 = vsel %vm3234_vm12, %v3403_v19, -1e+30  ;;  %v3434_v53 = vsel %vm2097_vm4, %v3412_v22, -inf  ;;  %v5813_v19 = vpack.c.bf16 %v3633_v29, %v3632_v59  ;;  %v3790_v59 = vld [vmem:[%s7862_s10 + $0x80] sm:$0xff]  ;;  %v3791_v29 = vld [vmem:[%s7862_s10 + $0x88] sm:$0xff] }
0x16d2   : > { %v3431_v47 = vsel %vm2097_vm4, %v3411_v43, -inf }
0x16d3   : > { %3429 = vmax.xlane.f32.xlu0 %v3428_v20  ;;  %3432 = vmax.xlane.f32.xlu1 %v3431_v47 }
0x16d7   : > { %3435 = vmax.xlane.f32.xlu0 %v3434_v53 }
0x1753   : > { %v3418_v0 = vpop.xlane.xlu1 %3417 }
0x1754   : > { %v3438_v4 = vsub.f32 %v3406_v44, %v3418_v0  ;;  %v3415_v15 = vpop.xlane.xlu0 %3414  ;;  %v3636_v0 = vld [vmem:[%s7860_s8 + $0x30] sm:$0xff] }
0x1755   : > { %v3437_v34 = vsub.f32 %v3405_v24, %v3415_v15 }
0x1756   : > { %v3447_v23 = vmul.f32 1.442695, %v3438_v4  ;;  %v3637_v4 = vld [vmem:[%s7860_s8 + $0x38] sm:$0xff] }
0x1757   : > { %v3445_v35 = vmul.f32 1.442695, %v3437_v34 }
0x1758   : > { %6200 = vpow2.f32 %v3447_v23  ;;  %v3421_v39 = vpop.xlane.xlu0 %3420 }
0x1759   : > { %6202 = vpow2.f32 %v3445_v35  ;;  %v3439_v58 = vsub.f32 %v3407_v38, %v3421_v39  ;;  %v5809_v38 = vpack.c.bf16 %v3631_v48, %v3630_v12  ;;  %v5821_v39 = vpack.c.bf16 %v3637_v4, %v3636_v0  ;;  %v3789_v12 = vld [vmem:[%s7862_s10 + $0x78] sm:$0xff]  ;;  %v3802_v0 = vld [vmem:[%s7862_s10 + $0xe0] sm:$0xff]  ;;  %v3803_v4 = vld [vmem:[%s7862_s10 + $0xe8] sm:$0xff] }
0x175b   : > { %v3449_v54 = vmul.f32 1.442695, %v3439_v58  ;;  %5810 = vmatprep.subr.bf16.mxu1 %v5809_v38 }
0x175c   : > { %v3424_v37 = vpop.xlane.xlu0 %3423  ;;  %v3427_v41 = vpop.xlane.xlu1 %3426 }
0x175d   : > { %6204 = vpow2.f32 %v3449_v54  ;;  %v3440_v61 = vsub.f32 %v3408_v21, %v3424_v37  ;;  %v3441_v63 = vsub.f32 %v3409_v33, %v3427_v41 }
0x175f   : > { %v3451_v62 = vmul.f32 1.442695, %v3440_v61  ;;  %v3453_v8 = vmul.f32 1.442695, %v3441_v63 }
0x1760   : > { %v3430_v17 = vpop.xlane.xlu0 %3429  ;;  %v3433_v1 = vpop.xlane.xlu1 %3432 }
0x1761   : > { %6206 = vpow2.f32 %v3451_v62  ;;  %v3442_v2 = vsub.f32 %v3410_v46, %v3430_v17  ;;  %v3443_v14 = vsub.f32 %v3411_v43, %v3433_v1  ;;  %v3634_v46 = vld [vmem:[%s7860_s8 + $0x20] sm:$0xff]  ;;  %v3635_v43 = vld [vmem:[%s7860_s8 + $0x28] sm:$0xff]  ;;  %v3776_v17 = vld [vmem:[%s7862_s10 + $0x10] sm:$0xff]  ;;  %v6258_v1 = vmov 0.0|0.0  }
0x1762   : > { %v6201_v25 = vpop.eup %6200  ;;  %6208 = vpow2.f32 %v3453_v8  ;;  %v5817_v53 = vpack.c.bf16 %v3635_v43, %v3634_v46  ;;  %v3774_v62 = vld [vmem:[%s7862_s10] sm:$0xff]  ;;  %v3775_v8 = vld [vmem:[%s7862_s10 + $0x8] sm:$0xff]  ;;  %5825 = vmatprep.subr.bf16.mxu0 %v6258_v1  ;;  %v3801_v46 = vld [vmem:[%s7862_s10 + $0xd8] sm:$0xff] }
0x1763   : > { %v6203_v3 = vpop.eup %6202  ;;  %v3455_v5 = vmul.f32 1.442695, %v3442_v2  ;;  %v3457_v6 = vmul.f32 1.442695, %v3443_v14  ;;  %v3464_v51 = vsel %vm2097_vm4, %v6201_v25, 0.0  ;;  %v5826_v2 = vpack.c.bf16 %v3775_v8, %v3774_v62  ;;  %v3777_v14 = vld [vmem:[%s7862_s10 + $0x18] sm:$0xff] }
0x1764   : > { %3465 = vadd.xlane.f32.xlu0 %v3464_v51  ;;  %v3436_v7 = vpop.xlane.xlu0 %3435  ;;  %v3461_v10 = vsel %vm2097_vm4, %v6203_v3, 0.0  ;;  %v3780_v51 = vld [vmem:[%s7862_s10 + $0x30] sm:$0xff] }
0x1765   : > { %6210 = vpow2.f32 %v3455_v5  ;;  %v3444_v44 = vsub.f32 %v3412_v22, %v3436_v7  ;;  %3462 = vadd.xlane.f32.xlu1 %v3461_v10  ;;  %5827 = vmatpush3.bf16.msra.mxu0 %v5826_v2  ;;  %v3779_v5 = vld [vmem:[%s7862_s10 + $0x28] sm:$0xff]  ;;  %v3781_v7 = vld [vmem:[%s7862_s10 + $0x38] sm:$0xff]  ;;  %v3814_v2 = vld [vmem:[%s7862_s10 + $0x140] sm:$0xff] }
0x1766   : > { %6212 = vpow2.f32 %v3457_v6  ;;  %5828 = vmatprep.subr.bf16.mxu0 %v6258_v1  ;;  %v5835_v10 = vpack.c.bf16 %v3781_v7, %v3780_v51 }
0x1767   : > { %v6205_v55 = vpop.eup %6204  ;;  %v3459_v11 = vmul.f32 1.442695, %v3444_v44  ;;  %v3782_v44 = vld [vmem:[%s7862_s10 + $0x40] sm:$0xff] }
0x1768   : > { %v3467_v45 = vsel %vm2097_vm4, %v6205_v55, 0.0 }
0x1769   : > { %6214 = vpow2.f32 %v3459_v11  ;;  %3468 = vadd.xlane.f32.xlu1 %v3467_v45 }
0x176b   : > { %v6207_v13 = vpop.eup %6206 }
0x176c   : > { %v6209_v52 = vpop.eup %6208  ;;  %v3470_v24 = vsel %vm2097_vm4, %v6207_v13, 0.0 }
0x176d   : > { %3471 = vadd.xlane.f32.xlu0 %v3470_v24  ;;  %v3473_v50 = vsel %vm2097_vm4, %v6209_v52, 0.0  ;;  %v3785_v24 = vld [vmem:[%s7862_s10 + $0x58] sm:$0xff] }
0x176e   : > { %3474 = vadd.xlane.f32.xlu1 %v3473_v50 }
0x176f   : > { %v6211_v16 = vpop.eup %6210 }
0x1770   : > { %v6213_v26 = vpop.eup %6212  ;;  %v3476_v28 = vsel %vm2097_vm4, %v6211_v16, 0.0 }
0x1771   : > { %3477 = vadd.xlane.f32.xlu0 %v3476_v28  ;;  %v3479_v30 = vsel %vm2097_vm4, %v6213_v26, 0.0 }
0x1772   : > { %3480 = vadd.xlane.f32.xlu1 %v3479_v30 }
0x1773   : > { %v6215_v18 = vpop.eup %6214 }
0x1774   : > { %v3482_v36 = vsel %vm2097_vm4, %v6215_v18, 0.0 }
0x1775   : > { %3483 = vadd.xlane.f32.xlu0 %v3482_v36  ;;  %v3788_v36 = vld [vmem:[%s7862_s10 + $0x70] sm:$0xff] }
0x17f1   : > { %v3466_v32 = vpop.xlane.xlu0 %3465 }
0x17f2   : > { %6216 = vrcp.f32 %v3466_v32  ;;  %v3463_v40 = vpop.xlane.xlu1 %3462  ;;  %v5847_v32 = vpack.c.bf16 %v3789_v12, %v3788_v36  ;;  %v3820_v36 = vld [vmem:[%s7862_s10 + $0x170] sm:$0xff]  ;;  %v3821_v12 = vld [vmem:[%s7862_s10 + $0x178] sm:$0xff] }
0x17f3   : > { %6218 = vrcp.f32 %v3463_v40 }
0x17f6   : > { %v3469_v57 = vpop.xlane.xlu1 %3468 }
0x17f7   : > { %6220 = vrcp.f32 %v3469_v57 }
0x17fa   : > { %v3472_v27 = vpop.xlane.xlu0 %3471 }
0x17fb   : > { %6222 = vrcp.f32 %v3472_v27  ;;  %v3475_v31 = vpop.xlane.xlu1 %3474  ;;  %v3798_v27 = vld [vmem:[%s7862_s10 + $0xc0] sm:$0xff] }
0x17fc   : > { %v6217_v21 = vpop.eup %6216  ;;  %6224 = vrcp.f32 %v3475_v31  ;;  %v3799_v31 = vld [vmem:[%s7862_s10 + $0xc8] sm:$0xff] }
0x17fd   : > { %v6219_v33 = vpop.eup %6218  ;;  %v3494_v60 = vmul.f32 %v6217_v21, %v6201_v25  ;;  %v5829_v25 = vpack.c.bf16 %v3777_v14, %v3776_v17  ;;  %v7615_v21 = vld [vmem:[%s7861_s9] ss:$0 sm:$0xff]  ;;  %v3815_v14 = vld [vmem:[%s7862_s10 + $0x148] sm:$0xff] }
0x17fe   : > { %v3478_v42 = vpop.xlane.xlu0 %3477  ;;  %v3493_v56 = vmul.f32 %v6219_v33, %v6203_v3  ;;  %v3778_v3 = vld [vmem:[%s7862_s10 + $0x20] sm:$0xff]  ;;  %v5886_v51 = vpack.c.bf16 %v3815_v14, %v3814_v2 }
0x17ff   : > { %6226 = vrcp.f32 %v3478_v42  ;;  %v3481_v49 = vpop.xlane.xlu1 %3480  ;;  %5830 = vmatpush3.bf16.msra.mxu0 %v5829_v25  ;;  %v5832_v6 = vpack.c.bf16 %v3779_v5, %v3778_v3  ;;  %v5862_v42 = vpack.c.bf16 %v3799_v31, %v3798_v27  ;;  %v3806_v25 = vld [vmem:[%s7862_s10 + $0x100] sm:$0xff]  ;;  %v3807_v3 = vld [vmem:[%s7862_s10 + $0x108] sm:$0xff] }
0x1800   : > { %6228 = vrcp.f32 %v3481_v49  ;;  %5362 = vmatprep.mubr.msk.f32.mxu1 %vm2097_vm4, %v3493_v56  ;;  %5831 = vmatprep.subr.bf16.mxu0 %v6258_v1  ;;  %v5850_v49 = vpack.c.bf16 %v3791_v29, %v3790_v59  ;;  %v3831_v27 = vld [vmem:[%s7862_s10 + $0x1c8] sm:$0xff]  ;;  %v3822_v31 = vld [vmem:[%s7862_s10 + $0x180] sm:$0xff] }
0x1801   : > { %v6221_v20 = vpop.eup %6220  ;;  %5363 = vmatmul.mubr.msk.f32.vlgmr.msra.gmra.mrb[56].mxu1 %vm2097_vm4, %v3494_v60  ;;  %v3823_v59 = vld [vmem:[%s7862_s10 + $0x188] sm:$0xff] }
0x1802   : > { %v3484_v47 = vpop.xlane.xlu0 %3483  ;;  %v3495_v22 = vmul.f32 %v6221_v20, %v6205_v55  ;;  %5812 = vmatpush3.bf16.msra.mxu1 %v5809_v38  ;;  %v3783_v55 = vld [vmem:[%s7862_s10 + $0x48] sm:$0xff]  ;;  %v3792_v20 = vld [vmem:[%s7862_s10 + $0x90] sm:$0xff] }
0x1803   : > { %6230 = vrcp.f32 %v3484_v47  ;;  %5814 = vmatprep.subr.bf16.mxu1 %v5813_v19  ;;  %5833 = vmatpush3.bf16.msra.mxu0 %v5832_v6  ;;  %v5838_v45 = vpack.c.bf16 %v3783_v55, %v3782_v44  ;;  %v3793_v47 = vld [vmem:[%s7862_s10 + $0x98] sm:$0xff]  ;;  %v3816_v44 = vld [vmem:[%s7862_s10 + $0x150] sm:$0xff] }
0x1804   : > { %5365 = vmatprep.mubr.msk.f32.mxu1 %vm2097_vm4, %v3495_v22  ;;  %5834 = vmatprep.subr.bf16.mxu0 %v6258_v1  ;;  %v3817_v55 = vld [vmem:[%s7862_s10 + $0x158] sm:$0xff] }
0x1805   : > { %v6223_v15 = vpop.eup %6222 }
0x1806   : > { %v6225_v34 = vpop.eup %6224  ;;  %v3496_v23 = vmul.f32 %v6223_v15, %v6207_v13  ;;  %5816 = vmatpush3.bf16.msra.mxu1 %v5813_v19  ;;  %v3800_v19 = vld [vmem:[%s7862_s10 + $0xd0] sm:$0xff]  ;;  %v3794_v15 = vld [vmem:[%s7862_s10 + $0xa0] sm:$0xff] }
0x1807   : > { %v3497_v35 = vmul.f32 %v6225_v34, %v6209_v52  ;;  %5818 = vmatprep.subr.bf16.mxu1 %v5817_v53  ;;  %5836 = vmatpush3.bf16.msra.mxu0 %v5835_v10  ;;  %v3784_v52 = vld [vmem:[%s7862_s10 + $0x50] sm:$0xff]  ;;  %v5865_v22 = vpack.c.bf16 %v3801_v46, %v3800_v19  ;;  %v3795_v34 = vld [vmem:[%s7862_s10 + $0xa8] sm:$0xff]  ;;  %v5874_v10 = vpack.c.bf16 %v3807_v3, %v3806_v25  ;;  %v3825_v46 = vld [vmem:[%s7862_s10 + $0x198] sm:$0xff] }
0x1808   : > { %5366 = vmatmul.mubr.msk.f32.gmra.mrb[58].mxu1 %vm2097_vm4, %v3496_v23  ;;  %5849 = vmatprep.subr.bf16.mxu0 %v6258_v1  ;;  %v5841_v50 = vpack.c.bf16 %v3785_v24, %v3784_v52  ;;  %v5889_v52 = vpack.c.bf16 %v3817_v55, %v3816_v44  ;;  %v3824_v19 = vld [vmem:[%s7862_s10 + $0x190] sm:$0xff] }
0x1809   : > { %v6227_v58 = vpop.eup %6226  ;;  %5368 = vmatprep.mubr.msk.f32.mxu1 %vm2097_vm4, %v3497_v35 }
0x180a   : > { %v6229_v54 = vpop.eup %6228  ;;  %v3498_v37 = vmul.f32 %v6227_v58, %v6211_v16  ;;  %5820 = vmatpush3.bf16.msra.mxu1 %v5817_v53  ;;  %v3786_v16 = vld [vmem:[%s7862_s10 + $0x60] sm:$0xff]  ;;  %v5853_v53 = vpack.c.bf16 %v3793_v47, %v3792_v20  ;;  %v5856_v58 = vpack.c.bf16 %v3795_v34, %v3794_v15  ;;  %v5901_v20 = vpack.c.bf16 %v3825_v46, %v3824_v19  ;;  %v3836_v34 = vld [vmem:[%s7862_s10 + $0x1f0] sm:$0xff] }
0x180b   : > { %v3499_v41 = vmul.f32 %v6229_v54, %v6213_v26  ;;  %5822 = vmatprep.subr.bf16.mxu1 %v5821_v39  ;;  %v3787_v26 = vld [vmem:[%s7862_s10 + $0x68] sm:$0xff]  ;;  %v3804_v54 = vld [vmem:[%s7862_s10 + $0xf0] sm:$0xff]  ;;  %v3834_v47 = vld [vmem:[%s7862_s10 + $0x1e0] sm:$0xff] }
0x180c   : > { %5369 = vmatmul.mubr.msk.f32.gmra.mrb[60].mxu1 %vm2097_vm4, %v3498_v37  ;;  %v3805_v37 = vld [vmem:[%s7862_s10 + $0xf8] sm:$0xff] }
0x180d   : > { %v6231_v61 = vpop.eup %6230  ;;  %5371 = vmatprep.mubr.msk.f32.mxu1 %vm2097_vm4, %v3499_v41  ;;  %v3796_v41 = vld [vmem:[%s7862_s10 + $0xb0] sm:$0xff]  ;;  %v5871_v8 = vpack.c.bf16 %v3805_v37, %v3804_v54 }
0x180e   : > { %v3500_v63 = vmul.f32 %v6231_v61, %v6215_v18  ;;  %5824 = vmatpush3.bf16.msra.mxu1 %v5821_v39  ;;  %v5844_v18 = vpack.c.bf16 %v3787_v26, %v3786_v16  ;;  %v5868_v39 = vpack.c.bf16 %v3803_v4, %v3802_v0  ;;  %v3797_v61 = vld [vmem:[%s7862_s10 + $0xb8] sm:$0xff]  ;;  %v3819_v16 = vld [vmem:[%s7862_s10 + $0x168] sm:$0xff]  ;;  %v3810_v26 = vld [vmem:[%s7862_s10 + $0x120] sm:$0xff] }
0x180f   : > { %5837 = vmatprep.subr.bf16.mxu1 %v6258_v1  ;;  %v5859_v17 = vpack.c.bf16 %v3797_v61, %v3796_v41  ;;  %v3827_v0 = vld [vmem:[%s7862_s10 + $0x1a8] sm:$0xff]  ;;  %v4447_v61 = vld [vmem:[%s7864_s12] sm:$0xff] }
0x1810   : > { %5372 = vmatmul.mubr.msk.f32.gmra.mrb[62].mxu1 %vm2097_vm4, %v3500_v63 }
0x18d4   : > { %v5364_v11 = vpop.f32.mrb[56].mxu1 }
0x18d5   : > { %v3591_v13 = vpop.f32.mrb[57].mxu1 }
0x18d6   : > { %5390 = vmatprep.mubr.msk.f32.mxu1 %vm2097_vm4, %v3591_v13  ;;  %v3809_v13 = vld [vmem:[%s7862_s10 + $0x118] sm:$0xff] }
0x18d7   : > { %5391 = vmatmul.mubr.msk.f32.vlgmr.msra.gmra.mrb[64].mxu1 %vm2097_vm4, %v5364_v11 }
0x18d8   : > { %5839 = vmatpush3.bf16.msra.mxu1 %v5838_v45  ;;  %v3808_v45 = vld [vmem:[%s7862_s10 + $0x110] sm:$0xff] }
0x18d9   : > { %5840 = vmatprep.subr.bf16.mxu1 %v6258_v1  ;;  %v5877_v24 = vpack.c.bf16 %v3809_v13, %v3808_v45 }
0x18db   : > { %v5367_v28 = vpop.f32.mrb[58].mxu1 }
0x18dc   : > { %v3601_v30 = vpop.f32.mrb[59].mxu1  ;;  %5842 = vmatpush3.bf16.msra.mxu1 %v5841_v50  ;;  %v3818_v50 = vld [vmem:[%s7862_s10 + $0x160] sm:$0xff] }
0x18dd   : > { %5393 = vmatprep.mubr.msk.f32.mxu1 %vm2097_vm4, %v3601_v30  ;;  %5843 = vmatprep.subr.bf16.mxu1 %v6258_v1  ;;  %v5892_v30 = vpack.c.bf16 %v3819_v16, %v3818_v50 }
0x18de   : > { %5394 = vmatmul.mubr.msk.f32.gmra.mrb[66].mxu1 %vm2097_vm4, %v5367_v28  ;;  %v3811_v28 = vld [vmem:[%s7862_s10 + $0x128] sm:$0xff] }
0x18df   : > { %v5370_v48 = vpop.f32.mrb[60].mxu1 }
0x18e0   : > { %v3611_v38 = vpop.f32.mrb[61].mxu1  ;;  %5845 = vmatpush3.bf16.msra.mxu1 %v5844_v18  ;;  %v5880_v18 = vpack.c.bf16 %v3811_v28, %v3810_v26 }
0x18e1   : > { %5396 = vmatprep.mubr.msk.f32.mxu1 %vm2097_vm4, %v3611_v38  ;;  %5846 = vmatprep.subr.bf16.mxu1 %v6258_v1  ;;  %v3813_v38 = vld [vmem:[%s7862_s10 + $0x138] sm:$0xff] }
0x18e2   : > { %5397 = vmatmul.mubr.msk.f32.gmra.mrb[68].mxu1 %vm2097_vm4, %v5370_v48  ;;  %v3812_v48 = vld [vmem:[%s7862_s10 + $0x130] sm:$0xff] }
0x18e3   : > { %v5373_v40 = vpop.f32.mrb[62].mxu1 }
0x18e4   : > { %v3621_v57 = vpop.f32.mrb[63].mxu1  ;;  %5848 = vmatpush3.bf16.msra.mxu1 %v5847_v32  ;;  %v5895_v32 = vpack.c.bf16 %v3821_v12, %v3820_v36 }
0x18e5   : > { %5399 = vmatprep.mubr.msk.f32.mxu1 %vm2097_vm4, %v3621_v57  ;;  %5861 = vmatprep.subr.bf16.mxu1 %v6258_v1  ;;  %v3830_v57 = vld [vmem:[%s7862_s10 + $0x1c0] sm:$0xff] }
0x18e6   : > { %5400 = vmatmul.mubr.msk.f32.gmra.mrb[70].mxu1 %vm2097_vm4, %v5373_v40  ;;  %v5883_v40 = vpack.c.bf16 %v3813_v38, %v3812_v48  ;;  %v5910_v29 = vpack.c.bf16 %v3831_v27, %v3830_v57  ;;  %v4821_v38 = vld [vmem:[%s7863_s11] ss:$0 sm:$0xff] }
0x18e7   : > { %5437 = vmatprep.mubr.msk.f32.mxu1 %vm6259_vm14, %v6256_v9  ;;  %v4822_v27 = vld [vmem:[#allocation4] ss:$0 sm:$0xff] }
0x19aa   : > { %v5392_v33 = vpop.f32.mrb[64].mxu1 }
0x19ab   : > { %v3741_v56 = vadd.f32 %v5392_v33, %v7615_v21  ;;  %v3735_v60 = vpop.f32.mrb[65].mxu1 }
0x19ac   : > { %v3736_v43 = vadd.f32 %v7615_v21, %v3735_v60  ;;  %v3833_v60 = vld [vmem:[%s7862_s10 + $0x1d8] sm:$0xff] }
0x19ad   : > { %5438 = vmatmul.mubr.msk.f32.vlgmr.msra.gmra.mrb[72].mxu1 %vm2097_vm4, %v3741_v56  ;;  %v3832_v56 = vld [vmem:[%s7862_s10 + $0x1d0] sm:$0xff] }
0x19ae   : > { %5863 = vmatpush3.bf16.msra.mxu1 %v5862_v42  ;;  %5419 = vmatmul.mubr.msk.f32.vlgmr.msra.gmra.mrb[32].mxu0 %vm2097_vm4, %v3736_v43  ;;  %v5898_v42 = vpack.c.bf16 %v3823_v59, %v3822_v31  ;;  %v5913_v43 = vpack.c.bf16 %v3833_v60, %v3832_v56 }
0x19af   : > { %5851 = vmatpush3.bf16.msra.mxu0 %v5850_v49  ;;  %5864 = vmatprep.subr.bf16.mxu1 %v6258_v1 }
0x19b0   : > { %5852 = vmatprep.subr.bf16.mxu0 %v6258_v1  ;;  %5475 = vmatprep.mubr.msk.f32.mxu1 %vm6259_vm14, %v6256_v9 }
0x19b1   : > { %v5395_v23 = vpop.f32.mrb[66].mxu1  ;;  %5456 = vmatprep.mubr.msk.f32.mxu0 %vm6259_vm14, %v6256_v9 }
0x19b2   : > { %5866 = vmatpush3.bf16.msra.mxu1 %v5865_v22  ;;  %v3745_v35 = vpop.f32.mrb[67].mxu1  ;;  %v3751_v7 = vadd.f32 %v5395_v23, %v7615_v21  ;;  %v3835_v22 = vld [vmem:[%s7862_s10 + $0x1e8] sm:$0xff]  ;;  %v3837_v23 = vld [vmem:[%s7862_s10 + $0x1f8] sm:$0xff] }
0x19b3   : > { %5854 = vmatpush3.bf16.msra.mxu0 %v5853_v53  ;;  %5867 = vmatprep.subr.bf16.mxu1 %v6258_v1  ;;  %v3746_v11 = vadd.f32 %v7615_v21, %v3745_v35  ;;  %v3826_v53 = vld [vmem:[%s7862_s10 + $0x1a0] sm:$0xff]  ;;  %v5916_v4 = vpack.c.bf16 %v3835_v22, %v3834_v47  ;;  %v3828_v35 = vld [vmem:[%s7862_s10 + $0x1b0] sm:$0xff] }
0x19b4   : > { %5855 = vmatprep.subr.bf16.mxu0 %v6258_v1  ;;  %v5904_v15 = vpack.c.bf16 %v3827_v0, %v3826_v53 }
0x19b5   : > { %v5398_v63 = vpop.f32.mrb[68].mxu1 }
0x19b6   : > { %5869 = vmatpush3.bf16.msra.mxu1 %v5868_v39  ;;  %v7671_v62 = vpop.f32.mrb[69].mxu1  ;;  %v3761_v33 = vadd.f32 %v5398_v63, %v7615_v21  ;;  %v3829_v39 = vld [vmem:[%s7862_s10 + $0x1b8] sm:$0xff]  ;;  %v4448_v63 = vld [vmem:[%s7864_s12 + $0x8] sm:$0x3] }
0x19b7   : > { %5857 = vmatpush3.bf16.msra.mxu0 %v5856_v58  ;;  %5870 = vmatprep.subr.bf16.mxu1 %v6258_v1  ;;  %v3756_v49 = vadd.f32 %v7615_v21, %v7671_v62  ;;  %v5919_v58 = vpack.c.bf16 %v3837_v23, %v3836_v34  ;;  %v5907_v54 = vpack.c.bf16 %v3829_v39, %v3828_v35 }
0x19b8   : > { %5858 = vmatprep.subr.bf16.mxu0 %v6258_v1  ;;  %v5922_v62 = vpack.c.bf16 %v4448_v63, %v4447_v61 }
0x19b9   : > { %v7687_v5 = vpop.f32.mrb[70].mxu1 }
0x19ba   : > { %5872 = vmatpush3.bf16.msra.mxu1 %v5871_v8  ;;  %v7689_v6 = vpop.f32.mrb[71].mxu1  ;;  %v3771_v37 = vadd.f32 %v7687_v5, %v7615_v21 }
0x19bb   : > { %5860 = vmatpush3.bf16.msra.mxu0 %v5859_v17  ;;  %5885 = vmatprep.subr.bf16.mxu1 %v6258_v1  ;;  %v3766_v41 = vadd.f32 %v7615_v21, %v7689_v6 }
0x19bc   : > { %5873 = vmatprep.subr.bf16.mxu0 %v6258_v1 }
0x19bd   : > { %5476 = vmatmul.mubr.msk.f32.vlgmr.msra.gmra.mrb[74].mxu1 %vm2097_vm4, %v3751_v7 }
0x19be   : > { %5457 = vmatmul.mubr.msk.f32.vlgmr.msra.gmra.mrb[34].mxu0 %vm2097_vm4, %v3746_v11  ;;  %5887 = vmatpush3.bf16.msra.mxu1 %v5886_v51 }
0x19bf   : > { %5875 = vmatpush3.bf16.msra.mxu0 %v5874_v10  ;;  %5888 = vmatprep.subr.bf16.mxu1 %v6258_v1 }
0x19c0   : > { %5876 = vmatprep.subr.bf16.mxu0 %v6258_v1  ;;  %5513 = vmatprep.mubr.msk.f32.mxu1 %vm6259_vm14, %v6256_v9 }
0x19c1   : > { %5494 = vmatprep.mubr.msk.f32.mxu0 %vm6259_vm14, %v6256_v9 }
0x19c2   : > { %5890 = vmatpush3.bf16.msra.mxu1 %v5889_v52 }
0x19c3   : > { %5878 = vmatpush3.bf16.msra.mxu0 %v5877_v24  ;;  %5891 = vmatprep.subr.bf16.mxu1 %v6258_v1 }
0x19c4   : > { %5879 = vmatprep.subr.bf16.mxu0 %v6258_v1 }
0x19c6   : > { %5893 = vmatpush3.bf16.msra.mxu1 %v5892_v30 }
0x19c7   : > { %5881 = vmatpush3.bf16.msra.mxu0 %v5880_v18  ;;  %5894 = vmatprep.subr.bf16.mxu1 %v6258_v1 }
0x19c8   : > { %5882 = vmatprep.subr.bf16.mxu0 %v6258_v1 }
0x19ca   : > { %5896 = vmatpush3.bf16.msra.mxu1 %v5895_v32 }
0x19cb   : > { %5884 = vmatpush3.bf16.msra.mxu0 %v5883_v40  ;;  %5909 = vmatprep.subr.bf16.mxu1 %v6258_v1 }
0x19cc   : > { %5897 = vmatprep.subr.bf16.mxu0 %v6258_v1 }
0x19cd   : > { %5514 = vmatmul.mubr.msk.f32.vlgmr.msra.gmra.mrb[76].mxu1 %vm2097_vm4, %v3761_v33 }
0x19ce   : > { %5495 = vmatmul.mubr.msk.f32.vlgmr.msra.gmra.mrb[36].mxu0 %vm2097_vm4, %v3756_v49  ;;  %5911 = vmatpush3.bf16.msra.mxu1 %v5910_v29 }
0x19cf   : > { %5899 = vmatpush3.bf16.msra.mxu0 %v5898_v42  ;;  %5912 = vmatprep.subr.bf16.mxu1 %v6258_v1 }
0x19d0   : > { %5900 = vmatprep.subr.bf16.mxu0 %v6258_v1  ;;  %5551 = vmatprep.mubr.msk.f32.mxu1 %vm6259_vm14, %v6256_v9 }
0x19d1   : > { %5532 = vmatprep.mubr.msk.f32.mxu0 %vm6259_vm14, %v6256_v9 }
0x19d2   : > { %5914 = vmatpush3.bf16.msra.mxu1 %v5913_v43 }
0x19d3   : > { %5902 = vmatpush3.bf16.msra.mxu0 %v5901_v20  ;;  %5915 = vmatprep.subr.bf16.mxu1 %v6258_v1 }
0x19d4   : > { %5903 = vmatprep.subr.bf16.mxu0 %v6258_v1 }
0x19d6   : > { %5917 = vmatpush3.bf16.msra.mxu1 %v5916_v4 }
0x19d7   : > { %5905 = vmatpush3.bf16.msra.mxu0 %v5904_v15  ;;  %5918 = vmatprep.subr.bf16.mxu1 %v6258_v1 }
0x19d8   : > { %5906 = vmatprep.subr.bf16.mxu0 %v6258_v1 }
0x19da   : > { %5920 = vmatpush3.bf16.msra.mxu1 %v5919_v58 }
0x19db   : > { %5908 = vmatpush3.bf16.msra.mxu0 %v5907_v54 }
0x19dc   : > { %5921 = vmatprep.subr.bf16.mxu0 %v6258_v1 }
0x19dd   : > { %5552 = vmatmul.mubr.msk.f32.vlgmr.msra.gmra.mrb[78].mxu1 %vm2097_vm4, %v3771_v37 }
0x19de   : > { %5533 = vmatmul.mubr.msk.f32.vlgmr.msra.gmra.mrb[38].mxu0 %vm2097_vm4, %v3766_v41 }
0x19df   : > { %5558 = vmatprep.mubr.msk.f32.mxu0 %vm6259_vm14, %v6256_v9  ;;  %5924 = vmatpush3.bf16.msk.msra.mxu0 %vm5923_vm1, %v5922_v62 }
0x1a80   : > { %v3980_v1 = vpop.f32.mrb[72].mxu1 }
0x1a81   : > { %v4424_v21 = vsel %vm4422_vm2, %v3980_v1, 0.0  ;;  %v3907_v8 = vpop.f32.mrb[32].mxu0  ;;  %v5439_v17 = vpop.f32.mrb[73].mxu1 }
0x1a82   : > { %v4423_v9 = vsel %vm4422_vm2, %v3907_v8, 0.0  ;;  %v5420_v2 = vpop.f32.mrb[33].mxu0 }
0x1a83   : > { %v4425_v14 = vadd.f32 %v4424_v21, %v4423_v9 }
0x1a90   : > { %v4126_v25 = vpop.f32.mrb[74].mxu1 }
0x1a91   : > { %v4053_v3 = vpop.f32.mrb[34].mxu0  ;;  %v5477_v5 = vpop.f32.mrb[75].mxu1  ;;  %v4428_v10 = vsel %vm4422_vm2, %v4126_v25, 0.0 }
0x1a92   : > { %v4426_v6 = vsel %vm4422_vm2, %v4053_v3, 0.0  ;;  %v5458_v51 = vpop.f32.mrb[35].mxu0 }
0x1a93   : > { %v4427_v7 = vadd.f32 %v4426_v6, %v4425_v14 }
0x1a95   : > { %v4429_v44 = vadd.f32 %v4428_v10, %v4427_v7 }
0x1aa0   : > { %v4272_v55 = vpop.f32.mrb[76].mxu1 }
0x1aa1   : > { %v4199_v11 = vpop.f32.mrb[36].mxu0  ;;  %v5515_v45 = vpop.f32.mrb[77].mxu1  ;;  %v4432_v50 = vsel %vm4422_vm2, %v4272_v55, 0.0 }
0x1aa2   : > { %v4430_v13 = vsel %vm4422_vm2, %v4199_v11, 0.0  ;;  %v5496_v52 = vpop.f32.mrb[37].mxu0 }
0x1aa3   : > { %v4431_v24 = vadd.f32 %v4430_v13, %v4429_v44 }
0x1aa5   : > { %v4433_v16 = vadd.f32 %v4432_v50, %v4431_v24 }
0x1ab0   : > { %v4418_v26 = vpop.f32.mrb[78].mxu1 }
0x1ab1   : > { %v4345_v28 = vpop.f32.mrb[38].mxu0  ;;  %v5553_v30 = vpop.f32.mrb[79].mxu1  ;;  %v4436_v48 = vsel %vm4422_vm2, %v4418_v26, 0.0 }
0x1ab2   : > { %v4434_v18 = vsel %vm4422_vm2, %v4345_v28, 0.0  ;;  %v5534_v36 = vpop.f32.mrb[39].mxu0 }
0x1ab3   : > { %v4435_v12 = vadd.f32 %v4434_v18, %v4433_v16 }
0x1ab5   : > { %v4437_v32 = vadd.f32 %v4436_v48, %v4435_v12 }
0x1ab7   : > { %v4445_v40 = vadd.f32 %v4821_v38, %v4437_v32 }
0x1ab9   : > { %v4446_v57 = vmax.f32 %v4445_v40, 0.0 }
0x1abb   : > { %5559 = vmatmul.mubr.msk.f32.vlgmr.msra.gmra.mrb[40].mxu0 %vm4422_vm2, %v4446_v57 }
0x1b8e   : > { %v4529_v31 = vpop.f32.mrb[40].mxu0 }
0x1b8f   : > { %v4530_v59 = vadd.f32 %v4822_v27, %v4529_v31  ;;  %v5560_v29 = vpop.f32.mrb[41].mxu0 }
0x1b91   : > { %4534 = vst.msk [vmem:[%s637_s27] sm:$0xff] %vm4533_vm3, %v4530_v59 }
0x1b92 PF: > { %p23_p9 = scmp.ge.s32.totalorder %s6356_s18, 4   ;;  %s7873_s15 = smov %s6250_s16 }
0x1b93   : > { %s7874_s16 = smov %s6365_s21  ;;  %s7875_s17 = smov %s6356_s18 }
0x1b94   :  { %25 = sbr.rel (!%p23_p9) target bundleno = 5 (0x5), region = 167 }

</bundles_post_ra>
